<compile_context>
chip_gen: v5e
topology: v5e:2x2
jax: 0.10.0
libtpu: 0.0.40
codegen_flags: <defaults>
</compile_context>

<pallas_src>
import functools

import jax
import jax.numpy as jnp
from jax.experimental import pallas as pl
from jax.experimental.pallas import tpu as pltpu

EPS = 1e-5


def _layer_norm_rows(y, gamma, beta):
    # y: (M, C) f32; per-pixel normalization over channels == PyTorch
    # LayerNorm2d (mean/var over dim=1 of NCHW, unbiased=False).
    # One-pass statistics: var = E[y^2] - mean^2 (f32, clamped >= 0).
    c = y.shape[-1]
    inv_c = 1.0 / c
    s1 = jnp.sum(y, axis=-1, keepdims=True)
    s2 = jnp.sum(y * y, axis=-1, keepdims=True)
    mean = s1 * inv_c
    var = jnp.maximum(s2 * inv_c - mean * mean, 0.0)
    return (y - mean) * jax.lax.rsqrt(var + EPS) * gamma + beta


def residual_block_kernel(xp_ref, w1_ref, w2_ref, g1_ref, b1_ref, g2_ref,
                          b2_ref, o_ref, *, im2col):
    # xp_ref : (1, H+4, W+2, C)  padded image (resident across strip steps), bf16/f32
    # wK_ref : (9*Ci, Co)        weight matrix, row = (kh, kw, ci)
    # gK/bK  : (1, Co)           LayerNorm2d affine params (f32)
    # o_ref  : (1, hs, W, Co)    output strip
    NB, HP4, WP, C = xp_ref.shape
    H, W = HP4 - 4, WP - 2
    _, hs, _, Co = o_ref.shape

    s = pl.program_id(1)
    n_strips = pl.num_programs(1)

    # Strip window: conv1 needs hs+2 output rows -> hs+4 input rows starting at
    # padded row s*hs (padded row = original row + 2).
    row0 = pl.multiple_of(s * hs, hs)
    xs = xp_ref[:, pl.ds(row0, hs + 4), :, :]           # (1, hs+4, W+2, C)

    def conv3x3(padded, w_ref, h_out):
        ci = padded.shape[-1]
        co = w_ref.shape[-1]
        m = NB * h_out * W
        if im2col:
            # small-C path: lane-concatenate the 9 taps -> one MXU matmul.
            taps = [padded[:, dy:dy + h_out, dx:dx + W, :]
                    for dy in range(3) for dx in range(3)]
            patches = jnp.concatenate(taps, axis=-1).reshape(m, 9 * ci)
            return jnp.dot(patches.astype(w_ref.dtype), w_ref[...],
                           preferred_element_type=jnp.float32)
        # large-C path: statically unrolled 9-tap accumulation; no 9x buffer,
        # no lane concat, each tap already has K = ci >= 128.
        acc = jnp.zeros((m, co), jnp.float32)
        for k in range(9):
            dy, dx = k // 3, k % 3
            tap = padded[:, dy:dy + h_out, dx:dx + W, :].reshape(m, ci)
            acc = acc + jnp.dot(tap.astype(w_ref.dtype),
                                w_ref[k * ci:(k + 1) * ci, :],
                                preferred_element_type=jnp.float32)
        return acc

    # conv1 -> LN -> ReLU on the strip + 1-row halo each side.
    # (the reference's second ReLU is a no-op: relu(relu(x)) == relu(x))
    y1 = conv3x3(xs, w1_ref, hs + 2)                    # (NB*(hs+2)*W, Co) f32
    y1 = _layer_norm_rows(y1, g1_ref[...], b1_ref[...])
    y1 = jnp.maximum(y1, 0.0)
    y1 = y1.reshape(NB, hs + 2, W, Co)

    # Halo rows outside the image must be exactly zero (they are conv2's zero
    # padding).  Per-step scalar scales — safe under "parallel" megacore.
    tz = jnp.where(s == 0, 0.0, 1.0).astype(y1.dtype)
    bz = jnp.where(s == n_strips - 1, 0.0, 1.0).astype(y1.dtype)
    y1 = jnp.concatenate(
        [y1[:, :1] * tz, y1[:, 1:hs + 1], y1[:, hs + 1:] * bz], axis=1)

    # Stage the intermediate in the MXU dtype (bf16 on the default path) and
    # add the zero pad columns for conv2.  No padded VMEM scratch needed.
    y1 = y1.astype(w2_ref.dtype)
    zcol = jnp.zeros((NB, hs + 2, 1, Co), y1.dtype)
    y1p = jnp.concatenate([zcol, y1, zcol], axis=2)     # (NB, hs+2, W+2, Co)

    y2 = conv3x3(y1p, w2_ref, hs)                       # (NB*hs*W, Co) f32
    y2 = _layer_norm_rows(y2, g2_ref[...], b2_ref[...])

    # Residual add (identity = unpadded interior of the strip) + final ReLU.
    ident = xs[:, 2:hs + 2, 1:W + 1, :].reshape(NB * hs * W, C).astype(jnp.float32)
    out = jnp.maximum(y2 + ident, 0.0)
    o_ref[...] = out.reshape(NB, hs, W, Co).astype(o_ref.dtype)


def _pick_strip_rows(H, W, C, N):
    """Largest divisor of H whose per-strip f32 temporaries fit a ~8 MiB budget,
    preferring >=128 MXU rows per strip and >=8 total grid steps (2 TCs)."""
    divs = sorted({d for d in range(1, H + 1) if H % d == 0}, reverse=True)

    def temp_bytes(hs):
        rows = hs + 2
        return 4 * (3 * rows * W * C + rows * (W + 2) * C)

    in_budget = [d for d in divs if temp_bytes(d) <= (8 << 20)] or [divs[-1]]
    for d in in_budget:                                  # big strips, enough steps
        if d * W >= 128 and N * (H // d) >= 8:
            return d
    for d in reversed(in_budget):                        # otherwise maximize steps
        if d * W >= 128 and N * (H // d) >= 2:
            return d
    return in_budget[0]


def residual_block(x_nchw, w1, w2, g1, b1, g2, b2, *, compute_dtype=jnp.bfloat16):
    """x_nchw: (N, C, H, W); wK: (Co, Ci, 3, 3); gK/bK: (Co,). Returns NCHW f32."""
    N, C, H, W = x_nchw.shape
    Co = w1.shape[0]
    assert Co == C, "identity add requires in_planes == out_planes (downsample=None)"

    hs = _pick_strip_rows(H, W, C, N)
    n_strips = H // hs
    use_im2col = C < 128   # small C: concat-im2col; large C: 9-tap accumulate

    # NCHW -> NHWC, cast to MXU dtype, pre-pad (H by 2 for the strip halo, W by 1).
    # TODO(synk): accept/return NHWC and fetch the halo in-kernel (manual DMA) to
    # drop the wrapper transpose/pad HBM round trips.
    x = jnp.transpose(x_nchw, (0, 2, 3, 1)).astype(compute_dtype)
    xp = jnp.pad(x, ((0, 0), (2, 2), (1, 1), (0, 0)))

    # (Co, Ci, 3, 3) -> (3, 3, Ci, Co) -> (9*Ci, Co); serves both conv paths.
    w1_k = jnp.transpose(w1, (2, 3, 1, 0)).reshape(9 * C, Co).astype(compute_dtype)
    w2_k = jnp.transpose(w2, (2, 3, 1, 0)).reshape(9 * Co, Co).astype(compute_dtype)
    g1_k = g1.reshape(1, Co).astype(jnp.float32)
    b1_k = b1.reshape(1, Co).astype(jnp.float32)
    g2_k = g2.reshape(1, Co).astype(jnp.float32)
    b2_k = b2.reshape(1, Co).astype(jnp.float32)

    kernel = functools.partial(residual_block_kernel, im2col=use_im2col)

    out = pl.pallas_call(
        kernel,
        out_shape=jax.ShapeDtypeStruct((N, H, W, Co), x_nchw.dtype),
        grid_spec=pltpu.PrefetchScalarGridSpec(
            num_scalar_prefetch=0,
            grid=(N, n_strips),
            in_specs=[
                # padded image: index_map ignores the strip axis -> DMA'd once
                # per batch element, resident across strip steps.
                pl.BlockSpec((1, H + 4, W + 2, C), lambda n, s: (n, 0, 0, 0)),
                pl.BlockSpec((9 * C, Co), lambda n, s: (0, 0)),
                pl.BlockSpec((9 * Co, Co), lambda n, s: (0, 0)),
                pl.BlockSpec((1, Co), lambda n, s: (0, 0)),
                pl.BlockSpec((1, Co), lambda n, s: (0, 0)),
                pl.BlockSpec((1, Co), lambda n, s: (0, 0)),
                pl.BlockSpec((1, Co), lambda n, s: (0, 0)),
            ],
            out_specs=pl.BlockSpec((1, hs, W, Co), lambda n, s: (n, s, 0, 0)),
        ),
        compiler_params=pltpu.CompilerParams(
            dimension_semantics=("parallel", "parallel"),
            vmem_limit_bytes=48 * 1024 * 1024),
    )(xp, w1_k, w2_k, g1_k, b1_k, g2_k, b2_k)
    # TODO(synk): for Co < 128, fold W into the lane axis (lane-dense out_spec)
    # or pad channels to a multiple of 128 to avoid masked vst on the output.
    return jnp.transpose(out, (0, 3, 1, 2))  # NHWC -> NCHW


def _xavier_uniform(key, co, ci, kh, kw):
    fan_in, fan_out = ci * kh * kw, co * kh * kw
    bound = (6.0 / (fan_in + fan_out)) ** 0.5
    return jax.random.uniform(key, (co, ci, kh, kw), jnp.float32, -bound, bound)


def _ref_forward(x, w1, w2, g1, b1, g2, b2):
    # pure-JAX reference of the PyTorch module (NCHW, f32)
    def conv(xx, w):
        return jax.lax.conv_general_dilated(
            xx, w, window_strides=(1, 1), padding=((1, 1), (1, 1)),
            dimension_numbers=('NCHW', 'OIHW', 'NCHW'))

    def ln2d(xx, g, b):
        mean = jnp.mean(xx, axis=1, keepdims=True)
        var = jnp.mean((xx - mean) ** 2, axis=1, keepdims=True)
        xn = (xx - mean) / jnp.sqrt(var + EPS)
        return xn * g.reshape(1, -1, 1, 1) + b.reshape(1, -1, 1, 1)

    out = conv(x, w1)
    out = jnp.maximum(ln2d(out, g1, b1), 0.0)
    out = jnp.maximum(out, 0.0)
    out = conv(out, w2)
    out = ln2d(out, g2, b2)
    out = out + x
    return jnp.maximum(out, 0.0)


if __name__ == "__main__":
    N, C, H, W = 2, 4, 16, 16
    key = jax.random.PRNGKey(0)
    kx, k1, k2 = jax.random.split(key, 3)

    x = jax.random.normal(kx, (N, C, H, W), jnp.float32)
    w1 = _xavier_uniform(k1, C, C, 3, 3)          # conv1 weight (Xavier uniform)
    w2 = _xavier_uniform(k2, C, C, 3, 3)          # conv2 weight
    g1 = jnp.ones((C,), jnp.float32)              # bn1 weight = 1
    b1 = jnp.zeros((C,), jnp.float32)             # bn1 bias   = 0
    g2 = jnp.ones((C,), jnp.float32)
    b2 = jnp.zeros((C,), jnp.float32)

    ref = jax.block_until_ready(_ref_forward(x, w1, w2, g1, b1, g2, b2))

    # Default bf16 MXU path (f32 accumulation): loose check vs f32 reference.
    out_bf16 = jax.block_until_ready(residual_block(x, w1, w2, g1, b1, g2, b2))
    assert out_bf16.shape == (N, C, H, W)
    assert jnp.allclose(out_bf16, ref, atol=2e-1, rtol=2e-1), "bf16 path diverged"

    # f32 path: strict check against the reference.
    out_f32 = jax.block_until_ready(
        residual_block(x, w1, w2, g1, b1, g2, b2, compute_dtype=jnp.float32))
    assert out_f32.shape == (N, C, H, W)
    assert jnp.allclose(out_f32, ref, atol=1e-3, rtol=1e-3), "f32 mismatch vs reference"

    print("KERNEL_OK")
</pallas_src>

<mosaic_0001>
module attributes {stable_mosaic.version = 11 : i64} {
  func.func @residual_block_kernel(%arg0: i32, %arg1: i32, %arg2: memref<1x20x18x4xbf16, #tpu.memory_space<vmem>>, %arg3: memref<36x4xbf16, #tpu.memory_space<vmem>>, %arg4: memref<36x4xbf16, #tpu.memory_space<vmem>>, %arg5: memref<1x4xf32, #tpu.memory_space<vmem>>, %arg6: memref<1x4xf32, #tpu.memory_space<vmem>>, %arg7: memref<1x4xf32, #tpu.memory_space<vmem>>, %arg8: memref<1x4xf32, #tpu.memory_space<vmem>>, %arg9: memref<1x8x16x4xf32, #tpu.memory_space<vmem>>) attributes {dimension_semantics = [#tpu.dimension_semantics<parallel>, #tpu.dimension_semantics<parallel>], iteration_bounds = array<i64: 2, 2>, scalar_prefetch = 0 : i64, scratch_operands = 0 : i64, tpu.core_type = #tpu.core_type<tc>, window_params = [{transform_indices = @transform_0, window_bounds = array<i64: 1, 20, 18, 4>}, {pipeline_mode = #tpu.pipeline_mode<synchronous>, transform_indices = @transform_1, window_bounds = array<i64: 36, 4>}, {pipeline_mode = #tpu.pipeline_mode<synchronous>, transform_indices = @transform_2, window_bounds = array<i64: 36, 4>}, {pipeline_mode = #tpu.pipeline_mode<synchronous>, transform_indices = @transform_3, window_bounds = array<i64: 1, 4>}, {pipeline_mode = #tpu.pipeline_mode<synchronous>, transform_indices = @transform_4, window_bounds = array<i64: 1, 4>}, {pipeline_mode = #tpu.pipeline_mode<synchronous>, transform_indices = @transform_5, window_bounds = array<i64: 1, 4>}, {pipeline_mode = #tpu.pipeline_mode<synchronous>, transform_indices = @transform_6, window_bounds = array<i64: 1, 4>}, {transform_indices = @transform_7, window_bounds = array<i64: 1, 8, 16, 4>}]} {
    %c8_i32 = arith.constant 8 : i32
    %0 = arith.muli %arg1, %c8_i32 : i32
    %1 = tpu.assume_multiple %0, 8 : i32
    %c0 = arith.constant 0 : index
    %2 = arith.index_cast %1 : i32 to index
    %c0_0 = arith.constant 0 : index
    %c0_1 = arith.constant 0 : index
    %3 = vector.load %arg2[%c0, %2, %c0_0, %c0_1] : memref<1x20x18x4xbf16, #tpu.memory_space<vmem>>, vector<1x12x18x4xbf16>
    %4 = vector.extract_strided_slice %3 {offsets = [0, 0, 0, 0], sizes = [1, 10, 16, 4], strides = [1, 1, 1, 1]} : vector<1x12x18x4xbf16> to vector<1x10x16x4xbf16>
    %5 = vector.extract_strided_slice %3 {offsets = [0, 0, 1, 0], sizes = [1, 10, 16, 4], strides = [1, 1, 1, 1]} : vector<1x12x18x4xbf16> to vector<1x10x16x4xbf16>
    %6 = vector.extract_strided_slice %3 {offsets = [0, 0, 2, 0], sizes = [1, 10, 16, 4], strides = [1, 1, 1, 1]} : vector<1x12x18x4xbf16> to vector<1x10x16x4xbf16>
    %7 = vector.extract_strided_slice %3 {offsets = [0, 1, 0, 0], sizes = [1, 10, 16, 4], strides = [1, 1, 1, 1]} : vector<1x12x18x4xbf16> to vector<1x10x16x4xbf16>
    %8 = vector.extract_strided_slice %3 {offsets = [0, 1, 1, 0], sizes = [1, 10, 16, 4], strides = [1, 1, 1, 1]} : vector<1x12x18x4xbf16> to vector<1x10x16x4xbf16>
    %9 = vector.extract_strided_slice %3 {offsets = [0, 1, 2, 0], sizes = [1, 10, 16, 4], strides = [1, 1, 1, 1]} : vector<1x12x18x4xbf16> to vector<1x10x16x4xbf16>
    %10 = vector.extract_strided_slice %3 {offsets = [0, 2, 0, 0], sizes = [1, 10, 16, 4], strides = [1, 1, 1, 1]} : vector<1x12x18x4xbf16> to vector<1x10x16x4xbf16>
    %11 = vector.extract_strided_slice %3 {offsets = [0, 2, 1, 0], sizes = [1, 10, 16, 4], strides = [1, 1, 1, 1]} : vector<1x12x18x4xbf16> to vector<1x10x16x4xbf16>
    %12 = vector.extract_strided_slice %3 {offsets = [0, 2, 2, 0], sizes = [1, 10, 16, 4], strides = [1, 1, 1, 1]} : vector<1x12x18x4xbf16> to vector<1x10x16x4xbf16>
    %13 = tpu.concatenate %4, %5, %6, %7, %8, %9, %10, %11, %12 in 3 : vector<1x10x16x4xbf16>, vector<1x10x16x4xbf16>, vector<1x10x16x4xbf16>, vector<1x10x16x4xbf16>, vector<1x10x16x4xbf16>, vector<1x10x16x4xbf16>, vector<1x10x16x4xbf16>, vector<1x10x16x4xbf16>, vector<1x10x16x4xbf16> -> vector<1x10x16x36xbf16>
    %14 = vector.shape_cast %13 : vector<1x10x16x36xbf16> to vector<160x36xbf16>
    %c0_2 = arith.constant 0 : index
    %c0_3 = arith.constant 0 : index
    %15 = vector.load %arg3[%c0_2, %c0_3] : memref<36x4xbf16, #tpu.memory_space<vmem>>, vector<36x4xbf16>
    %cst = arith.constant dense<0.000000e+00> : vector<160x4xf32>
    %16 = tpu.matmul %14, %15, %cst {dimension_numbers = #tpu.dot_dimension_numbers<[1], [0], [0], [1], [0, 0, 1, 1], [], []>} : vector<160x36xbf16>, vector<36x4xbf16>, vector<160x4xf32> -> vector<160x4xf32>
    %c0_4 = arith.constant 0 : index
    %c0_5 = arith.constant 0 : index
    %17 = vector.load %arg5[%c0_4, %c0_5] : memref<1x4xf32, #tpu.memory_space<vmem>>, vector<1x4xf32>
    %c0_6 = arith.constant 0 : index
    %c0_7 = arith.constant 0 : index
    %18 = vector.load %arg6[%c0_6, %c0_7] : memref<1x4xf32, #tpu.memory_space<vmem>>, vector<1x4xf32>
    %cst_8 = arith.constant dense<0.000000e+00> : vector<160xf32>
    %19 = vector.multi_reduction <add>, %16, %cst_8 [1] : vector<160x4xf32> to vector<160xf32>
    %20 = vector.shape_cast %19 : vector<160xf32> to vector<160x1xf32>
    %21 = arith.mulf %16, %16 : vector<160x4xf32>
    %cst_9 = arith.constant dense<0.000000e+00> : vector<160xf32>
    %22 = vector.multi_reduction <add>, %21, %cst_9 [1] : vector<160x4xf32> to vector<160xf32>
    %23 = vector.shape_cast %22 : vector<160xf32> to vector<160x1xf32>
    %cst_10 = arith.constant 2.500000e-01 : f32
    %24 = vector.broadcast %cst_10 : f32 to vector<160x1xf32>
    %25 = arith.mulf %20, %24 : vector<160x1xf32>
    %cst_11 = arith.constant 2.500000e-01 : f32
    %26 = vector.broadcast %cst_11 : f32 to vector<160x1xf32>
    %27 = arith.mulf %23, %26 : vector<160x1xf32>
    %28 = arith.mulf %25, %25 : vector<160x1xf32>
    %29 = arith.subf %27, %28 : vector<160x1xf32>
    %cst_12 = arith.constant 0.000000e+00 : f32
    %30 = vector.broadcast %cst_12 : f32 to vector<160x1xf32>
    %31 = arith.maximumf %29, %30 : vector<160x1xf32>
    %32 = vector.broadcast %25 : vector<160x1xf32> to vector<160x4xf32>
    %33 = arith.subf %16, %32 : vector<160x4xf32>
    %cst_13 = arith.constant 9.99999974E-6 : f32
    %34 = vector.broadcast %cst_13 : f32 to vector<160x1xf32>
    %35 = arith.addf %31, %34 : vector<160x1xf32>
    %36 = math.rsqrt %35 : vector<160x1xf32>
    %37 = vector.broadcast %36 : vector<160x1xf32> to vector<160x4xf32>
    %38 = arith.mulf %33, %37 : vector<160x4xf32>
    %39 = vector.broadcast %17 : vector<1x4xf32> to vector<160x4xf32>
    %40 = arith.mulf %38, %39 : vector<160x4xf32>
    %41 = vector.broadcast %18 : vector<1x4xf32> to vector<160x4xf32>
    %42 = arith.addf %40, %41 : vector<160x4xf32>
    %cst_14 = arith.constant 0.000000e+00 : f32
    %43 = vector.broadcast %cst_14 : f32 to vector<160x4xf32>
    %44 = arith.maximumf %42, %43 : vector<160x4xf32>
    %45 = vector.shape_cast %44 : vector<160x4xf32> to vector<1x10x16x4xf32>
    %c0_i32 = arith.constant 0 : i32
    %46 = arith.cmpi eq, %arg1, %c0_i32 : i32
    %cst_15 = arith.constant 0.000000e+00 : f32
    %cst_16 = arith.constant 1.000000e+00 : f32
    %47 = arith.select %46, %cst_15, %cst_16 : f32
    %c1_i32 = arith.constant 1 : i32
    %48 = arith.cmpi eq, %arg1, %c1_i32 : i32
    %cst_17 = arith.constant 0.000000e+00 : f32
    %cst_18 = arith.constant 1.000000e+00 : f32
    %49 = arith.select %48, %cst_17, %cst_18 : f32
    %50 = vector.extract_strided_slice %45 {offsets = [0, 0, 0, 0], sizes = [1, 1, 16, 4], strides = [1, 1, 1, 1]} : vector<1x10x16x4xf32> to vector<1x1x16x4xf32>
    %51 = vector.broadcast %47 : f32 to vector<1x1x16x4xf32>
    %52 = arith.mulf %50, %51 : vector<1x1x16x4xf32>
    %53 = vector.extract_strided_slice %45 {offsets = [0, 1, 0, 0], sizes = [1, 8, 16, 4], strides = [1, 1, 1, 1]} : vector<1x10x16x4xf32> to vector<1x8x16x4xf32>
    %54 = vector.extract_strided_slice %45 {offsets = [0, 9, 0, 0], sizes = [1, 1, 16, 4], strides = [1, 1, 1, 1]} : vector<1x10x16x4xf32> to vector<1x1x16x4xf32>
    %55 = vector.broadcast %49 : f32 to vector<1x1x16x4xf32>
    %56 = arith.mulf %54, %55 : vector<1x1x16x4xf32>
    %57 = tpu.concatenate %52, %53, %56 in 1 : vector<1x1x16x4xf32>, vector<1x8x16x4xf32>, vector<1x1x16x4xf32> -> vector<1x10x16x4xf32>
    %58 = arith.truncf %57 : vector<1x10x16x4xf32> to vector<1x10x16x4xbf16>
    %cst_19 = arith.constant 0.000000e+00 : bf16
    %59 = vector.broadcast %cst_19 : bf16 to vector<1x10x1x4xbf16>
    %60 = tpu.concatenate %59, %58, %59 in 2 : vector<1x10x1x4xbf16>, vector<1x10x16x4xbf16>, vector<1x10x1x4xbf16> -> vector<1x10x18x4xbf16>
    %61 = vector.extract_strided_slice %60 {offsets = [0, 0, 0, 0], sizes = [1, 8, 16, 4], strides = [1, 1, 1, 1]} : vector<1x10x18x4xbf16> to vector<1x8x16x4xbf16>
    %62 = vector.extract_strided_slice %60 {offsets = [0, 0, 1, 0], sizes = [1, 8, 16, 4], strides = [1, 1, 1, 1]} : vector<1x10x18x4xbf16> to vector<1x8x16x4xbf16>
    %63 = vector.extract_strided_slice %60 {offsets = [0, 0, 2, 0], sizes = [1, 8, 16, 4], strides = [1, 1, 1, 1]} : vector<1x10x18x4xbf16> to vector<1x8x16x4xbf16>
    %64 = vector.extract_strided_slice %60 {offsets = [0, 1, 0, 0], sizes = [1, 8, 16, 4], strides = [1, 1, 1, 1]} : vector<1x10x18x4xbf16> to vector<1x8x16x4xbf16>
    %65 = vector.extract_strided_slice %60 {offsets = [0, 1, 1, 0], sizes = [1, 8, 16, 4], strides = [1, 1, 1, 1]} : vector<1x10x18x4xbf16> to vector<1x8x16x4xbf16>
    %66 = vector.extract_strided_slice %60 {offsets = [0, 1, 2, 0], sizes = [1, 8, 16, 4], strides = [1, 1, 1, 1]} : vector<1x10x18x4xbf16> to vector<1x8x16x4xbf16>
    %67 = vector.extract_strided_slice %60 {offsets = [0, 2, 0, 0], sizes = [1, 8, 16, 4], strides = [1, 1, 1, 1]} : vector<1x10x18x4xbf16> to vector<1x8x16x4xbf16>
    %68 = vector.extract_strided_slice %60 {offsets = [0, 2, 1, 0], sizes = [1, 8, 16, 4], strides = [1, 1, 1, 1]} : vector<1x10x18x4xbf16> to vector<1x8x16x4xbf16>
    %69 = vector.extract_strided_slice %60 {offsets = [0, 2, 2, 0], sizes = [1, 8, 16, 4], strides = [1, 1, 1, 1]} : vector<1x10x18x4xbf16> to vector<1x8x16x4xbf16>
    %70 = tpu.concatenate %61, %62, %63, %64, %65, %66, %67, %68, %69 in 3 : vector<1x8x16x4xbf16>, vector<1x8x16x4xbf16>, vector<1x8x16x4xbf16>, vector<1x8x16x4xbf16>, vector<1x8x16x4xbf16>, vector<1x8x16x4xbf16>, vector<1x8x16x4xbf16>, vector<1x8x16x4xbf16>, vector<1x8x16x4xbf16> -> vector<1x8x16x36xbf16>
    %71 = vector.shape_cast %70 : vector<1x8x16x36xbf16> to vector<128x36xbf16>
    %c0_20 = arith.constant 0 : index
    %c0_21 = arith.constant 0 : index
    %72 = vector.load %arg4[%c0_20, %c0_21] : memref<36x4xbf16, #tpu.memory_space<vmem>>, vector<36x4xbf16>
    %cst_22 = arith.constant dense<0.000000e+00> : vector<128x4xf32>
    %73 = tpu.matmul %71, %72, %cst_22 {dimension_numbers = #tpu.dot_dimension_numbers<[1], [0], [0], [1], [0, 0, 1, 1], [], []>} : vector<128x36xbf16>, vector<36x4xbf16>, vector<128x4xf32> -> vector<128x4xf32>
    %c0_23 = arith.constant 0 : index
    %c0_24 = arith.constant 0 : index
    %74 = vector.load %arg7[%c0_23, %c0_24] : memref<1x4xf32, #tpu.memory_space<vmem>>, vector<1x4xf32>
    %c0_25 = arith.constant 0 : index
    %c0_26 = arith.constant 0 : index
    %75 = vector.load %arg8[%c0_25, %c0_26] : memref<1x4xf32, #tpu.memory_space<vmem>>, vector<1x4xf32>
    %cst_27 = arith.constant dense<0.000000e+00> : vector<128xf32>
    %76 = vector.multi_reduction <add>, %73, %cst_27 [1] : vector<128x4xf32> to vector<128xf32>
    %77 = vector.shape_cast %76 : vector<128xf32> to vector<128x1xf32>
    %78 = arith.mulf %73, %73 : vector<128x4xf32>
    %cst_28 = arith.constant dense<0.000000e+00> : vector<128xf32>
    %79 = vector.multi_reduction <add>, %78, %cst_28 [1] : vector<128x4xf32> to vector<128xf32>
    %80 = vector.shape_cast %79 : vector<128xf32> to vector<128x1xf32>
    %cst_29 = arith.constant 2.500000e-01 : f32
    %81 = vector.broadcast %cst_29 : f32 to vector<128x1xf32>
    %82 = arith.mulf %77, %81 : vector<128x1xf32>
    %cst_30 = arith.constant 2.500000e-01 : f32
    %83 = vector.broadcast %cst_30 : f32 to vector<128x1xf32>
    %84 = arith.mulf %80, %83 : vector<128x1xf32>
    %85 = arith.mulf %82, %82 : vector<128x1xf32>
    %86 = arith.subf %84, %85 : vector<128x1xf32>
    %cst_31 = arith.constant 0.000000e+00 : f32
    %87 = vector.broadcast %cst_31 : f32 to vector<128x1xf32>
    %88 = arith.maximumf %86, %87 : vector<128x1xf32>
    %89 = vector.broadcast %82 : vector<128x1xf32> to vector<128x4xf32>
    %90 = arith.subf %73, %89 : vector<128x4xf32>
    %cst_32 = arith.constant 9.99999974E-6 : f32
    %91 = vector.broadcast %cst_32 : f32 to vector<128x1xf32>
    %92 = arith.addf %88, %91 : vector<128x1xf32>
    %93 = math.rsqrt %92 : vector<128x1xf32>
    %94 = vector.broadcast %93 : vector<128x1xf32> to vector<128x4xf32>
    %95 = arith.mulf %90, %94 : vector<128x4xf32>
    %96 = vector.broadcast %74 : vector<1x4xf32> to vector<128x4xf32>
    %97 = arith.mulf %95, %96 : vector<128x4xf32>
    %98 = vector.broadcast %75 : vector<1x4xf32> to vector<128x4xf32>
    %99 = arith.addf %97, %98 : vector<128x4xf32>
    %100 = vector.extract_strided_slice %3 {offsets = [0, 2, 1, 0], sizes = [1, 8, 16, 4], strides = [1, 1, 1, 1]} : vector<1x12x18x4xbf16> to vector<1x8x16x4xbf16>
    %101 = vector.shape_cast %100 : vector<1x8x16x4xbf16> to vector<128x4xbf16>
    %102 = arith.extf %101 : vector<128x4xbf16> to vector<128x4xf32>
    %103 = arith.addf %99, %102 : vector<128x4xf32>
    %cst_33 = arith.constant 0.000000e+00 : f32
    %104 = vector.broadcast %cst_33 : f32 to vector<128x4xf32>
    %105 = arith.maximumf %103, %104 : vector<128x4xf32>
    %106 = vector.shape_cast %105 : vector<128x4xf32> to vector<1x8x16x4xf32>
    %c0_34 = arith.constant 0 : index
    %c0_35 = arith.constant 0 : index
    %c0_36 = arith.constant 0 : index
    %c0_37 = arith.constant 0 : index
    %107 = vector.load %arg9[%c0_34, %c0_35, %c0_36, %c0_37] : memref<1x8x16x4xf32, #tpu.memory_space<vmem>>, vector<1x8x16x4xf32>
    tpu.vector_store %arg9[%c0_34, %c0_35, %c0_36, %c0_37], %106 {strides = array<i32>} : memref<1x8x16x4xf32, #tpu.memory_space<vmem>>, vector<1x8x16x4xf32>,
    return
  }
  func.func @transform_0(%arg0: i32, %arg1: i32) -> (i32, i32, i32, i32) {
    %c0_i32 = arith.constant 0 : i32
    %c0_i32_0 = arith.constant 0 : i32
    %c0_i32_1 = arith.constant 0 : i32
    %c0_i32_2 = arith.constant 0 : i32
    return %arg0, %c0_i32, %c0_i32_0, %c0_i32_1 : i32, i32, i32, i32
  }
  func.func @transform_1(%arg0: i32, %arg1: i32) -> (i32, i32) {
    %c0_i32 = arith.constant 0 : i32
    %c0_i32_0 = arith.constant 0 : i32
    %c0_i32_1 = arith.constant 0 : i32
    return %c0_i32, %c0_i32_0 : i32, i32
  }
  func.func @transform_2(%arg0: i32, %arg1: i32) -> (i32, i32) {
    %c0_i32 = arith.constant 0 : i32
    %c0_i32_0 = arith.constant 0 : i32
    %c0_i32_1 = arith.constant 0 : i32
    return %c0_i32, %c0_i32_0 : i32, i32
  }
  func.func @transform_3(%arg0: i32, %arg1: i32) -> (i32, i32) {
    %c0_i32 = arith.constant 0 : i32
    %c0_i32_0 = arith.constant 0 : i32
    %c0_i32_1 = arith.constant 0 : i32
    return %c0_i32, %c0_i32_0 : i32, i32
  }
  func.func @transform_4(%arg0: i32, %arg1: i32) -> (i32, i32) {
    %c0_i32 = arith.constant 0 : i32
    %c0_i32_0 = arith.constant 0 : i32
    %c0_i32_1 = arith.constant 0 : i32
    return %c0_i32, %c0_i32_0 : i32, i32
  }
  func.func @transform_5(%arg0: i32, %arg1: i32) -> (i32, i32) {
    %c0_i32 = arith.constant 0 : i32
    %c0_i32_0 = arith.constant 0 : i32
    %c0_i32_1 = arith.constant 0 : i32
    return %c0_i32, %c0_i32_0 : i32, i32
  }
  func.func @transform_6(%arg0: i32, %arg1: i32) -> (i32, i32) {
    %c0_i32 = arith.constant 0 : i32
    %c0_i32_0 = arith.constant 0 : i32
    %c0_i32_1 = arith.constant 0 : i32
    return %c0_i32, %c0_i32_0 : i32, i32
  }
  func.func @transform_7(%arg0: i32, %arg1: i32) -> (i32, i32, i32, i32) {
    %c0_i32 = arith.constant 0 : i32
    %c0_i32_0 = arith.constant 0 : i32
    %c0_i32_1 = arith.constant 0 : i32
    return %arg0, %arg1, %c0_i32, %c0_i32_0 : i32, i32, i32, i32
  }
}

</mosaic_0001>

<bundles_post_ra>
// kernel: tpu_custom_call.1
= control target key start
LH: loop header
LB: loop body
LE: loop exit
PB: predicated region body
PF: predicated region fallthrough
CT: control target
= control target key end

     0   :  { %s3482_s24 = smov 0   ;;  %s3484_s25 = smov 0   ;;  %s5468_s0 = inlined_call_operand.vmem [shape: bf16[2,20,18,4], index: 0, kind: input, shape index: {}]   ;;  %s5469_s1 = inlined_call_operand.vmem [shape: bf16[36,4], index: 1, kind: input, shape index: {}]   ;;  %s5470_s2 = inlined_call_operand.vmem [shape: bf16[36,4], index: 2, kind: input, shape index: {}]   ;;  %s5471_s3 = inlined_call_operand.vmem [shape: f32[1,4], index: 3, kind: input, shape index: {}]   ;;  %s5472_s4 = inlined_call_operand.vmem [shape: f32[1,4], index: 4, kind: input, shape index: {}]   ;;  %s5473_s5 = inlined_call_operand.vmem [shape: f32[1,4], index: 5, kind: input, shape index: {}]   ;;  %s5474_s6 = inlined_call_operand.vmem [shape: f32[1,4], index: 6, kind: input, shape index: {}]   ;;  %s5475_s7 = inlined_call_operand.vmem [shape: f32[2,16,16,4], index: 7, kind: output, shape index: {}]  }
   0x1   :  { %s3486_s26 = smov 0   ;;  %s3488_s27 = smov 0  }
   0x2   :  { %s3490_s28 = smov 0  }
   0x3 LB: > { %s26_s29 = sadd.s32 1, %s3424_s26  ;;  %s29_s30 = sadd.s32 1, %s3428_s27  ;;  %s3432_s28 = sphi %s3490_s28, %s17_s28   ;;  %s3428_s27 = sphi %s3488_s27, %s5529_s27   ;;  %s3424_s26 = sphi %s3486_s26, %s5528_s26   ;;  %s3420_s25 = sphi %s3484_s25, %s5527_s25   ;;  %s3416_s24 = sphi %s3482_s24, %s5526_s24  }
   0x4   : > { %p27_p0 = scmp.ge.s32.totalorder %s26_s29, 2  ;;  %p3141_p1 = scmp.ge.s32.totalorder %s3432_s28, 1 }
   0x5   : > { %p251_p2 = scmp.lt.s32.totalorder %s3432_s28, 5 }
   0x6   : > { %s5531_s29 = smov (%p27_p0, %s26_s29), 0  ;;  %s5533_s30 = smov (!%p27_p0, %s29_s30), %s3428_s27 }
   0x7   : > { %p252_p3 = pnand %p3141_p1, %p251_p2  ;;  %p31_p4 = scmp.ge.s32.totalorder %s5533_s30, 2 }
   0x8   : > { %p288_p5 = scmp.lt.s32.totalorder (!%p252_p3), %s3420_s25, 1  ;;  %s3234_s8 = smul.u32 (!%p252_p3), 96, %s3416_s24 }
   0x9   : > { %s5535_s30 = smov (%p31_p4, %s5533_s30), 0  ;;  %255 = sbr.rel (%p252_p3) target bundleno = 1150 (0x47e), region = 48 }
   0xa   : > { %s3434_s14 = smov (!%p252_p3), 4   ;;  %s3435_s15 = smov (!%p252_p3), 8  }
   0xb   : > { %s3436_s16 = smov (!%p252_p3), 16   ;;  %s3437_s17 = smov (!%p252_p3), 12  }
   0xc   : > { %s3438_s18 = smov (!%p252_p3), 28   ;;  %s3439_s19 = smov (!%p252_p3), 24  }
   0xd   : > { %s3440_s20 = smov (!%p252_p3), 20   ;;  %s3441_s21 = smov (!%p252_p3), 32  }
   0xe   : > { %s5537_s25 = smov (!%p288_p5, %s3420_s25), 1  ;;  %vm425_vm0 = vsmask.f32 7424  ;;  %vm566_vm1 = vcmask 1046528   ;;  %vm992_vm2 = vcmask 1041408   ;;  %vm783_vm3 = vcmask 31744  }
   0xf   : > { %s3257_s9 = smul.u32 240, %s5537_s25  ;;  %vm825_vm4 = vcmask 97280   ;;  %vm804_vm5 = vcmask 64512   ;;  %vm846_vm6 = vcmask 130048   ;;  %vm867_vm7 = vcmask 162816   ;;  %p1623_p6 = scmp.eq.s32.totalorder %s3416_s24, 0 }
  0x10   : > { %vm888_vm8 = vcmask 195584   ;;  %vm5478_vm9 = vcmask 228352   ;;  %vm5477_vm10 = vcmask 261120   ;;  %vm5476_vm11 = vcmask 293888   ;;  %p1625_p7 = scmp.eq.s32.totalorder %s3416_s24, 1 }
  0x11   : > { %s292_s12 = scalar_lea.vmem %s5468_s0, %s3257_s9 }
  0x12   : > { %s3521_s13 = scalar_lea.vmem %s292_s12, %s3234_s8 }
  0x13   : > { %v3524_v0 = vld [vmem:[%s3521_s13 + $0x30] sm:$0xff]  ;;  %v323_v1 = vld [vmem:[%s3521_s13 + $0x38] sm:$0x1]  ;;  %v317_v4 = vld [vmem:[%s3521_s13 + $0x20] sm:$0x1] }
  0x14   : > { %v409_v2 = vunpack.c.l.b16 %v323_v1  ;;  %v3528_v3 = vld [vmem:[%s3521_s13 + $0x18] sm:$0xff]  ;;  %v475_v5 = vshrl.u32 %v3524_v0, 16  ;;  %v477_v6 = vshll.u32 %v3524_v0, 16  ;;  %v407_v7 = vunpack.c.l.b16 %v317_v4  ;;  %v311_v8 = vld [vmem:[%s3521_s13 + $0x8] sm:$0x1]  ;;  %v3539_v12 = vld [vmem:[%s3521_s13] sm:$0xff] }
  0x15   : > { %v451_v10 = vshrl.u32 %v3528_v3, 16  ;;  %v453_v11 = vshll.u32 %v3528_v3, 16  ;;  %v405_v17 = vunpack.c.l.b16 %v311_v8  ;;  %v3545_v18 = vld [vmem:[%s3521_s13 + $0x3c] sm:$0xff]  ;;  %v326_v19 = vld [vmem:[%s3521_s13 + $0x44] sm:$0x1]  ;;  %v427_v22 = vshrl.u32 %v3539_v12, 16 }
  0x16   : > { %v3534_v9 = vpack.c.b16 %v409_v2, %v409_v2  ;;  %v479_v13 = vrot.slane %v477_v6, 1  ;;  %v3541_v14 = vpack.c.b16 %v407_v7, %v407_v7  ;;  %v429_v26 = vshll.u32 %v3539_v12, 16  ;;  %v3567_v36 = vld [vmem:[%s3521_s13 + $0x24] sm:$0xff]  ;;  %v320_v37 = vld [vmem:[%s3521_s13 + $0x2c] sm:$0x1]  ;;  %v3600_v7 = vld [vmem:[%s3521_s13 + $0x54] sm:$0xff] }
  0x17   : > { %v455_v16 = vrot.slane %v453_v11, 1  ;;  %v3550_v25 = vpack.c.b16 %v405_v17, %v405_v17  ;;  %v410_v28 = vunpack.c.l.b16 %v326_v19  ;;  %v487_v29 = vshrl.u32 %v3545_v18, 16  ;;  %v3574_v42 = vld [vmem:[%s3521_s13 + $0xc] sm:$0xff]  ;;  %v314_v43 = vld [vmem:[%s3521_s13 + $0x14] sm:$0x1]  ;;  %v3585_v53 = vld [vmem:[%s3521_s13 + $0x60] sm:$0xff] }
  0x18   : > { %v482_v15 = vshll.u32 %v3534_v9, 16  ;;  %v480_v20 = vor.u32 %v479_v13, %v475_v5  ;;  %v458_v21 = vshll.u32 %v3541_v14, 16  ;;  %v431_v31 = vrot.slane %v429_v26, 1  ;;  %v335_v50 = vld [vmem:[%s3521_s13 + $0x68] sm:$0x1] }
  0x19   : > { %v456_v24 = vor.u32 %v455_v16, %v451_v10  ;;  %v434_v32 = vshll.u32 %v3550_v25, 16  ;;  %v489_v33 = vshll.u32 %v3545_v18, 16  ;;  %v3564_v35 = vpack.c.b16 %v410_v28, %v410_v28  ;;  %v332_v8 = vld [vmem:[%s3521_s13 + $0x5c] sm:$0x1]  ;;  %v3610_v16 = vld [vmem:[%s3521_s13 + $0x48] sm:$0xff] }
  0x1a   : > { %v484_v23 = vrot.slane %v482_v15, 1  ;;  %v460_v27 = vrot.slane %v458_v21, 1  ;;  %v432_v38 = vor.u32 %v431_v31, %v427_v22  ;;  %v408_v46 = vunpack.c.l.b16 %v320_v37  ;;  %v329_v17 = vld [vmem:[%s3521_s13 + $0x50] sm:$0x1]  ;;  %s4173_s9 = scalar_select %p1623_p6, 0.0, 1.0 }
  0x1b   : > { %v436_v39 = vrot.slane %v434_v32, 1  ;;  %v491_v40 = vrot.slane %v489_v33, 1  ;;  %v494_v41 = vshll.u32 %v3564_v35, 16  ;;  %v463_v48 = vshrl.u32 %v3567_v36, 16  ;;  %s1626_s23 = scalar_select %p1625_p7, 0.0, 1.0 }
  0x1c   : > { %v3555_v30 = vsel %vm425_vm0, %v480_v20, %v484_v23  ;;  %v3562_v34 = vsel %vm425_vm0, %v456_v24, %v460_v27  ;;  %v465_v49 = vshll.u32 %v3567_v36, 16  ;;  %v3582_v51 = vpack.c.b16 %v408_v46, %v408_v46 }
  0x1d   : > { %554 = vrot.lane.b32.xlu2 %v3555_v30, %s3434_s14  ;;  %550 = vrot.lane.b32.xlu1 %v3562_v34, %s3434_s14  ;;  %v437_v44 = vsel %vm425_vm0, %v432_v38, %v436_v39  ;;  %v492_v45 = vor.u32 %v491_v40, %v487_v29  ;;  %v496_v47 = vrot.slane %v494_v41, 1  ;;  %v406_v52 = vunpack.c.l.b16 %v314_v43  ;;  %v3630_v40 = vld [vmem:[%s3521_s13 + $0x6c] sm:$0xff]  ;;  %v338_v41 = vld [vmem:[%s3521_s13 + $0x74] sm:$0x1] }
  0x1e   : > { %546 = vrot.lane.b32.xlu0 %v437_v44, %s3434_s14  ;;  %v467_v55 = vrot.slane %v465_v49, 1  ;;  %v439_v56 = vshrl.u32 %v3574_v42, 16  ;;  %v441_v57 = vshll.u32 %v3574_v42, 16  ;;  %v470_v58 = vshll.u32 %v3582_v51, 16 }
  0x1f   : > { %v3588_v54 = vsel %vm425_vm0, %v492_v45, %v496_v47  ;;  %v416_v59 = vpack.c.b16 %v406_v52, %v406_v52  ;;  %v413_v60 = vunpack.c.l.b16 %v335_v50  ;;  %v523_v63 = vshrl.u32 %v3585_v53, 16 }
  0x20   : > { %v468_v61 = vor.u32 %v467_v55, %v463_v48  ;;  %v443_v62 = vrot.slane %v441_v57, 1  ;;  %v472_v1 = vrot.slane %v470_v58, 1  ;;  %v525_v5 = vshll.u32 %v3585_v53, 16 }
  0x21   : > { %v446_v2 = vshll.u32 %v416_v59, 16  ;;  %v3596_v4 = vpack.c.b16 %v413_v60, %v413_v60  ;;  %v412_v21 = vunpack.c.l.b16 %v332_v8  ;;  %v511_v23 = vshrl.u32 %v3600_v7, 16 }
  0x22   : > { %v444_v6 = vor.u32 %v443_v62, %v439_v56  ;;  %v3604_v10 = vsel %vm425_vm0, %v468_v61, %v472_v1  ;;  %v527_v13 = vrot.slane %v525_v5, 1  ;;  %v513_v24 = vshll.u32 %v3600_v7, 16 }
  0x23   : > { %v448_v11 = vrot.slane %v446_v2, 1  ;;  %v530_v15 = vshll.u32 %v3596_v4, 16  ;;  %v3617_v26 = vpack.c.b16 %v412_v21, %v412_v21  ;;  %v411_v27 = vunpack.c.l.b16 %v329_v17 }
  0x24   : > { %v528_v20 = vor.u32 %v527_v13, %v523_v63  ;;  %v515_v29 = vrot.slane %v513_v24, 1  ;;  %v499_v31 = vshrl.u32 %v3610_v16, 16  ;;  %v501_v32 = vshll.u32 %v3610_v16, 16 }
  0x25   : > { %556 = vrot.lane.b32.xlu2 %v3588_v54, %s3434_s14  ;;  %552 = vrot.lane.b32.xlu1 %v3604_v10, %s3434_s14  ;;  %v449_v19 = vsel %vm425_vm0, %v444_v6, %v448_v11  ;;  %v532_v22 = vrot.slane %v530_v15, 1  ;;  %v518_v33 = vshll.u32 %v3617_v26, 16  ;;  %v3627_v37 = vpack.c.b16 %v411_v27, %v411_v27 }
  0x26   : > { %548 = vrot.lane.b32.xlu0 %v449_v19, %s3434_s14  ;;  %v516_v38 = vor.u32 %v515_v29, %v511_v23  ;;  %v503_v39 = vrot.slane %v501_v32, 1  ;;  %v570_v46 = vrot.slane %v3574_v42, 1  ;;  %v571_v47 = vrot.slane %v416_v59, 1 }
  0x27   : > { %v3620_v28 = vsel %vm425_vm0, %v528_v20, %v532_v22  ;;  %v520_v43 = vrot.slane %v518_v33, 1  ;;  %v506_v44 = vshll.u32 %v3627_v37, 16  ;;  %v414_v50 = vunpack.c.l.b16 %v338_v41 }
  0x28   : > { %v504_v45 = vor.u32 %v503_v39, %v499_v31  ;;  %v572_v52 = vsel %vm566_vm1, %v570_v46, %v571_v47  ;;  %v535_v55 = vshrl.u32 %v3630_v40, 16  ;;  %v537_v56 = vshll.u32 %v3630_v40, 16 }
  0x29   : > { %v3636_v48 = vsel %vm425_vm0, %v516_v38, %v520_v43  ;;  %v508_v49 = vrot.slane %v506_v44, 1  ;;  %v567_v58 = vrot.slane %v3539_v12, 1  ;;  %v568_v59 = vrot.slane %v3550_v25, 1  ;;  %v955_v44 = vld [vmem:[%s5469_s1 + $0x10] sm:$0x3] }
  0x2a   : > { %v3648_v60 = vpack.c.b16 %v414_v50, %v414_v50  ;;  %v539_v61 = vrot.slane %v537_v56, 1  ;;  %v579_v1 = vrot.slane %v3524_v0, 1  ;;  %v580_v2 = vrot.slane %v3534_v9, 1 }
  0x2b   : > { %v3644_v57 = vsel %vm425_vm0, %v504_v45, %v508_v49  ;;  %v569_v5 = vsel %vm566_vm1, %v567_v58, %v568_v59  ;;  %v576_v11 = vrot.slane %v3567_v36, 1  ;;  %v577_v13 = vrot.slane %v3582_v51, 1 }
  0x2c   : > { %v542_v62 = vshll.u32 %v3648_v60, 16  ;;  %v540_v63 = vor.u32 %v539_v61, %v535_v55  ;;  %v3662_v8 = vsel %vm566_vm1, %v579_v1, %v580_v2  ;;  %v573_v9 = vrot.slane %v3528_v3, 1 }
  0x2d   : > { %562 = vrot.lane.b32.xlu2 %v3620_v28, %s3434_s14  ;;  %560 = vrot.lane.b32.xlu1 %v3636_v48, %s3434_s14  ;;  %v574_v15 = vrot.slane %v3541_v14, 1  ;;  %v578_v17 = vsel %vm566_vm1, %v576_v11, %v577_v13  ;;  %v582_v51 = vrot.slane %v3545_v18, 1  ;;  %v583_v21 = vrot.slane %v3564_v35, 1 }
  0x2e   : > { %558 = vrot.lane.b32.xlu0 %v3644_v57, %s3434_s14  ;;  %v544_v6 = vrot.slane %v542_v62, 1  ;;  %v585_v14 = vrot.slane %v3610_v16, 1  ;;  %v586_v35 = vrot.slane %v3627_v37, 1  ;;  %v589_v23 = vrot.slane %v3617_v26, 1 }
  0x2f   : > { %v575_v20 = vsel %vm566_vm1, %v573_v9, %v574_v15  ;;  %v3680_v22 = vsel %vm566_vm1, %v582_v51, %v583_v21  ;;  %v591_v33 = vrot.slane %v3585_v53, 1  ;;  %v592_v37 = vrot.slane %v3596_v4, 1 }
  0x30   : > { %v3658_v25 = vsel %vm425_vm0, %v540_v63, %v544_v6  ;;  %v965_v45 = vunpack.c.l.b16 %v955_v44  ;;  %v594_v58 = vrot.slane %v3630_v40, 1 }
  0x31   : > { %v593_v38 = vsel %vm566_vm1, %v591_v33, %v592_v37 }
  0x32   : > { %v968_v46 = vpack.c.b16 %v965_v45, %v965_v45 }
  0x35   : > { %599 = vrot.lane.b32.xlu2 %v572_v52, %s3435_s15  ;;  %597 = vrot.lane.b32.xlu1 %v569_v5, %s3435_s15 }
  0x36   : > { %564 = vrot.lane.b32.xlu0 %v3658_v25, %s3434_s14 }
  0x3d   : > { %605 = vrot.lane.b32.xlu2 %v3662_v8, %s3435_s15  ;;  %603 = vrot.lane.b32.xlu1 %v578_v17, %s3435_s15 }
  0x3e   : > { %601 = vrot.lane.b32.xlu0 %v575_v20, %s3435_s15 }
  0x45   : > { %657 = vrot.lane.b32.xlu2 %v449_v19, %s3436_s16  ;;  %622 = vrot.lane.b32.xlu1 %v3574_v42, %s3437_s17  ;;  %v588_v19 = vrot.slane %v3600_v7, 1 }
  0x46   : > { %607 = vrot.lane.b32.xlu0 %v3680_v22, %s3435_s15 }
  0x47   : > { %v590_v27 = vsel %vm566_vm1, %v588_v19, %v589_v23 }
  0x4d   : > { %740 = vrot.lane.b32.xlu2 %v3562_v34, %s3438_s18  ;;  %705 = vrot.lane.b32.xlu1 %v3528_v3, %s3439_s19 }
  0x4e   : > { %680 = vrot.lane.b32.xlu0 %v572_v52, %s3440_s20  ;;  %v3247_v52 = vld [vmem:[%s5469_s1] sm:$0xff] }
  0x55   : > { %659 = vrot.lane.b32.xlu2 %v3562_v34, %s3436_s16  ;;  %624 = vrot.lane.b32.xlu1 %v3528_v3, %s3437_s17  ;;  %v3706_v34 = vsel %vm566_vm1, %v585_v14, %v586_v35 }
  0x56   : > { %763 = vrot.lane.b32.xlu0 %v575_v20, %s3441_s21 }
  0x5d   : > { %667 = vrot.lane.b32.xlu2 %v3644_v57, %s3436_s16  ;;  %682 = vrot.lane.b32.xlu1 %v575_v20, %s3440_s20 }
  0x5e   : > { %632 = vrot.lane.b32.xlu0 %v3610_v16, %s3437_s17 }
  0x65   : > { %742 = vrot.lane.b32.xlu2 %v3604_v10, %s3438_s18  ;;  %690 = vrot.lane.b32.xlu1 %v3706_v34, %s3440_s20 }
  0x66   : > { %707 = vrot.lane.b32.xlu0 %v3567_v36, %s3439_s19 }
  0x6d   : > { %750 = vrot.lane.b32.xlu2 %v3636_v48, %s3438_s18  ;;  %765 = vrot.lane.b32.xlu1 %v578_v17, %s3441_s21 }
  0x6e   : > { %715 = vrot.lane.b32.xlu0 %v3600_v7, %s3439_s19 }
  0x75   : > { %609 = vrot.lane.b32.xlu2 %v3706_v34, %s3435_s15  ;;  %626 = vrot.lane.b32.xlu1 %v3567_v36, %s3437_s17 }
  0x76   : > { %773 = vrot.lane.b32.xlu0 %v590_v27, %s3441_s21 }
  0x77   : > { %v3721_v24 = vpop.permute.xlu2 %554 }
  0x7d   : > { %684 = vrot.lane.b32.xlu2 %v578_v17, %s3440_s20  ;;  %634 = vrot.lane.b32.xlu1 %v3600_v7, %s3437_s17 }
  0x7e   : > { %661 = vrot.lane.b32.xlu0 %v3604_v10, %s3436_s16 }
  0x7f   : > { %v3728_v29 = vpop.permute.xlu2 %556 }
  0x85   : > { %692 = vrot.lane.b32.xlu2 %v590_v27, %s3440_s20  ;;  %709 = vrot.lane.b32.xlu1 %v3524_v0, %s3439_s19 }
  0x86   : > { %669 = vrot.lane.b32.xlu0 %v3636_v48, %s3436_s16  ;;  %v994_v48 = vsel %vm992_vm2, %v968_v46, 0 }
  0x87   : > { %v3735_v26 = vpop.permute.xlu2 %562  ;;  %1001 = vmatpush.bf16.msra.mxu0 %v994_v48  ;;  %3251 = vmatpush.bf16.msra.mxu2 %v994_v48 }
  0x8d   : > { %767 = vrot.lane.b32.xlu2 %v3662_v8, %s3441_s21  ;;  %717 = vrot.lane.b32.xlu1 %v3585_v53, %s3439_s19 }
  0x8e   : > { %744 = vrot.lane.b32.xlu0 %v3555_v30, %s3438_s18 }
  0x8f   : > { %v3743_v31 = vpop.permute.xlu2 %599  ;;  %v3745_v32 = vpop.permute.xlu1 %550 }
  0x90   : > { %v547_v10 = vpop.permute.xlu0 %546 }
  0x91   : > { %v785_v5 = vsel %vm783_vm3, %v3539_v12, %v547_v10  ;;  %v3245_v12 = vld [vmem:[%s3521_s13 + $0x78] sm:$0xff] }
  0x92   : > { %v648_v51 = vshll.u32 %v3245_v12, 16  ;;  %v646_v35 = vshrl.u32 %v3245_v12, 16 }
  0x94   : > { %v650_v19 = vrot.slane %v648_v51, 1 }
  0x95   : > { %628 = vrot.lane.b32.xlu2 %v3524_v0, %s3437_s17  ;;  %775 = vrot.lane.b32.xlu1 %v593_v38, %s3441_s21 }
  0x96   : > { %752 = vrot.lane.b32.xlu0 %v3620_v28, %s3438_s18  ;;  %v651_v37 = vor.u32 %v650_v19, %v646_v35 }
  0x97   : > { %v3756_v39 = vpop.permute.xlu2 %605  ;;  %v3759_v41 = vpop.permute.xlu1 %552 }
  0x98   : > { %v3763_v43 = vpop.permute.xlu0 %548 }
  0x99   : > { %v787_v45 = vsel %vm783_vm3, %v3574_v42, %v3763_v43  ;;  %v344_v42 = vld [vmem:[%s3521_s13 + $0x8c] sm:$0x1] }
  0x9a   : > { %v808_v48 = vsel %vm804_vm5, %v787_v45, %v3743_v31 }
  0x9d   : > { %636 = vrot.lane.b32.xlu2 %v3585_v53, %s3437_s17  ;;  %663 = vrot.lane.b32.xlu1 %v3555_v30, %s3436_s16  ;;  %v3248_v30 = vld [vmem:[%s5469_s1 + $0x8] sm:$0xff] }
  0x9e   : > { %611 = vrot.lane.b32.xlu0 %v590_v27, %s3435_s15  ;;  %1002 = vmatpush.bf16.msra.mxu0 %v3248_v30 }
  0x9f   : > { %v658_v4 = vpop.permute.xlu2 %657  ;;  %v3773_v47 = vpop.permute.xlu1 %560  ;;  %3252 = vmatpush.bf16.msra.mxu2 %v3248_v30 }
  0xa0   : > { %v3778_v49 = vpop.permute.xlu0 %558 }
  0xa2   : > { %1003 = vmatpush.bf16.msra.mxu0 %v3247_v52 }
  0xa3   : > { %3253 = vmatpush.bf16.msra.mxu2 %v3247_v52  ;;  %v677_v52 = vrot.slane %v3245_v12, 1 }
  0xa5   : > { %711 = vrot.lane.b32.xlu2 %v3545_v18, %s3439_s19  ;;  %671 = vrot.lane.b32.xlu1 %v3620_v28, %s3436_s16  ;;  %v595_v28 = vrot.slane %v3648_v60, 1 }
  0xa6   : > { %686 = vrot.lane.b32.xlu0 %v3662_v8, %s3440_s20  ;;  %v341_v8 = vld [vmem:[%s3521_s13 + $0x80] sm:$0x1] }
  0xa7   : > { %v741_v50 = vpop.permute.xlu2 %740  ;;  %v598_v55 = vpop.permute.xlu1 %597  ;;  %v3801_v61 = vsel %vm566_vm1, %v594_v58, %v595_v28  ;;  %v643_v15 = vunpack.c.l.b16 %v341_v8  ;;  %v795_v8 = vsel %vm783_vm3, %v3545_v18, %v3728_v29 }
  0xa8   : > { %v3792_v56 = vpop.permute.xlu0 %564  ;;  %v806_v6 = vsel %vm804_vm5, %v785_v5, %v598_v55  ;;  %v726_v5 = vunpack.c.l.b16 %v344_v42 }
  0xa9   : > { %v644_v21 = vpack.c.b16 %v643_v15, %v643_v15 }
  0xab   : > { %v653_v23 = vshll.u32 %v644_v21, 16  ;;  %v678_v55 = vrot.slane %v644_v21, 1 }
  0xad   : > { %719 = vrot.lane.b32.xlu2 %v3630_v40, %s3439_s19  ;;  %746 = vrot.lane.b32.xlu1 %v3588_v54, %s3438_s18  ;;  %v679_v31 = vsel %vm566_vm1, %v677_v52, %v678_v55 }
  0xae   : > { %694 = vrot.lane.b32.xlu0 %v593_v38, %s3440_s20 }
  0xaf   : > { %v3796_v59 = vpop.permute.xlu2 %659  ;;  %v3804_v62 = vpop.permute.xlu1 %603 }
  0xb0   : > { %v3808_v63 = vpop.permute.xlu0 %601 }
  0xb5   : > { %777 = vrot.lane.b32.xlu2 %v3801_v61, %s3441_s21  ;;  %754 = vrot.lane.b32.xlu1 %v3658_v25, %s3438_s18 }
  0xb6   : > { %769 = vrot.lane.b32.xlu0 %v3680_v22, %s3441_s21 }
  0xb7   : > { %v3812_v60 = vpop.permute.xlu2 %667  ;;  %v623_v1 = vpop.permute.xlu1 %622 }
  0xb8   : > { %v3818_v2 = vpop.permute.xlu0 %607  ;;  %v827_v11 = vsel %vm825_vm4, %v806_v6, %v623_v1  ;;  %v3246_v1 = vld [vmem:[%s3521_s13 + $0x84] sm:$0xff] }
  0xb9   : > { %v848_v17 = vsel %vm846_vm6, %v827_v11, %v658_v4  ;;  %v731_v15 = vshll.u32 %v3246_v1, 16  ;;  %v729_v29 = vshrl.u32 %v3246_v1, 16  ;;  %v760_v21 = vrot.slane %v3246_v1, 1 }
  0xbd   : > { %665 = vrot.lane.b32.xlu2 %v3588_v54, %s3436_s16  ;;  %613 = vrot.lane.b32.xlu1 %v593_v38, %s3435_s15  ;;  %v655_v38 = vrot.slane %v653_v23, 1 }
  0xbe   : > { %630 = vrot.lane.b32.xlu0 %v3545_v18, %s3437_s17 }
  0xbf   : > { %v706_v54 = vpop.permute.xlu1 %705  ;;  %v743_v13 = vpop.permute.xlu2 %742 }
  0xc0   : > { %v681_v9 = vpop.permute.xlu0 %680 }
  0xc1   : > { %v869_v20 = vsel %vm867_vm7, %v848_v17, %v681_v9 }
  0xc2   : > { %v890_v14 = vsel %vm888_vm8, %v869_v20, %v706_v54  ;;  %v816_v54 = vsel %vm804_vm5, %v795_v8, %v3818_v2  ;;  %v733_v20 = vrot.slane %v731_v15, 1 }
  0xc3   : > { %v911_v10 = vsel %vm5478_vm9, %v890_v14, %v741_v50 }
  0xc4   : > { %v734_v19 = vor.u32 %v733_v20, %v729_v29  ;;  %v791_v29 = vsel %vm783_vm3, %v3567_v36, %v3759_v41 }
  0xc5   : > { %673 = vrot.lane.b32.xlu2 %v3658_v25, %s3436_s16  ;;  %688 = vrot.lane.b32.xlu1 %v3680_v22, %s3440_s20 }
  0xc6   : > { %638 = vrot.lane.b32.xlu0 %v3630_v40, %s3437_s17 }
  0xc7   : > { %v625_v25 = vpop.permute.xlu1 %624  ;;  %v751_v22 = vpop.permute.xlu2 %750 }
  0xc8   : > { %v764_v27 = vpop.permute.xlu0 %763  ;;  %v829_v50 = vsel %vm825_vm4, %v808_v48, %v625_v25 }
  0xc9   : > { %v932_v33 = vsel %vm5477_vm10, %v911_v10, %v764_v27  ;;  %v850_v43 = vsel %vm846_vm6, %v829_v50, %v3796_v59 }
  0xca   : > { %3206 = vmatmul.msk.bf16.vlgmr.msra.gmra.mxu0 %vm5476_vm11, %v932_v33 }
  0xcd   : > { %748 = vrot.lane.b32.xlu2 %v3644_v57, %s3438_s18  ;;  %696 = vrot.lane.b32.xlu1 %v3801_v61, %s3440_s20  ;;  %v656_v57 = vsel %vm425_vm0, %v651_v37, %v655_v38 }
  0xce   : > { %713 = vrot.lane.b32.xlu0 %v3610_v16, %s3439_s19 }
  0xcf   : > { %v683_v4 = vpop.permute.xlu1 %682  ;;  %v3852_v46 = vpop.permute.xlu2 %609 }
  0xd0   : > { %v633_v44 = vpop.permute.xlu0 %632  ;;  %v871_v28 = vsel %vm867_vm7, %v850_v43, %v683_v4 }
  0xd5   : > { %756 = vrot.lane.b32.xlu2 %v656_v57, %s3438_s18  ;;  %771 = vrot.lane.b32.xlu1 %v3706_v34, %s3441_s21 }
  0xd6   : > { %721 = vrot.lane.b32.xlu0 %v3245_v12, %s3439_s19 }
  0xd7   : > { %v691_v30 = vpop.permute.xlu1 %690  ;;  %v685_v6 = vpop.permute.xlu2 %684 }
  0xd8   : > { %v708_v58 = vpop.permute.xlu0 %707 }
  0xd9   : > { %v892_v34 = vsel %vm888_vm8, %v871_v28, %v708_v58  ;;  %v797_v28 = vsel %vm783_vm3, %v3610_v16, %v3778_v49 }
  0xda   : > { %v913_v59 = vsel %vm5478_vm9, %v892_v34, %v743_v13 }
  0xdd   : > { %640 = vrot.lane.b32.xlu2 %v3245_v12, %s3437_s17  ;;  %615 = vrot.lane.b32.xlu1 %v3801_v61, %s3435_s15  ;;  %v727_v12 = vpack.c.b16 %v726_v5, %v726_v5  ;;  %v837_v61 = vsel %vm825_vm4, %v816_v54, %v633_v44 }
  0xde   : > { %779 = vrot.lane.b32.xlu0 %v679_v31, %s3441_s21  ;;  %v858_v18 = vsel %vm846_vm6, %v837_v61, %v3812_v60  ;;  %v799_v61 = vsel %vm783_vm3, %v3600_v7, %v3773_v47 }
  0xdf   : > { %v766_v11 = vpop.permute.xlu1 %765  ;;  %v736_v13 = vshll.u32 %v727_v12, 16  ;;  %v879_v51 = vsel %vm867_vm7, %v858_v18, %v691_v30  ;;  %v761_v14 = vrot.slane %v727_v12, 1  ;;  %v693_v35 = vpop.permute.xlu2 %692 }
  0xe0   : > { %v934_v9 = vsel %vm5477_vm10, %v913_v59, %v766_v11  ;;  %v716_v17 = vpop.permute.xlu0 %715 }
  0xe1   : > { %3207 = vmatmul.msk.bf16.gmra.mxu0 %vm5476_vm11, %v934_v9  ;;  %v900_v2 = vsel %vm888_vm8, %v879_v51, %v716_v17  ;;  %v738_v23 = vrot.slane %v736_v13, 1  ;;  %v762_v33 = vsel %vm566_vm1, %v760_v21, %v761_v14  ;;  %v812_v13 = vsel %vm804_vm5, %v791_v29, %v3804_v62 }
  0xe2   : > { %v921_v60 = vsel %vm5478_vm9, %v900_v2, %v751_v22  ;;  %v789_v22 = vsel %vm783_vm3, %v3528_v3, %v3745_v32  ;;  %v818_v32 = vsel %vm804_vm5, %v797_v28, %v3852_v46 }
  0xe3   : > { %v739_v37 = vsel %vm425_vm0, %v734_v19, %v738_v23  ;;  %v810_v48 = vsel %vm804_vm5, %v789_v22, %v3808_v63 }
  0xe5   : > { %723 = vrot.lane.b32.xlu2 %v3246_v1, %s3439_s19  ;;  %698 = vrot.lane.b32.xlu1 %v679_v31, %s3440_s20 }
  0xe6   : > { %675 = vrot.lane.b32.xlu0 %v656_v57, %s3436_s16 }
  0xe7   : > { %v627_v25 = vpop.permute.xlu1 %626  ;;  %v768_v57 = vpop.permute.xlu2 %767 }
  0xe8   : > { %v774_v27 = vpop.permute.xlu0 %773  ;;  %v831_v50 = vsel %vm825_vm4, %v810_v48, %v627_v25 }
  0xe9   : > { %v942_v10 = vsel %vm5477_vm10, %v921_v60, %v774_v27 }
  0xea   : > { %3211 = vmatmul.msk.bf16.vlgmr.msra.gmra.mxu2 %vm5476_vm11, %v942_v10 }
  0xed   : > { %781 = vrot.lane.b32.xlu1 %v762_v33, %s3441_s21 }
  0xee   : > { %758 = vrot.lane.b32.xlu0 %v739_v37, %s3438_s18 }
  0xef   : > { %v635_v38 = vpop.permute.xlu1 %634  ;;  %v629_v30 = vpop.permute.xlu2 %628 }
  0xf0   : > { %v662_v4 = vpop.permute.xlu0 %661  ;;  %v839_v34 = vsel %vm825_vm4, %v818_v32, %v635_v38  ;;  %v833_v21 = vsel %vm825_vm4, %v812_v13, %v629_v30 }
  0xf1   : > { %v852_v52 = vsel %vm846_vm6, %v831_v50, %v662_v4 }
  0xf2   : > { %v873_v58 = vsel %vm867_vm7, %v852_v52, %v685_v6 }
  0xf7   : > { %v710_v44 = vpop.permute.xlu1 %709  ;;  %v637_v31 = vpop.permute.xlu2 %636 }
  0xf8   : > { %v670_v45 = vpop.permute.xlu0 %669  ;;  %v894_v42 = vsel %vm888_vm8, %v873_v58, %v710_v44  ;;  %v793_v44 = vsel %vm783_vm3, %v3524_v0, %v3721_v24 }
  0xf9   : > { %v860_v1 = vsel %vm846_vm6, %v839_v34, %v670_v45  ;;  %v814_v45 = vsel %vm804_vm5, %v793_v44, %v3756_v39 }
  0xfa   : > { %v881_v6 = vsel %vm867_vm7, %v860_v1, %v693_v35 }
  0xff   : > { %v718_v55 = vpop.permute.xlu1 %717  ;;  %v712_v46 = vpop.permute.xlu2 %711 }
 0x100   : > { %v745_v43 = vpop.permute.xlu0 %744  ;;  %v902_v8 = vsel %vm888_vm8, %v881_v6, %v718_v55 }
 0x101   : > { %v915_v3 = vsel %vm5478_vm9, %v894_v42, %v745_v43  ;;  %v801_v42 = vsel %vm783_vm3, %v3585_v53, %v3735_v26 }
 0x102   : > { %v936_v63 = vsel %vm5477_vm10, %v915_v3, %v768_v57 }
 0x103   : > { %3208 = vmatmul.msk.bf16.gmra.mxu0 %vm5476_vm11, %v936_v63 }
 0x107   : > { %v776_v5 = vpop.permute.xlu1 %775  ;;  %v720_v12 = vpop.permute.xlu2 %719 }
 0x108   : > { %v753_v16 = vpop.permute.xlu0 %752 }
 0x109   : > { %v923_v49 = vsel %vm5478_vm9, %v902_v8, %v753_v16 }
 0x10a   : > { %v944_v11 = vsel %vm5477_vm10, %v923_v49, %v776_v5 }
 0x10b   : > { %3212 = vmatmul.msk.bf16.gmra.mxu2 %vm5476_vm11, %v944_v11 }
 0x10f   : > { %v664_v59 = vpop.permute.xlu1 %663  ;;  %v778_v2 = vpop.permute.xlu2 %777 }
 0x110   : > { %v612_v54 = vpop.permute.xlu0 %611  ;;  %v854_v7 = vsel %vm846_vm6, %v833_v21, %v664_v59 }
 0x111   : > { %v820_v17 = vsel %vm804_vm5, %v799_v61, %v612_v54  ;;  %v803_v54 = vsel %vm783_vm3, %v3630_v40, %v3792_v56 }
 0x112   : > { %v841_v51 = vsel %vm825_vm4, %v820_v17, %v637_v31 }
 0x117   : > { %v672_v9 = vpop.permute.xlu1 %671  ;;  %v666_v10 = vpop.permute.xlu2 %665 }
 0x118   : > { %v687_v15 = vpop.permute.xlu0 %686  ;;  %v862_v14 = vsel %vm846_vm6, %v841_v51, %v672_v9 }
 0x119   : > { %v875_v25 = vsel %vm867_vm7, %v854_v7, %v687_v15 }
 0x11a   : > { %v896_v41 = vsel %vm888_vm8, %v875_v25, %v712_v46 }
 0x11f   : > { %v747_v18 = vpop.permute.xlu1 %746  ;;  %v674_v38 = vpop.permute.xlu2 %673 }
 0x120   : > { %v695_v20 = vpop.permute.xlu0 %694  ;;  %v917_v19 = vsel %vm5478_vm9, %v896_v41, %v747_v18 }
 0x121   : > { %v883_v47 = vsel %vm867_vm7, %v862_v14, %v695_v20 }
 0x122   : > { %v904_v35 = vsel %vm888_vm8, %v883_v47, %v720_v12 }
 0x127   : > { %v755_v36 = vpop.permute.xlu1 %754  ;;  %v749_v50 = vpop.permute.xlu2 %748 }
 0x128   : > { %v925_v62 = vsel %vm5478_vm9, %v904_v35, %v755_v36  ;;  %v770_v23 = vpop.permute.xlu0 %769 }
 0x129   : > { %v946_v27 = vsel %vm5477_vm10, %v925_v62, %v778_v2  ;;  %v938_v60 = vsel %vm5477_vm10, %v917_v19, %v770_v23 }
 0x12a   : > { %3213 = vmatmul.msk.bf16.gmra.mxu2 %vm5476_vm11, %v946_v27  ;;  %3209 = vmatmul.msk.bf16.gmra.mxu0 %vm5476_vm11, %v938_v60 }
 0x12f   : > { %v614_v33 = vpop.permute.xlu1 %613  ;;  %v757_v26 = vpop.permute.xlu2 %756 }
 0x130   : > { %v631_v37 = vpop.permute.xlu0 %630  ;;  %v822_v39 = vsel %vm804_vm5, %v801_v42, %v614_v33 }
 0x131   : > { %v835_v22 = vsel %vm825_vm4, %v814_v45, %v631_v37 }
 0x132   : > { %v856_v52 = vsel %vm846_vm6, %v835_v22, %v666_v10 }
 0x137   : > { %v689_v4 = vpop.permute.xlu1 %688  ;;  %v641_v59 = vpop.permute.xlu2 %640 }
 0x138   : > { %v639_v57 = vpop.permute.xlu0 %638  ;;  %v877_v55 = vsel %vm867_vm7, %v856_v52, %v689_v4 }
 0x139   : > { %v843_v3 = vsel %vm825_vm4, %v822_v39, %v639_v57 }
 0x13a   : > { %v864_v31 = vsel %vm846_vm6, %v843_v3, %v674_v38 }
 0x13f   : > { %v697_v48 = vpop.permute.xlu1 %696  ;;  %v724_v29 = vpop.permute.xlu2 %723 }
 0x140   : > { %v714_v30 = vpop.permute.xlu0 %713  ;;  %v885_v1 = vsel %vm867_vm7, %v864_v31, %v697_v48 }
 0x141   : > { %v898_v58 = vsel %vm888_vm8, %v877_v55, %v714_v30 }
 0x142   : > { %v919_v0 = vsel %vm5478_vm9, %v898_v58, %v749_v50 }
 0x147   : > { %v772_v24 = vpop.permute.xlu1 %771  ;;  %v3955_v43 = vpop.f32.mrf.mxu0 }
 0x148   : > { %v940_v28 = vsel %vm5477_vm10, %v919_v0, %v772_v24  ;;  %v722_v32 = vpop.permute.xlu0 %721  ;;  %v1057_v63 = vsel %vm783_vm3, %v3955_v43, 0.0  ;;  %v1117_v53 = vmul.f32 %v3955_v43, %v3955_v43 }
 0x149   : > { %3210 = vmatmul.msk.bf16.gmra.mxu0 %vm5476_vm11, %v940_v28  ;;  %1058 = vadd.xlane.f32.xlu2 %v1057_v63  ;;  %v906_v5 = vsel %vm888_vm8, %v885_v1, %v722_v32 }
 0x14a   : > { %v1137_v34 = vsel %vm783_vm3, %v1117_v53, 0.0  ;;  %v927_v16 = vsel %vm5478_vm9, %v906_v5, %v757_v26 }
 0x14b   : > { %1138 = vadd.xlane.f32.xlu1 %v1137_v34 }
 0x14f   : > { %v616_v6 = vpop.permute.xlu1 %615  ;;  %v3968_v8 = vpop.f32.mrf.mxu0 }
 0x150   : > { %v780_v49 = vpop.permute.xlu0 %779  ;;  %v1060_v11 = vsel %vm783_vm3, %v3968_v8, 0.0  ;;  %v824_v9 = vsel %vm804_vm5, %v803_v54, %v616_v6  ;;  %v1118_v25 = vmul.f32 %v3968_v8, %v3968_v8 }
 0x151   : > { %1061 = vadd.xlane.f32.xlu0 %v1060_v11  ;;  %v948_v46 = vsel %vm5477_vm10, %v927_v16, %v780_v49  ;;  %v845_v61 = vsel %vm825_vm4, %v824_v9, %v641_v59 }
 0x152   : > { %3214 = vmatmul.msk.bf16.gmra.mxu2 %vm5476_vm11, %v948_v46  ;;  %v1140_v41 = vsel %vm783_vm3, %v1118_v25, 0.0 }
 0x157   : > { %v699_v12 = vpop.permute.xlu1 %698 }
 0x158   : > { %v676_v15 = vpop.permute.xlu0 %675 }
 0x159   : > { %v866_v17 = vsel %vm846_vm6, %v845_v61, %v676_v15 }
 0x15a   : > { %v887_v18 = vsel %vm867_vm7, %v866_v17, %v699_v12 }
 0x15b   : > { %v908_v13 = vsel %vm888_vm8, %v887_v18, %v724_v29 }
 0x15e   : > { %v3993_v47 = vpop.f32.mrf.mxu0 }
 0x15f   : > { %v782_v20 = vpop.permute.xlu1 %781  ;;  %v1119_v35 = vmul.f32 %v3993_v47, %v3993_v47  ;;  %v1063_v23 = vsel %vm783_vm3, %v3993_v47, 0.0 }
 0x160   : > { %v759_v51 = vpop.permute.xlu0 %758 }
 0x161   : > { %v929_v2 = vsel %vm5478_vm9, %v908_v13, %v759_v51  ;;  %v1143_v19 = vsel %vm783_vm3, %v1119_v35, 0.0 }
 0x162   : > { %v950_v21 = vsel %vm5477_vm10, %v929_v2, %v782_v20  ;;  %vm1794_vm10 = vsmask.f32 256 }
 0x163   : > { %3215 = vmatmul.msk.bf16.gmra.mxu2 %vm5476_vm11, %v950_v21 }
 0x166   : > { %v4017_v4 = vpop.f32.mrf.mxu0 }
 0x167   : > { %v1120_v57 = vmul.f32 %v4017_v4, %v4017_v4  ;;  %v1066_v45 = vsel %vm783_vm3, %v4017_v4, 0.0 }
 0x169   : > { %v1146_v48 = vsel %vm783_vm3, %v1120_v57, 0.0 }
 0x16d   : > { %v3986_v40 = vpop.f32.mrf.mxu2 }
 0x16e   : > { %v1087_v56 = vsel %vm783_vm3, %v3986_v40, 0.0  ;;  %v1127_v14 = vmul.f32 %v3986_v40, %v3986_v40 }
 0x16f   : > { %1088 = vadd.xlane.f32.xlu2 %v1087_v56 }
 0x170   : > { %v1167_v7 = vsel %vm783_vm3, %v1127_v14, 0.0 }
 0x171   : > { %1168 = vadd.xlane.f32.xlu1 %v1167_v7 }
 0x175   : > { %v3999_v36 = vpop.f32.mrf.mxu2 }
 0x176   : > { %v1090_v62 = vsel %vm783_vm3, %v3999_v36, 0.0  ;;  %v1128_v27 = vmul.f32 %v3999_v36, %v3999_v36 }
 0x177   : > { %1141 = vadd.xlane.f32.xlu2 %v1140_v41  ;;  %1091 = vadd.xlane.f32.xlu0 %v1090_v62 }
 0x178   : > { %v1170_v60 = vsel %vm783_vm3, %v1128_v27, 0.0 }
 0x179   : > { %1144 = vadd.xlane.f32.xlu1 %v1143_v19 }
 0x17f   : > { %1064 = vadd.xlane.f32.xlu2 %v1063_v23 }
 0x180   : > { %v4028_v50 = vpop.f32.mrf.mxu0 }
 0x181   : > { %v1121_v30 = vmul.f32 %v4028_v50, %v4028_v50  ;;  %v1069_v52 = vsel %vm783_vm3, %v4028_v50, 0.0 }
 0x183   : > { %v1149_v55 = vsel %vm783_vm3, %v1121_v30, 0.0 }
 0x187   : > { %1171 = vadd.xlane.f32.xlu2 %v1170_v60 }
 0x188   : > { %v4038_v0 = vpop.f32.mrf.mxu0 }
 0x189   : > { %v1122_v63 = vmul.f32 %v4038_v0, %v4038_v0  ;;  %v1072_v26 = vsel %vm783_vm3, %v4038_v0, 0.0 }
 0x18b   : > { %v1152_v31 = vsel %vm783_vm3, %v1122_v63, 0.0 }
 0x18e   : > { %v4010_v10 = vpop.f32.mrf.mxu2 }
 0x18f   : > { %v1093_v33 = vsel %vm783_vm3, %v4010_v10, 0.0  ;;  %v1129_v37 = vmul.f32 %v4010_v10, %v4010_v10 }
 0x190   : > { %1094 = vadd.xlane.f32.xlu0 %v1093_v33 }
 0x191   : > { %v1173_v38 = vsel %vm783_vm3, %v1129_v37, 0.0 }
 0x192   : > { %1174 = vadd.xlane.f32.xlu2 %v1173_v38 }
 0x196   : > { %v4021_v44 = vpop.f32.mrf.mxu2 }
 0x197   : > { %v1096_v22 = vsel %vm783_vm3, %v4021_v44, 0.0  ;;  %v1130_v58 = vmul.f32 %v4021_v44, %v4021_v44 }
 0x198   : > { %1067 = vadd.xlane.f32.xlu0 %v1066_v45  ;;  %1097 = vadd.xlane.f32.xlu1 %v1096_v22 }
 0x199   : > { %v1176_v42 = vsel %vm783_vm3, %v1130_v58, 0.0 }
 0x19a   : > { %1147 = vadd.xlane.f32.xlu2 %v1146_v48 }
 0x1a0   : > { %1070 = vadd.xlane.f32.xlu0 %v1069_v52 }
 0x1a2   : > { %1150 = vadd.xlane.f32.xlu2 %v1149_v55 }
 0x1a7   : > { %v4047_v32 = vpop.f32.mrf.mxu0 }
 0x1a8   : > { %1177 = vadd.xlane.f32.xlu0 %v1176_v42  ;;  %v1123_v5 = vmul.f32 %v4047_v32, %v4047_v32  ;;  %v1075_v6 = vsel %vm783_vm3, %v4047_v32, 0.0 }
 0x1aa   : > { %v1155_v49 = vsel %vm783_vm3, %v1123_v5, 0.0 }
 0x1ad   : > { %v4040_v24 = vpop.f32.mrf.mxu2 }
 0x1ae   : > { %v1099_v39 = vsel %vm783_vm3, %v4040_v24, 0.0  ;;  %v1131_v28 = vmul.f32 %v4040_v24, %v4040_v24 }
 0x1af   : > { %1100 = vadd.xlane.f32.xlu1 %v1099_v39  ;;  %v4058_v1 = vpop.f32.mrf.mxu0 }
 0x1b0   : > { %v1179_v3 = vsel %vm783_vm3, %v1131_v28, 0.0  ;;  %v1078_v16 = vsel %vm783_vm3, %v4058_v1, 0.0  ;;  %v1124_v61 = vmul.f32 %v4058_v1, %v4058_v1 }
 0x1b1   : > { %1180 = vadd.xlane.f32.xlu0 %v1179_v3 }
 0x1b2   : > { %v1158_v18 = vsel %vm783_vm3, %v1124_v61, 0.0 }
 0x1b5   : > { %v4051_v53 = vpop.f32.mrf.mxu2 }
 0x1b6   : > { %v1102_v34 = vsel %vm783_vm3, %v4051_v53, 0.0  ;;  %v1132_v11 = vmul.f32 %v4051_v53, %v4051_v53 }
 0x1b7   : > { %1073 = vadd.xlane.f32.xlu1 %v1072_v26  ;;  %1103 = vadd.xlane.f32.xlu2 %v1102_v34 }
 0x1b8   : > { %v1182_v54 = vsel %vm783_vm3, %v1132_v11, 0.0 }
 0x1b9   : > { %1153 = vadd.xlane.f32.xlu0 %v1152_v31 }
 0x1bc   : > { %v1059_v46 = vpop.xlane.xlu2 %1058 }
 0x1bd   : > { %v4069_v59 = vmul.f32 0.25, %v1059_v46 }
 0x1be   : > { %v1139_v9 = vpop.xlane.xlu1 %1138 }
 0x1bf   : > { %1076 = vadd.xlane.f32.xlu1 %v1075_v6  ;;  %1079 = vadd.xlane.f32.xlu2 %v1078_v16  ;;  %v1237_v12 = vmul.f32 %v4069_v59, %v4069_v59  ;;  %v1217_v15 = vmul.f32 0.25, %v1139_v9 }
 0x1c1   : > { %1156 = vadd.xlane.f32.xlu0 %v1155_v49  ;;  %v1257_v17 = vsub.f32 %v1217_v15, %v1237_v12 }
 0x1c3   : > { %v1277_v29 = vmax.f32 %v1257_v17, 0.0 }
 0x1c4   : > { %v1062_v37 = vpop.xlane.xlu0 %1061 }
 0x1c5   : > { %v4077_v20 = vadd.f32 1e-05, %v1277_v29  ;;  %v4116_v55 = vmul.f32 0.25, %v1062_v37 }
 0x1c6   : > { %v4085_v21 = vpop.f32.mrf.mxu0 }
 0x1c7   : > { %1183 = vadd.xlane.f32.xlu1 %v1182_v54  ;;  %3310 = vrsqrt.f32 %v4077_v20  ;;  %v1081_v41 = vsel %vm783_vm3, %v4085_v21, 0.0  ;;  %v1125_v60 = vmul.f32 %v4085_v21, %v4085_v21  ;;  %v1238_v26 = vmul.f32 %v4116_v55, %v4116_v55 }
 0x1c8   : > { %vm1343_vm13 = vweird.f32 %v4077_v20 }
 0x1c9   : > { %v1161_v52 = vsel %vm783_vm3, %v1125_v60, 0.0 }
 0x1cd   : > { %v4095_v35 = vpop.eup %3310 }
 0x1ce   : > { %v4100_v19 = vpop.f32.mrf.mxu0  ;;  %v1338_v23 = vmul.f32 %v4095_v35, %v4077_v20  ;;  %vm1344_vm12 = vweird.f32 %v4095_v35 }
 0x1cf   : > { %1159 = vadd.xlane.f32.xlu1 %v1158_v18  ;;  %v1126_v38 = vmul.f32 %v4100_v19, %v4100_v19  ;;  %v1084_v39 = vsel %vm783_vm3, %v4100_v19, 0.0  ;;  %vm1345_vm14 = vmor %vm1343_vm13, %vm1344_vm12 }
 0x1d0   : > { %v1339_v48 = vmul.f32 %v4095_v35, %v1338_v23  ;;  %v1297_v23 = vsub.f32 %v3955_v43, %v4069_v59 }
 0x1d1   : > { %v1164_v42 = vsel %vm783_vm3, %v1126_v38, 0.0  ;;  %v4158_v38 = vld [vmem:[%s5471_s3] ss:$0 sm:$0xff] }
 0x1d2   : > { %v1340_v3 = vmul.f32 0.5, %v1339_v48 }
 0x1d4   : > { %v1341_v16 = vsub.f32 1.5, %v1340_v3 }
 0x1d5   : > { %v4079_v13 = vpop.f32.mrf.mxu2 }
 0x1d6   : > { %v1105_v51 = vsel %vm783_vm3, %v4079_v13, 0.0  ;;  %v1133_v2 = vmul.f32 %v4079_v13, %v4079_v13  ;;  %v1342_v15 = vmul.f32 %v4095_v35, %v1341_v16 }
 0x1d7   : > { %1106 = vadd.xlane.f32.xlu0 %v1105_v51 }
 0x1d8   : > { %v1185_v56 = vsel %vm783_vm3, %v1133_v2, 0.0 }
 0x1d9   : > { %1186 = vadd.xlane.f32.xlu2 %v1185_v56 }
 0x1dd   : > { %v4089_v14 = vpop.f32.mrf.mxu2 }
 0x1de   : > { %v1108_v7 = vsel %vm783_vm3, %v4089_v14, 0.0  ;;  %v1134_v25 = vmul.f32 %v4089_v14, %v4089_v14 }
 0x1df   : > { %1109 = vadd.xlane.f32.xlu1 %v1108_v7 }
 0x1e0   : > { %v1188_v62 = vsel %vm783_vm3, %v1134_v25, 0.0 }
 0x1e1   : > { %1082 = vadd.xlane.f32.xlu2 %v1081_v41  ;;  %1189 = vadd.xlane.f32.xlu0 %v1188_v62  ;;  %v1346_v41 = vsel %vm1345_vm14, %v4095_v35, %v1342_v15 }
 0x1e2   : > { %v1089_v27 = vpop.xlane.xlu2 %1088 }
 0x1e3   : > { %v4106_v33 = vmul.f32 0.25, %v1089_v27 }
 0x1e4   : > { %v1169_v57 = vpop.xlane.xlu1 %1168 }
 0x1e5   : > { %v1247_v45 = vmul.f32 %v4106_v33, %v4106_v33  ;;  %v1227_v22 = vmul.f32 0.25, %v1169_v57  ;;  %v1537_v57 = vmul.f32 %v1346_v41, %v1297_v23 }
 0x1e6   : > { %v4113_v30 = vpop.f32.mrf.mxu2 }
 0x1e7   : > { %v1267_v58 = vsub.f32 %v1227_v22, %v1247_v45  ;;  %1162 = vadd.xlane.f32.xlu1 %v1161_v52  ;;  %v1135_v5 = vmul.f32 %v4113_v30, %v4113_v30  ;;  %v1111_v11 = vsel %vm783_vm3, %v4113_v30, 0.0 }
 0x1e9   : > { %v1287_v28 = vmax.f32 %v1267_v58, 0.0  ;;  %1165 = vadd.xlane.f32.xlu2 %v1164_v42  ;;  %1085 = vadd.xlane.f32.xlu0 %v1084_v39  ;;  %v1191_v9 = vsel %vm783_vm3, %v1135_v5, 0.0  ;;  %v4167_v42 = vld [vmem:[%s5472_s4] ss:$0 sm:$0xff]  ;;  %v1560_v39 = vmul.f32 %v4158_v38, %v1537_v57 }
 0x1ea   : > { %v1142_v63 = vpop.xlane.xlu2 %1141  ;;  %v1092_v56 = vpop.xlane.xlu0 %1091 }
 0x1eb   : > { %v4123_v34 = vadd.f32 1e-05, %v1287_v28  ;;  %v1218_v31 = vmul.f32 0.25, %v1142_v63  ;;  %v4152_v27 = vmul.f32 0.25, %v1092_v56  ;;  %v1583_v5 = vadd.f32 %v4167_v42, %v1560_v39 }
 0x1ec   : > { %v1145_v61 = vpop.xlane.xlu1 %1144  ;;  %v1627_v56 = vstv %s4173_s9 }
 0x1ed   : > { %3312 = vrsqrt.f32 %v4123_v34  ;;  %v1258_v6 = vsub.f32 %v1218_v31, %v1238_v26  ;;  %v1219_v7 = vmul.f32 0.25, %v1145_v61  ;;  %v1248_v43 = vmul.f32 %v4152_v27, %v4152_v27 }
 0x1ee   : > { %v4128_v49 = vpop.f32.mrf.mxu2  ;;  %vm1443_vm11 = vweird.f32 %v4123_v34 }
 0x1ef   : > { %v1278_v46 = vmax.f32 %v1258_v6, 0.0  ;;  %1112 = vadd.xlane.f32.xlu1 %v1111_v11  ;;  %v1114_v54 = vsel %vm783_vm3, %v4128_v49, 0.0  ;;  %v1136_v17 = vmul.f32 %v4128_v49, %v4128_v49 }
 0x1f1   : > { %v1318_v12 = vadd.f32 1e-05, %v1278_v46  ;;  %1192 = vadd.xlane.f32.xlu0 %v1191_v9  ;;  %1115 = vadd.xlane.f32.xlu2 %v1114_v54  ;;  %v1194_v62 = vsel %vm783_vm3, %v1136_v17, 0.0  ;;  %v1298_v46 = vsub.f32 %v3968_v8, %v4116_v55 }
 0x1f2   : > { %v1065_v18 = vpop.xlane.xlu2 %1064 }
 0x1f3   : > { %v4139_v29 = vpop.eup %3312  ;;  %3314 = vrsqrt.f32 %v1318_v12  ;;  %v4141_v51 = vmul.f32 0.25, %v1065_v18  ;;  %vm1353_vm12 = vweird.f32 %v1318_v12 }
 0x1f4   : > { %v1438_v2 = vmul.f32 %v4139_v29, %v4123_v34  ;;  %vm1444_vm13 = vweird.f32 %v4139_v29 }
 0x1f5   : > { %v1239_v25 = vmul.f32 %v4141_v51, %v4141_v51 }
 0x1f6   : > { %v1439_v20 = vmul.f32 %v4139_v29, %v1438_v2  ;;  %v1603_v2 = vmax.f32 %v1583_v5, 0.0 }
 0x1f7   : > { %v1259_v60 = vsub.f32 %v1219_v7, %v1239_v25  ;;  %1195 = vadd.xlane.f32.xlu1 %v1194_v62 }
 0x1f8   : > { %v1440_v52 = vmul.f32 0.5, %v1439_v20  ;;  %v1628_v20 = vmul.f32 %v1627_v56, %v1603_v2 }
 0x1f9   : > { %v3315_v37 = vpop.eup %3314  ;;  %v1279_v35 = vmax.f32 %v1259_v60, 0.0  ;;  %v1307_v60 = vsub.f32 %v3986_v40, %v4106_v33 }
 0x1fa   : > { %v1348_v45 = vmul.f32 %v3315_v37, %v1318_v12  ;;  %v1172_v22 = vpop.xlane.xlu2 %1171  ;;  %v1441_v26 = vsub.f32 1.5, %v1440_v52  ;;  %vm1354_vm15 = vweird.f32 %v3315_v37 }
 0x1fb   : > { %v4162_v59 = vadd.f32 1e-05, %v1279_v35  ;;  %v1228_v48 = vmul.f32 0.25, %v1172_v22  ;;  %vm1355_vm14 = vmor %vm1353_vm12, %vm1354_vm15 }
 0x1fc   : > { %v1349_v58 = vmul.f32 %v3315_v37, %v1348_v45  ;;  %v1442_v9 = vmul.f32 %v4139_v29, %v1441_v26  ;;  %vm1445_vm15 = vmor %vm1443_vm11, %vm1444_vm13 }
 0x1fd   : > { %3316 = vrsqrt.f32 %v4162_v59  ;;  %v1268_v28 = vsub.f32 %v1228_v48, %v1248_v43  ;;  %vm1363_vm9 = vweird.f32 %v4162_v59 }
 0x1fe   : > { %v1350_v3 = vmul.f32 0.5, %v1349_v58  ;;  %v1446_v41 = vsel %vm1445_vm15, %v4139_v29, %v1442_v9  ;;  %vm1793_vm15 = vcmask 1040384  }
 0x1ff   : > { %v1288_v63 = vmax.f32 %v1268_v28, 0.0  ;;  %v1547_v35 = vmul.f32 %v1446_v41, %v1307_v60  ;;  %v1633_v28 = vpack.c.bf16 %v1628_v20, %v1628_v20 }
 0x200   : > { %v1351_v31 = vsub.f32 1.5, %v1350_v3 }
 0x201   : > { %v1328_v6 = vadd.f32 1e-05, %v1288_v63  ;;  %v1570_v40 = vmul.f32 %v4158_v38, %v1547_v35 }
 0x202   : > { %v1352_v16 = vmul.f32 %v3315_v37, %v1351_v31 }
 0x203   : > { %v4175_v11 = vpop.eup %3316  ;;  %3318 = vrsqrt.f32 %v1328_v6  ;;  %v1095_v54 = vpop.xlane.xlu0 %1094  ;;  %vm1453_vm12 = vweird.f32 %v1328_v6 }
 0x204   : > { %v1356_v15 = vsel %vm1355_vm14, %v3315_v37, %v1352_v16  ;;  %v1358_v61 = vmul.f32 %v4175_v11, %v4162_v59  ;;  %v4183_v12 = vmul.f32 0.25, %v1095_v54  ;;  %v1673_v16 = vunpack.c.l.b16 %v1633_v28 }
 0x205   : > { %v1538_v17 = vmul.f32 %v1356_v15, %v1298_v46  ;;  %v1175_v18 = vpop.xlane.xlu2 %1174  ;;  %v1593_v15 = vadd.f32 %v4167_v42, %v1570_v40  ;;  %vm1364_vm13 = vweird.f32 %v4175_v11  ;;  %v1299_v28 = vsub.f32 %v3993_v47, %v4141_v51 }
 0x206   : > { %v1249_v8 = vmul.f32 %v4183_v12, %v4183_v12  ;;  %v1229_v55 = vmul.f32 0.25, %v1175_v18  ;;  %v1359_v25 = vmul.f32 %v4175_v11, %v1358_v61  ;;  %v1308_v61 = vsub.f32 %v3999_v36, %v4152_v27 }
 0x207   : > { %v1561_v7 = vmul.f32 %v4158_v38, %v1538_v17  ;;  %v1613_v60 = vmax.f32 %v1593_v15, 0.0 }
 0x208   : > { %v1269_v62 = vsub.f32 %v1229_v55, %v1249_v8  ;;  %v1360_v45 = vmul.f32 0.5, %v1359_v25 }
 0x209   : > { %v3319_v23 = vpop.eup %3318  ;;  %v1584_v34 = vadd.f32 %v4167_v42, %v1561_v7 }
 0x20a   : > { %v1448_v37 = vmul.f32 %v3319_v23, %v1328_v6  ;;  %v1289_v57 = vmax.f32 %v1269_v62, 0.0  ;;  %v1361_v33 = vsub.f32 1.5, %v1360_v45  ;;  %vm1454_vm11 = vweird.f32 %v3319_v23 }
 0x20b   : > { %v1068_v22 = vpop.xlane.xlu0 %1067  ;;  %v1604_v43 = vmax.f32 %v1584_v34, 0.0  ;;  %vm1455_vm14 = vmor %vm1453_vm12, %vm1454_vm11  ;;  %v1098_v41 = vpop.xlane.xlu1 %1097 }
 0x20c   : > { %v1449_v48 = vmul.f32 %v3319_v23, %v1448_v37  ;;  %v4197_v52 = vadd.f32 1e-05, %v1289_v57  ;;  %v4199_v58 = vmul.f32 0.25, %v1068_v22  ;;  %v1362_v17 = vmul.f32 %v4175_v11, %v1361_v33  ;;  %vm4223_vm11 = vmor %vm1363_vm9, %vm1364_vm13  ;;  %v3250_v22 = vld [vmem:[%s5470_s2 + $0x8] sm:$0xff] }
 0x20d   : > { %v1148_v29 = vpop.xlane.xlu2 %1147  ;;  %v1629_v39 = vmul.f32 %v1627_v56, %v1604_v43  ;;  %v4232_v35 = vmul.f32 0.25, %v1098_v41  ;;  %vm4236_vm12 = vmand %vm1793_vm15, %vm1794_vm10 }
 0x20e   : > { %v1450_v3 = vmul.f32 0.5, %v1449_v48  ;;  %3320 = vrsqrt.f32 %v4197_v52  ;;  %v1240_v63 = vmul.f32 %v4199_v58, %v4199_v58  ;;  %v1220_v31 = vmul.f32 0.25, %v1148_v29 }
 0x20f   : > { %v1634_v5 = vpack.c.bf16 %v1629_v39, %v1629_v39  ;;  %v1366_v59 = vsel %vm4223_vm11, %v4175_v11, %v1362_v17  ;;  %vm1463_vm10 = vweird.f32 %v4197_v52 }
 0x210   : > { %v1451_v26 = vsub.f32 1.5, %v1450_v3  ;;  %v1260_v54 = vsub.f32 %v1220_v31, %v1240_v63  ;;  %v1539_v31 = vmul.f32 %v1366_v59, %v1299_v28 }
 0x211   : > { %v1674_v9 = vunpack.c.l.b16 %v1634_v5  ;;  %v1250_v5 = vmul.f32 %v4232_v35, %v4232_v35 }
 0x212   : > { %v1452_v46 = vmul.f32 %v3319_v23, %v1451_v26  ;;  %v1280_v55 = vmax.f32 %v1260_v54, 0.0  ;;  %v1643_v26 = vpack.c.bf16 %v1613_v60, %v1613_v60 }
 0x213   : > { %v1071_v18 = vpop.xlane.xlu0 %1070  ;;  %v1693_v6 = vpack.c.b16 %v1674_v9, %v1673_v16 }
 0x214   : > { %v4210_v2 = vpop.eup %3320  ;;  %v1456_v8 = vsel %vm1455_vm14, %v3319_v23, %v1452_v46  ;;  %v4212_v56 = vmul.f32 0.25, %v1071_v18  ;;  %v4217_v36 = vadd.f32 1e-05, %v1280_v55  ;;  %v1562_v55 = vmul.f32 %v4158_v38, %v1539_v31 }
 0x215   : > { %v1548_v7 = vmul.f32 %v1456_v8, %v1308_v61  ;;  %v1458_v25 = vmul.f32 %v4210_v2, %v4197_v52  ;;  %v1151_v62 = vpop.xlane.xlu2 %1150  ;;  %v1704_v57 = vshrl.u32 %v1693_v6, 16  ;;  %v1707_v39 = vshll.u32 %v1693_v6, 16 }
 0x216   : > { %v1241_v27 = vmul.f32 %v4212_v56, %v4212_v56  ;;  %v1221_v23 = vmul.f32 0.25, %v1151_v62  ;;  %3322 = vrsqrt.f32 %v4217_v36  ;;  %v1683_v8 = vunpack.c.l.b16 %v1643_v26 }
 0x217   : > { %v1571_v20 = vmul.f32 %v4158_v38, %v1548_v7  ;;  %v1459_v37 = vmul.f32 %v4210_v2, %v1458_v25  ;;  %v1706_v29 = vrot.slane %v1704_v57, 7  ;;  %vm1464_vm9 = vweird.f32 %v4210_v2 }
 0x218   : > { %v1261_v45 = vsub.f32 %v1221_v23, %v1241_v27  ;;  %v1309_v57 = vsub.f32 %v4010_v10, %v4183_v12  ;;  %vm4274_vm13 = vmor %vm1463_vm10, %vm1464_vm9  ;;  %v1300_v26 = vsub.f32 %v4017_v4, %v4199_v58  ;;  %vm1373_vm15 = vweird.f32 %v4217_v36 }
 0x219   : > { %v1594_v43 = vadd.f32 %v4167_v42, %v1571_v20  ;;  %v1460_v48 = vmul.f32 0.5, %v1459_v37  ;;  %v1709_v33 = vor.u32 %v1707_v39, %v1706_v29  ;;  %v1806_v63 = vsel %vm4236_vm12, %v1706_v29, 0 }
 0x21a   : > { %v1281_v3 = vmax.f32 %v1261_v45, 0.0  ;;  %v1945_v17 = vrot.slane %v1806_v63, 1  ;;  %v1824_v37 = vshll.u32 %v1806_v63, 16  ;;  %v1585_v29 = vadd.f32 %v4167_v42, %v1562_v55 }
 0x21b   : > { %v1614_v11 = vmax.f32 %v1594_v43, 0.0  ;;  %v1178_v40 = vpop.xlane.xlu0 %1177  ;;  %v1461_v54 = vsub.f32 1.5, %v1460_v48  ;;  %v4251_v9 = vsel %vm4236_vm12, 0, %v1709_v33 }
 0x21c   : > { %v4247_v16 = vadd.f32 1e-05, %v1281_v3  ;;  %v1230_v46 = vmul.f32 0.25, %v1178_v40  ;;  %v3323_v51 = vpop.eup %3322  ;;  %v1944_v61 = vrot.slane %v4251_v9, 1  ;;  %v1819_v25 = vshll.u32 %v4251_v9, 16 }
 0x21d   : > { %v1644_v47 = vpack.c.bf16 %v1614_v11, %v1614_v11  ;;  %v1368_v18 = vmul.f32 %v3323_v51, %v4217_v36  ;;  %v1462_v41 = vmul.f32 %v4210_v2, %v1461_v54  ;;  %v1817_v12 = vshrl.u32 %v4251_v9, 16 }
 0x21e   : > { %3324 = vrsqrt.f32 %v4247_v16  ;;  %v1270_v15 = vsub.f32 %v1230_v46, %v1250_v5  ;;  %v1946_v7 = vsel %vm566_vm1, %v1944_v61, %v1945_v17  ;;  %v1821_v20 = vrot.slane %v1819_v25, 1 }
 0x21f   : > { %v1369_v62 = vmul.f32 %v3323_v51, %v1368_v18  ;;  %1968 = vrot.lane.b32.xlu0 %v1946_v7, %s3435_s15  ;;  %v1684_v23 = vunpack.c.l.b16 %v1644_v47  ;;  %v1466_v52 = vsel %vm4274_vm13, %v4210_v2, %v1462_v41  ;;  %vm1374_vm14 = vweird.f32 %v3323_v51 }
 0x220   : > { %v1290_v6 = vmax.f32 %v1270_v15, 0.0  ;;  %v1822_v11 = vor.u32 %v1821_v20, %v1817_v12  ;;  %v1826_v40 = vrot.slane %v1824_v37, 1  ;;  %vm1375_vm11 = vmor %vm1373_vm15, %vm1374_vm14  ;;  %v1605_v15 = vmax.f32 %v1585_v29, 0.0 }
 0x221   : > { %v1370_v59 = vmul.f32 0.5, %v1369_v62  ;;  %v1698_v43 = vpack.c.b16 %v1684_v23, %v1683_v8  ;;  %v1549_v61 = vmul.f32 %v1466_v52, %v1309_v57  ;;  %v1310_v23 = vsub.f32 %v4021_v44, %v4232_v35 }
 0x222   : > { %v1101_v27 = vpop.xlane.xlu1 %1100  ;;  %v4262_v60 = vadd.f32 1e-05, %v1290_v6  ;;  %v1827_v2 = vsel %vm425_vm0, %v1822_v11, %v1826_v40  ;;  %vm1383_vm13 = vweird.f32 %v4247_v16 }
 0x223   : > { %v4264_v34 = vmul.f32 0.25, %v1101_v27  ;;  %v1371_v28 = vsub.f32 1.5, %v1370_v59  ;;  %v1739_v63 = vshrl.u32 %v1698_v43, 16  ;;  %v1742_v47 = vshll.u32 %v1698_v43, 16  ;;  %1912 = vrot.lane.b32.xlu2 %v1827_v2, %s3434_s14 }
 0x224   : > { %v1181_v45 = vpop.xlane.xlu0 %1180  ;;  %v4269_v48 = vpop.eup %3324  ;;  %3326 = vrsqrt.f32 %v4262_v60  ;;  %v1572_v57 = vmul.f32 %v4158_v38, %v1549_v61  ;;  %vm1473_vm14 = vweird.f32 %v4262_v60 }
 0x225   : > { %v1251_v10 = vmul.f32 %v4264_v34, %v4264_v34  ;;  %v1378_v3 = vmul.f32 %v4269_v48, %v4247_v16  ;;  %v1231_v33 = vmul.f32 0.25, %v1181_v45  ;;  %v1372_v31 = vmul.f32 %v3323_v51, %v1371_v28 }
 0x226   : > { %v1741_v54 = vrot.slane %v1739_v63, 7  ;;  %vm1384_vm9 = vweird.f32 %v4269_v48 }
 0x227   : > { %v1379_v5 = vmul.f32 %v4269_v48, %v1378_v3  ;;  %v1271_v46 = vsub.f32 %v1231_v33, %v1251_v10  ;;  %v1376_v17 = vsel %vm1375_vm11, %v3323_v51, %v1372_v31  ;;  %v4302_v51 = vpack.c.bf16 %v1605_v15, %v1605_v15  ;;  %vm4336_vm11 = vmor %vm1383_vm13, %vm1384_vm9 }
 0x228   : > { %v1540_v4 = vmul.f32 %v1376_v17, %v1300_v26  ;;  %v1744_v6 = vor.u32 %v1742_v47, %v1741_v54  ;;  %v1811_v45 = vsel %vm4236_vm12, %v1741_v54, 0 }
 0x229   : > { %v1380_v18 = vmul.f32 0.5, %v1379_v5  ;;  %v1291_v58 = vmax.f32 %v1271_v46, 0.0  ;;  %v1960_v35 = vrot.slane %v1811_v45, 1  ;;  %v1884_v28 = vshll.u32 %v1811_v45, 16 }
 0x22a   : > { %v1074_v8 = vpop.xlane.xlu1 %1073  ;;  %v3327_v55 = vpop.eup %3326  ;;  %v4300_v27 = vsel %vm4236_vm12, 0, %v1744_v6  ;;  %v1563_v20 = vmul.f32 %v4158_v38, %v1540_v4  ;;  %v1595_v5 = vadd.f32 %v4167_v42, %v1572_v57 }
 0x22b   : > { %v4293_v36 = vmul.f32 0.25, %v1074_v8  ;;  %v1468_v7 = vmul.f32 %v3327_v55, %v4262_v60  ;;  %v1381_v41 = vsub.f32 1.5, %v1380_v18  ;;  %v4296_v62 = vadd.f32 1e-05, %v1291_v58  ;;  %2056 = vrot.lane.b32.xlu0 %v4300_v27, %s3439_s19  ;;  %v1104_v40 = vpop.xlane.xlu2 %1103 }
 0x22c   : > { %v1154_v25 = vpop.xlane.xlu0 %1153  ;;  %v1959_v44 = vrot.slane %v4300_v27, 1  ;;  %vm1474_vm10 = vweird.f32 %v3327_v55  ;;  %v1879_v10 = vshll.u32 %v4300_v27, 16  ;;  %v1586_v11 = vadd.f32 %v4167_v42, %v1563_v20 }
 0x22d   : > { %v1469_v37 = vmul.f32 %v3327_v55, %v1468_v7  ;;  %3328 = vrsqrt.f32 %v4296_v62  ;;  %v1242_v59 = vmul.f32 %v4293_v36, %v4293_v36  ;;  %v1382_v29 = vmul.f32 %v4269_v48, %v1381_v41  ;;  %vm1475_vm15 = vmor %vm1473_vm14, %vm1474_vm10 }
 0x22e   : > { %v1222_v39 = vmul.f32 0.25, %v1154_v25  ;;  %v4320_v52 = vsel %vm566_vm1, %v1959_v44, %v1960_v35  ;;  %v1877_v63 = vshrl.u32 %v4300_v27, 16  ;;  %v1881_v26 = vrot.slane %v1879_v10, 1 }
 0x22f   : > { %v1470_v43 = vmul.f32 0.5, %v1469_v37  ;;  %1978 = vrot.lane.b32.xlu1 %v4320_v52, %s3435_s15  ;;  %v1886_v15 = vrot.slane %v1884_v28, 1  ;;  %v1606_v17 = vmax.f32 %v1586_v11, 0.0  ;;  %v4342_v60 = vmul.f32 0.25, %v1104_v40 }
 0x230   : > { %v1262_v33 = vsub.f32 %v1222_v39, %v1242_v59  ;;  %v1882_v47 = vor.u32 %v1881_v26, %v1877_v63  ;;  %v1386_v58 = vsel %vm4336_vm11, %v4269_v48, %v1382_v29  ;;  %v1675_v37 = vunpack.c.l.b16 %v4302_v51 }
 0x231   : > { %v1471_v12 = vsub.f32 1.5, %v1470_v43  ;;  %v1636_v48 = vpack.c.bf16 %v1606_v17, %v1606_v17  ;;  %v1252_v45 = vmul.f32 %v4342_v60, %v4342_v60  ;;  %v1311_v10 = vsub.f32 %v4040_v24, %v4264_v34 }
 0x232   : > { %v1077_v3 = vpop.xlane.xlu1 %1076  ;;  %v1282_v54 = vmax.f32 %v1262_v33, 0.0  ;;  %v4352_v25 = vsel %vm425_vm0, %v1882_v47, %v1886_v15  ;;  %v1302_v40 = vsub.f32 %v4038_v0, %v4293_v36  ;;  %vm1483_vm9 = vweird.f32 %v4296_v62 }
 0x233   : > { %v4326_v31 = vmul.f32 0.25, %v1077_v3  ;;  %v1472_v2 = vmul.f32 %v3327_v55, %v1471_v12  ;;  %v4331_v46 = vpop.eup %3328  ;;  %1922 = vrot.lane.b32.xlu2 %v4352_v25, %s3434_s14  ;;  %v1676_v51 = vunpack.c.l.b16 %v1636_v48  ;;  %v1080_v12 = vpop.xlane.xlu2 %1079  ;;  %v1312_v0 = vsub.f32 %v4051_v53, %v4342_v60 }
 0x234   : > { %v1157_v61 = vpop.xlane.xlu0 %1156  ;;  %v1478_v16 = vmul.f32 %v4331_v46, %v4296_v62  ;;  %v4349_v7 = vadd.f32 1e-05, %v1282_v54  ;;  %vm1484_vm10 = vweird.f32 %v4331_v46 }
 0x235   : > { %v1476_v8 = vsel %vm1475_vm15, %v3327_v55, %v1472_v2  ;;  %v1243_v4 = vmul.f32 %v4326_v31, %v4326_v31  ;;  %v1301_v55 = vsub.f32 %v4028_v50, %v4212_v56  ;;  %v1223_v20 = vmul.f32 0.25, %v1157_v61  ;;  %vm4405_vm14 = vmor %vm1483_vm9, %vm1484_vm10 }
 0x236   : > { %v1550_v6 = vmul.f32 %v1476_v8, %v1310_v23  ;;  %v1479_v41 = vmul.f32 %v4331_v46, %v1478_v16  ;;  %3330 = vrsqrt.f32 %v4349_v7  ;;  %v1615_v23 = vmax.f32 %v1595_v5, 0.0 }
 0x237   : > { %v1541_v59 = vmul.f32 %v1386_v58, %v1301_v55  ;;  %v1263_v43 = vsub.f32 %v1223_v20, %v1243_v4  ;;  %2104 = vrot.lane.b32.xlu1 %v4320_v52, %s3441_s21  ;;  %v1694_v3 = vpack.c.b16 %v1676_v51, %v1675_v37  ;;  %v4376_v61 = vmul.f32 0.25, %v1080_v12 }
 0x238   : > { %v1573_v57 = vmul.f32 %v4158_v38, %v1550_v6  ;;  %v1480_v44 = vmul.f32 0.5, %v1479_v41  ;;  %v1645_v63 = vpack.c.bf16 %v1615_v23, %v1615_v23  ;;  %vm1393_vm15 = vweird.f32 %v4349_v7 }
 0x239   : > { %v1283_v29 = vmax.f32 %v1263_v43, 0.0  ;;  %v1564_v11 = vmul.f32 %v4158_v38, %v1541_v59  ;;  %v1711_v54 = vshrl.u32 %v1694_v3, 16  ;;  %v1714_v18 = vshll.u32 %v1694_v3, 16 }
 0x23a   : > { %v1184_v50 = vpop.xlane.xlu1 %1183  ;;  %v1596_v56 = vadd.f32 %v4167_v42, %v1573_v57  ;;  %v1481_v5 = vsub.f32 1.5, %v1480_v44  ;;  %v1685_v41 = vunpack.c.l.b16 %v1645_v63  ;;  %v1244_v37 = vmul.f32 %v4376_v61, %v4376_v61 }
 0x23b   : > { %v1232_v35 = vmul.f32 0.25, %v1184_v50  ;;  %v4372_v33 = vadd.f32 1e-05, %v1283_v29  ;;  %2084 = vrot.lane.b32.xlu2 %v4352_v25, %s3438_s18  ;;  %v1713_v17 = vrot.slane %v1711_v54, 7  ;;  %v4386_v8 = vadd.f32 %v4167_v42, %v1564_v11 }
 0x23c   : > { %v1616_v39 = vmax.f32 %v1596_v56, 0.0  ;;  %v3331_v26 = vpop.eup %3330  ;;  %v1482_v6 = vmul.f32 %v4331_v46, %v1481_v5 }
 0x23d   : > { %v1272_v28 = vsub.f32 %v1232_v35, %v1252_v45  ;;  %v1388_v15 = vmul.f32 %v3331_v26, %v4349_v7  ;;  %3332 = vrsqrt.f32 %v4372_v33  ;;  %v1716_v55 = vor.u32 %v1714_v18, %v1713_v17 }
 0x23e   : > { %v1646_v47 = vpack.c.bf16 %v1616_v39, %v1616_v39  ;;  %v1807_v57 = vsel %vm4236_vm12, %v1713_v17, 0  ;;  %vm1394_vm13 = vweird.f32 %v3331_v26  ;;  %v1486_v29 = vsel %vm4405_vm14, %v4331_v46, %v1482_v6 }
 0x23f   : > { %v1292_v2 = vmax.f32 %v1272_v28, 0.0  ;;  %v1389_v16 = vmul.f32 %v3331_v26, %v1388_v15  ;;  %v4397_v23 = vsel %vm4236_vm12, 0, %v1716_v55  ;;  %v1836_v59 = vshll.u32 %v1807_v57, 16  ;;  %vm1395_vm11 = vmor %vm1393_vm15, %vm1394_vm13 }
 0x240   : > { %v1686_v58 = vunpack.c.l.b16 %v1646_v47  ;;  %1985 = vrot.lane.b32.xlu1 %v4397_v23, %s3437_s17  ;;  %v1947_v44 = vrot.slane %v4397_v23, 1  ;;  %v1948_v35 = vrot.slane %v1807_v57, 1  ;;  %v1831_v39 = vshll.u32 %v4397_v23, 16 }
 0x241   : > { %v4383_v36 = vadd.f32 1e-05, %v1292_v2  ;;  %v1390_v20 = vmul.f32 0.5, %v1389_v16  ;;  %v1829_v11 = vshrl.u32 %v4397_v23, 16  ;;  %v1838_v7 = vrot.slane %v1836_v59, 1 }
 0x242   : > { %v1160_v4 = vpop.xlane.xlu1 %1159  ;;  %v1699_v45 = vpack.c.b16 %v1686_v58, %v1685_v41  ;;  %v1949_v28 = vsel %vm566_vm1, %v1947_v44, %v1948_v35  ;;  %v1833_v46 = vrot.slane %v1831_v39, 1  ;;  %v1607_v55 = vmax.f32 %v4386_v8, 0.0 }
 0x243   : > { %3334 = vrsqrt.f32 %v4383_v36  ;;  %v1224_v48 = vmul.f32 0.25, %v1160_v4  ;;  %v4399_v43 = vpop.eup %3332  ;;  %v1391_v56 = vsub.f32 1.5, %v1390_v20  ;;  %1970 = vrot.lane.b32.xlu0 %v1949_v28, %s3435_s15  ;;  %2033 = vrot.lane.b32.xlu2 %v1949_v28, %s3440_s20  ;;  %vm1403_vm9 = vweird.f32 %v4372_v33 }
 0x244   : > { %v1398_v62 = vmul.f32 %v4399_v43, %v4372_v33  ;;  %v1746_v2 = vshrl.u32 %v1699_v45, 16  ;;  %v1749_v17 = vshll.u32 %v1699_v45, 16  ;;  %v1834_v4 = vor.u32 %v1833_v46, %v1829_v11 }
 0x245   : > { %v1264_v51 = vsub.f32 %v1224_v48, %v1244_v37  ;;  %v1392_v12 = vmul.f32 %v3331_v26, %v1391_v56  ;;  %vm1404_vm13 = vweird.f32 %v4399_v43  ;;  %vm1493_vm14 = vweird.f32 %v4383_v36 }
 0x246   : > { %v1399_v5 = vmul.f32 %v4399_v43, %v1398_v62  ;;  %v1748_v6 = vrot.slane %v1746_v2, 7  ;;  %v1839_v57 = vsel %vm425_vm0, %v1834_v4, %v1838_v7  ;;  %v1637_v60 = vpack.c.bf16 %v1607_v55, %v1607_v55 }
 0x247   : > { %v1284_v3 = vmax.f32 %v1264_v51, 0.0  ;;  %v1396_v54 = vsel %vm1395_vm11, %v3331_v26, %v1392_v12  ;;  %v1551_v26 = vmul.f32 %v1486_v29, %v1311_v10  ;;  %vm4476_vm11 = vmor %vm1403_vm9, %vm1404_vm13 }
 0x248   : > { %v1542_v18 = vmul.f32 %v1396_v54, %v1302_v40  ;;  %v1400_v16 = vmul.f32 0.5, %v1399_v5  ;;  %v1751_v40 = vor.u32 %v1749_v17, %v1748_v6  ;;  %1914 = vrot.lane.b32.xlu1 %v1839_v57, %s3434_s14  ;;  %v1812_v34 = vsel %vm4236_vm12, %v1748_v6, 0 }
 0x249   : > { %v3335_v63 = vpop.eup %3334  ;;  %v4426_v15 = vadd.f32 1e-05, %v1284_v3  ;;  %v1963_v51 = vrot.slane %v1812_v34, 1  ;;  %v1896_v7 = vshll.u32 %v1812_v34, 16  ;;  %v1677_v34 = vunpack.c.l.b16 %v1637_v60 }
 0x24a   : > { %v1488_v47 = vmul.f32 %v3335_v63, %v4383_v36  ;;  %v1107_v58 = vpop.xlane.xlu0 %1106  ;;  %v1565_v37 = vmul.f32 %v4158_v38, %v1542_v18  ;;  %v1401_v59 = vsub.f32 1.5, %v1400_v16  ;;  %vm1494_vm10 = vweird.f32 %v3335_v63 }
 0x24b   : > { %3336 = vrsqrt.f32 %v4426_v15  ;;  %v4430_v20 = vmul.f32 0.25, %v1107_v58  ;;  %v4443_v24 = vsel %vm4236_vm12, 0, %v1751_v40  ;;  %vm1495_vm15 = vmor %vm1493_vm14, %vm1494_vm10  ;;  %v1898_v58 = vrot.slane %v1896_v7, 1 }
 0x24c   : > { %v1489_v41 = vmul.f32 %v3335_v63, %v1488_v47  ;;  %v1187_v48 = vpop.xlane.xlu2 %1186  ;;  %v1588_v10 = vadd.f32 %v4167_v42, %v1565_v37  ;;  %v1962_v35 = vrot.slane %v4443_v24, 1  ;;  %1995 = vrot.lane.b32.xlu0 %v4443_v24, %s3437_s17  ;;  %v1891_v29 = vshll.u32 %v4443_v24, 16 }
 0x24d   : > { %v1253_v8 = vmul.f32 %v4430_v20, %v4430_v20  ;;  %v1233_v50 = vmul.f32 0.25, %v1187_v48  ;;  %v1402_v39 = vmul.f32 %v4399_v43, %v1401_v59  ;;  %v1889_v3 = vshrl.u32 %v4443_v24, 16 }
 0x24e   : > { %v1490_v45 = vmul.f32 0.5, %v1489_v41  ;;  %v4462_v36 = vsel %vm566_vm1, %v1962_v35, %v1963_v51  ;;  %v1893_v46 = vrot.slane %v1891_v29, 1  ;;  %v1608_v2 = vmax.f32 %v1588_v10, 0.0 }
 0x24f   : > { %v1273_v44 = vsub.f32 %v1233_v50, %v1253_v8  ;;  %v1303_v48 = vsub.f32 %v4047_v32, %v4326_v31  ;;  %v1574_v8 = vmul.f32 %v4158_v38, %v1551_v26  ;;  %vm1413_vm9 = vweird.f32 %v4426_v15 }
 0x250   : > { %v1491_v56 = vsub.f32 1.5, %v1490_v45  ;;  %v1894_v4 = vor.u32 %v1893_v46, %v1889_v3  ;;  %2043 = vrot.lane.b32.xlu1 %v4462_v36, %s3440_s20  ;;  %v1638_v55 = vpack.c.bf16 %v1608_v2, %v1608_v2  ;;  %v1304_v60 = vsub.f32 %v4058_v1, %v4376_v61 }
 0x251   : > { %v4454_v62 = vpop.eup %3336  ;;  %v1293_v28 = vmax.f32 %v1273_v44, 0.0  ;;  %v1597_v26 = vadd.f32 %v4167_v42, %v1574_v8  ;;  %v1313_v61 = vsub.f32 %v4079_v13, %v4430_v20 }
 0x252   : > { %v1492_v12 = vmul.f32 %v3335_v63, %v1491_v56  ;;  %v1408_v11 = vmul.f32 %v4454_v62, %v4426_v15  ;;  %v1110_v5 = vpop.xlane.xlu1 %1109  ;;  %v4490_v40 = vsel %vm425_vm0, %v1894_v4, %v1898_v58  ;;  %v1678_v10 = vunpack.c.l.b16 %v1638_v55 }
 0x253   : > { %v4464_v47 = vadd.f32 1e-05, %v1293_v28  ;;  %v4466_v17 = vmul.f32 0.25, %v1110_v5  ;;  %2023 = vrot.lane.b32.xlu2 %v4490_v40, %s3436_s16  ;;  %vm1414_vm10 = vweird.f32 %v4454_v62 }
 0x254   : > { %v1496_v54 = vsel %vm1495_vm15, %v3335_v63, %v1492_v12  ;;  %v1409_v16 = vmul.f32 %v4454_v62, %v1408_v11  ;;  %v1083_v6 = vpop.xlane.xlu2 %1082  ;;  %v1190_v41 = vpop.xlane.xlu0 %1189  ;;  %2013 = vrot.lane.b32.xlu0 %v1839_v57, %s3436_s16  ;;  %vm4530_vm13 = vmor %vm1413_vm9, %vm1414_vm10 }
 0x255   : > { %v1552_v18 = vmul.f32 %v1496_v54, %v1312_v0  ;;  %3338 = vrsqrt.f32 %v4464_v47  ;;  %v1254_v53 = vmul.f32 %v4466_v17, %v4466_v17  ;;  %v1406_v0 = vsel %vm4476_vm11, %v4399_v43, %v1402_v39 }
 0x256   : > { %v1410_v33 = vmul.f32 0.5, %v1409_v16  ;;  %v4496_v59 = vmul.f32 0.25, %v1083_v6  ;;  %v1234_v45 = vmul.f32 0.25, %v1190_v41  ;;  %v1543_v43 = vmul.f32 %v1406_v0, %v1303_v48 }
 0x257   : > { %v1575_v37 = vmul.f32 %v4158_v38, %v1552_v18  ;;  %v1695_v39 = vpack.c.b16 %v1678_v10, %v1677_v34  ;;  %vm1503_vm14 = vweird.f32 %v4464_v47 }
 0x258   : > { %v1274_v50 = vsub.f32 %v1234_v45, %v1254_v53  ;;  %v1411_v44 = vsub.f32 1.5, %v1410_v33  ;;  %v1245_v31 = vmul.f32 %v4496_v59, %v4496_v59  ;;  %v1566_v3 = vmul.f32 %v4158_v38, %v1543_v43  ;;  %1924 = vrot.lane.b32.xlu1 %v4490_v40, %s3434_s14 }
 0x259   : > { %v1598_v56 = vadd.f32 %v4167_v42, %v1575_v37  ;;  %v1718_v54 = vshrl.u32 %v1695_v39, 16  ;;  %v1721_v63 = vshll.u32 %v1695_v39, 16  ;;  %v1617_v53 = vmax.f32 %v1597_v26, 0.0 }
 0x25a   : > { %v1163_v35 = vpop.xlane.xlu1 %1162  ;;  %v1294_v51 = vmax.f32 %v1274_v50, 0.0  ;;  %v1412_v46 = vmul.f32 %v4454_v62, %v1411_v44  ;;  %v4547_v43 = vadd.f32 %v4167_v42, %v1566_v3 }
 0x25b   : > { %v4501_v32 = vpop.eup %3338  ;;  %v1225_v29 = vmul.f32 0.25, %v1163_v35  ;;  %v1618_v18 = vmax.f32 %v1598_v56, 0.0  ;;  %v1720_v41 = vrot.slane %v1718_v54, 7 }
 0x25c   : > { %v1498_v57 = vmul.f32 %v4501_v32, %v4464_v47  ;;  %v1166_v12 = vpop.xlane.xlu2 %1165  ;;  %v1086_v28 = vpop.xlane.xlu0 %1085  ;;  %v4511_v11 = vadd.f32 1e-05, %v1294_v51  ;;  %1980 = vrot.lane.b32.xlu0 %v4462_v36, %s3435_s15  ;;  %v1416_v33 = vsel %vm4530_vm13, %v4454_v62, %v1412_v46  ;;  %vm1504_vm15 = vweird.f32 %v4501_v32 }
 0x25d   : > { %v1265_v5 = vsub.f32 %v1225_v29, %v1245_v31  ;;  %v4517_v2 = vmul.f32 0.25, %v1086_v28  ;;  %v1226_v4 = vmul.f32 0.25, %v1166_v12  ;;  %v1723_v45 = vor.u32 %v1721_v63, %v1720_v41  ;;  %vm4583_vm11 = vmor %vm1503_vm14, %vm1504_vm15 }
 0x25e   : > { %v1499_v7 = vmul.f32 %v4501_v32, %v1498_v57  ;;  %3340 = vrsqrt.f32 %v4511_v11  ;;  %v1808_v1 = vsel %vm4236_vm12, %v1720_v41, 0  ;;  %v1648_v8 = vpack.c.bf16 %v1618_v18, %v1618_v18 }
 0x25f   : > { %v1285_v16 = vmax.f32 %v1265_v5, 0.0  ;;  %v1246_v6 = vmul.f32 %v4517_v2, %v4517_v2  ;;  %v4551_v62 = vsel %vm4236_vm12, 0, %v1723_v45  ;;  %v1544_v44 = vmul.f32 %v1416_v33, %v1304_v60 }
 0x260   : > { %v1500_v58 = vmul.f32 0.5, %v1499_v7  ;;  %1987 = vrot.lane.b32.xlu2 %v4551_v62, %s3437_s17  ;;  %2050 = vrot.lane.b32.xlu1 %v4551_v62, %s3439_s19  ;;  %v1950_v35 = vrot.slane %v4551_v62, 1  ;;  %v1951_v31 = vrot.slane %v1808_v1, 1  ;;  %v1647_v29 = vpack.c.bf16 %v1617_v53, %v1617_v53 }
 0x261   : > { %v4534_v37 = vadd.f32 1e-05, %v1285_v16  ;;  %v1266_v48 = vsub.f32 %v1226_v4, %v1246_v6  ;;  %v1688_v3 = vunpack.c.l.b16 %v1648_v8  ;;  %v1567_v18 = vmul.f32 %v4158_v38, %v1544_v44 }
 0x262   : > { %v1113_v55 = vpop.xlane.xlu1 %1112  ;;  %v1501_v50 = vsub.f32 1.5, %v1500_v58  ;;  %v1952_v28 = vsel %vm566_vm1, %v1950_v35, %v1951_v31  ;;  %v1843_v16 = vshll.u32 %v4551_v62, 16  ;;  %v1848_v4 = vshll.u32 %v1808_v1, 16 }
 0x263   : > { %3342 = vrsqrt.f32 %v4534_v37  ;;  %v4544_v15 = vmul.f32 0.25, %v1113_v55  ;;  %v1286_v34 = vmax.f32 %v1266_v48, 0.0  ;;  %v1687_v58 = vunpack.c.l.b16 %v1647_v29 }
 0x264   : > { %v1116_v10 = vpop.xlane.xlu2 %1115  ;;  %v3341_v56 = vpop.eup %3340  ;;  %v1502_v5 = vmul.f32 %v4501_v32, %v1501_v50  ;;  %2035 = vrot.lane.b32.xlu0 %v1952_v28, %s3440_s20  ;;  %v1841_v38 = vshrl.u32 %v4551_v62, 16  ;;  %v1845_v33 = vrot.slane %v1843_v16, 1  ;;  %v1850_v47 = vrot.slane %v1848_v4, 1 }
 0x265   : > { %v1193_v51 = vpop.xlane.xlu0 %1192  ;;  %v1508_v39 = vmul.f32 %v3341_v56, %v4511_v11  ;;  %v4559_v26 = vadd.f32 1e-05, %v1286_v34  ;;  %v1255_v57 = vmul.f32 %v4544_v15, %v4544_v15  ;;  %v4563_v12 = vmul.f32 0.25, %v1116_v10 }
 0x266   : > { %v1235_v7 = vmul.f32 0.25, %v1193_v51  ;;  %v1700_v45 = vpack.c.b16 %v1688_v3, %v1687_v58  ;;  %v1506_v55 = vsel %vm4583_vm11, %v4501_v32, %v1502_v5  ;;  %vm1514_vm9 = vweird.f32 %v3341_v56 }
 0x267   : > { %v1509_v46 = vmul.f32 %v3341_v56, %v1508_v39  ;;  %3344 = vrsqrt.f32 %v4559_v26  ;;  %v1256_v63 = vmul.f32 %v4563_v12, %v4563_v12  ;;  %v1846_v50 = vor.u32 %v1845_v33, %v1841_v38  ;;  %v4639_v38 = vld [vmem:[%s5472_s4] ss:$0 sm:$0xff] }
 0x268   : > { %v1275_v53 = vsub.f32 %v1235_v7, %v1255_v57  ;;  %2098 = vrot.lane.b32.xlu2 %v1952_v28, %s3441_s21  ;;  %v1753_v10 = vshrl.u32 %v1700_v45, 16  ;;  %v1590_v35 = vadd.f32 %v4167_v42, %v1567_v18  ;;  %vm1513_vm10 = vweird.f32 %v4511_v11 }
 0x269   : > { %v4571_v54 = vpop.eup %3342  ;;  %v1510_v6 = vmul.f32 0.5, %v1509_v46  ;;  %v1314_v32 = vsub.f32 %v4089_v14, %v4466_v17  ;;  %vm1515_vm13 = vmor %vm1513_vm10, %vm1514_vm9  ;;  %v4602_v39 = vsel %vm425_vm0, %v1846_v50, %v1850_v47  ;;  %v1553_v42 = vmul.f32 %v1506_v55, %v1313_v61  ;;  %v4620_v61 = vld [vmem:[%s5471_s3] ss:$0 sm:$0xff] }
 0x26a   : > { %v1418_v41 = vmul.f32 %v4571_v54, %v4534_v37  ;;  %v1196_v60 = vpop.xlane.xlu1 %1195  ;;  %v1295_v8 = vmax.f32 %v1275_v53, 0.0  ;;  %2015 = vrot.lane.b32.xlu1 %v4602_v39, %s3436_s16  ;;  %v1755_v46 = vrot.slane %v1753_v10, 7  ;;  %v1610_v7 = vmax.f32 %v1590_v35, 0.0 }
 0x26b   : > { %v1236_v48 = vmul.f32 0.25, %v1196_v60  ;;  %v1511_v1 = vsub.f32 1.5, %v1510_v6  ;;  %v1756_v16 = vshll.u32 %v1700_v45, 16  ;;  %v1609_v13 = vmax.f32 %v4547_v43, 0.0 }
 0x26c   : > { %v1419_v51 = vmul.f32 %v4571_v54, %v1418_v41  ;;  %v4607_v5 = vadd.f32 1e-05, %v1295_v8  ;;  %1972 = vrot.lane.b32.xlu0 %v1952_v28, %s3435_s15  ;;  %v1813_v6 = vsel %vm4236_vm12, %v1755_v46, 0  ;;  %vm1424_vm14 = vweird.f32 %v4571_v54 }
 0x26d   : > { %v1276_v34 = vsub.f32 %v1236_v48, %v1256_v63  ;;  %v4592_v44 = vpop.eup %3344  ;;  %v1512_v31 = vmul.f32 %v3341_v56, %v1511_v1  ;;  %v1758_v28 = vor.u32 %v1756_v16, %v1755_v46  ;;  %v1640_v63 = vpack.c.bf16 %v1610_v7, %v1610_v7 }
 0x26e   : > { %v1428_v29 = vmul.f32 %v4592_v44, %v4559_v26  ;;  %v1420_v18 = vmul.f32 0.5, %v1419_v51  ;;  %v1639_v53 = vpack.c.bf16 %v1609_v13, %v1609_v13  ;;  %v1908_v0 = vshll.u32 %v1813_v6, 16 }
 0x26f   : > { %v1296_v57 = vmax.f32 %v1276_v34, 0.0  ;;  %v1516_v3 = vsel %vm1515_vm13, %v3341_v56, %v1512_v31  ;;  %v1576_v56 = vmul.f32 %v4620_v61, %v1553_v42  ;;  %v4629_v41 = vsel %vm4236_vm12, 0, %v1758_v28 }
 0x270   : > { %v1554_v14 = vmul.f32 %v1516_v3, %v1314_v32  ;;  %v1429_v17 = vmul.f32 %v4592_v44, %v1428_v29  ;;  %v1421_v43 = vsub.f32 1.5, %v1420_v18  ;;  %1997 = vrot.lane.b32.xlu2 %v4629_v41, %s3437_s17  ;;  %v1903_v60 = vshll.u32 %v4629_v41, 16 }
 0x271   : > { %v4613_v11 = vadd.f32 1e-05, %v1296_v57  ;;  %v1599_v33 = vadd.f32 %v4639_v38, %v1576_v56  ;;  %vm1434_vm15 = vweird.f32 %v4592_v44  ;;  %v1901_v8 = vshrl.u32 %v4629_v41, 16 }
 0x272   : > { %v1430_v20 = vmul.f32 0.5, %v1429_v17  ;;  %v1577_v4 = vmul.f32 %v4620_v61, %v1554_v14  ;;  %v1422_v1 = vmul.f32 %v4571_v54, %v1421_v43  ;;  %v1905_v50 = vrot.slane %v1903_v60, 1 }
 0x273   : > { %3346 = vrsqrt.f32 %v4613_v11  ;;  %v1680_v47 = vunpack.c.l.b16 %v1640_v63  ;;  %vm1423_vm11 = vweird.f32 %v4534_v37  ;;  %vm1433_vm9 = vweird.f32 %v4559_v26 }
 0x274   : > { %v1431_v58 = vsub.f32 1.5, %v1430_v20  ;;  %3348 = vrsqrt.f32 %v4607_v5  ;;  %2060 = vrot.lane.b32.xlu0 %v4629_v41, %s3439_s19  ;;  %v1600_v55 = vadd.f32 %v4639_v38, %v1577_v4  ;;  %v1679_v10 = vunpack.c.l.b16 %v1639_v53  ;;  %vm4654_vm10 = vmor %vm1433_vm9, %vm1434_vm15 }
 0x275   : > { %v1906_v51 = vor.u32 %v1905_v50, %v1901_v8  ;;  %v1910_v32 = vrot.slane %v1908_v0, 1  ;;  %v1619_v29 = vmax.f32 %v1599_v33, 0.0  ;;  %vm4662_vm13 = vmor %vm1423_vm11, %vm1424_vm14  ;;  %v1306_v37 = vsub.f32 %v4100_v19, %v4517_v2 }
 0x276   : > { %v1432_v45 = vmul.f32 %v4592_v44, %v1431_v58  ;;  %v1620_v42 = vmax.f32 %v1600_v55, 0.0  ;;  %v1426_v3 = vsel %vm4662_vm13, %v4571_v54, %v1422_v1  ;;  %v1696_v46 = vpack.c.b16 %v1680_v47, %v1679_v10 }
 0x277   : > { %v1911_v17 = vsel %vm425_vm0, %v1906_v51, %v1910_v32  ;;  %v1305_v7 = vsub.f32 %v4085_v21, %v4496_v59  ;;  %v1649_v54 = vpack.c.bf16 %v1619_v29, %v1619_v29  ;;  %v1965_v13 = vrot.slane %v4629_v41, 1 }
 0x278   : > { %v1436_v26 = vsel %vm4654_vm10, %v4592_v44, %v1432_v45  ;;  %2088 = vrot.lane.b32.xlu1 %v1911_v17, %s3438_s18  ;;  %1916 = vrot.lane.b32.xlu2 %v4602_v39, %s3434_s14  ;;  %v1650_v19 = vpack.c.bf16 %v1620_v42, %v1620_v42  ;;  %v1725_v20 = vshrl.u32 %v1696_v46, 16  ;;  %v1966_v28 = vrot.slane %v1813_v6, 1 }
 0x279   : > { %v4642_v48 = vpop.eup %3346  ;;  %v1546_v2 = vmul.f32 %v1436_v26, %v1306_v37  ;;  %v1545_v18 = vmul.f32 %v1426_v3, %v1305_v7  ;;  %v1689_v4 = vunpack.c.l.b16 %v1649_v54  ;;  %v1728_v33 = vshll.u32 %v1696_v46, 16 }
 0x27a   : > { %v4650_v34 = vpop.eup %3348  ;;  %v1528_v31 = vmul.f32 %v4642_v48, %v4613_v11  ;;  %v1690_v21 = vunpack.c.l.b16 %v1650_v19  ;;  %v1967_v63 = vsel %vm566_vm1, %v1965_v13, %v1966_v28  ;;  %v1727_v53 = vrot.slane %v1725_v20, 7 }
 0x27b   : > { %v1518_v14 = vmul.f32 %v4650_v34, %v4607_v5  ;;  %v1569_v59 = vmul.f32 %v4620_v61, %v1546_v2  ;;  %v1568_v58 = vmul.f32 %v4620_v61, %v1545_v18  ;;  %vm1534_vm14 = vweird.f32 %v4642_v48 }
 0x27c   : > { %v1529_v44 = vmul.f32 %v4642_v48, %v1528_v31  ;;  %2078 = vrot.lane.b32.xlu0 %v4602_v39, %s3438_s18  ;;  %v1701_v39 = vpack.c.b16 %v1690_v21, %v1689_v4  ;;  %v1730_v55 = vor.u32 %v1728_v33, %v1727_v53  ;;  %vm1533_vm15 = vweird.f32 %v4613_v11 }
 0x27d   : > { %v1519_v16 = vmul.f32 %v4650_v34, %v1518_v14  ;;  %v1592_v60 = vadd.f32 %v4639_v38, %v1569_v59  ;;  %v1591_v6 = vadd.f32 %v4639_v38, %v1568_v58  ;;  %vm1524_vm11 = vweird.f32 %v4650_v34  ;;  %vm4704_vm9 = vmor %vm1533_vm15, %vm1534_vm14  ;;  %v1913_v29 = vpop.permute.xlu2 %1912 }
 0x27e   : > { %v1530_v56 = vmul.f32 0.5, %v1529_v44  ;;  %v1760_v1 = vshrl.u32 %v1701_v39, 16  ;;  %v4702_v35 = vsel %vm4236_vm12, 0, %v1730_v55  ;;  %vm1523_vm10 = vweird.f32 %v4607_v5 }
 0x27f   : > { %v1520_v43 = vmul.f32 0.5, %v1519_v16  ;;  %v1612_v8 = vmax.f32 %v1592_v60, 0.0  ;;  %v1611_v47 = vmax.f32 %v1591_v6, 0.0  ;;  %v1763_v57 = vshll.u32 %v1701_v39, 16  ;;  %vm1525_vm13 = vmor %vm1523_vm10, %vm1524_vm11 }
 0x280   : > { %2025 = vrot.lane.b32.xlu1 %v1911_v17, %s3436_s16  ;;  %2108 = vrot.lane.b32.xlu2 %v1967_v63, %s3441_s21  ;;  %v1531_v0 = vsub.f32 1.5, %v1530_v56  ;;  %v1762_v31 = vrot.slane %v1760_v1, 7  ;;  %v1316_v26 = vsub.f32 %v4128_v49, %v4563_v12  ;;  %v1809_v14 = vsel %vm4236_vm12, %v1727_v53, 0 }
 0x281   : > { %v1521_v45 = vsub.f32 1.5, %v1520_v43  ;;  %v1642_v32 = vpack.c.bf16 %v1612_v8, %v1612_v8  ;;  %v1641_v37 = vpack.c.bf16 %v1611_v47, %v1611_v47  ;;  %v1855_v5 = vshll.u32 %v4702_v35, 16 }
 0x282   : > { %v1532_v50 = vmul.f32 %v4642_v48, %v1531_v0  ;;  %v1765_v3 = vor.u32 %v1763_v57, %v1762_v31  ;;  %v1953_v19 = vrot.slane %v4702_v35, 1  ;;  %v1954_v2 = vrot.slane %v1809_v14, 1 }
 0x283   : > { %v1522_v10 = vmul.f32 %v4650_v34, %v1521_v45  ;;  %v1682_v49 = vunpack.c.l.b16 %v1642_v32  ;;  %v1681_v44 = vunpack.c.l.b16 %v1641_v37  ;;  %v1857_v18 = vrot.slane %v1855_v5, 1 }
 0x284   : > { %2045 = vrot.lane.b32.xlu0 %v1967_v63, %s3440_s20  ;;  %v1536_v11 = vsel %vm4704_vm9, %v4642_v48, %v1532_v50  ;;  %v1315_v48 = vsub.f32 %v4113_v30, %v4544_v15  ;;  %v1804_v54 = vsel %vm4236_vm12, 0, %v1765_v3  ;;  %v1853_v16 = vshrl.u32 %v4702_v35, 16 }
 0x285   : > { %v1526_v42 = vsel %vm1525_vm13, %v4650_v34, %v1522_v10  ;;  %v1556_v46 = vmul.f32 %v1536_v11, %v1316_v26  ;;  %v1697_v15 = vpack.c.b16 %v1682_v49, %v1681_v44  ;;  %v1860_v13 = vshll.u32 %v1809_v14, 16 }
 0x286   : > { %v1555_v34 = vmul.f32 %v1526_v42, %v1315_v48  ;;  %v1858_v21 = vor.u32 %v1857_v18, %v1853_v16  ;;  %v2004_v56 = vshll.u32 %v1804_v54, 16  ;;  %v1814_v53 = vsel %vm4236_vm12, %v1762_v31, 0 }
 0x287   : > { %v1579_v30 = vmul.f32 %v4620_v61, %v1556_v46  ;;  %v1862_v4 = vrot.slane %v1860_v13, 1  ;;  %v1732_v58 = vshrl.u32 %v1697_v15, 16  ;;  %v2002_v0 = vshrl.u32 %v1804_v54, 16 }
 0x288   : > { %1989 = vrot.lane.b32.xlu1 %v4702_v35, %s3437_s17  ;;  %1982 = vrot.lane.b32.xlu2 %v1967_v63, %s3435_s15  ;;  %v1578_v20 = vmul.f32 %v4620_v61, %v1555_v34  ;;  %v2006_v61 = vrot.slane %v2004_v56, 1  ;;  %v2009_v33 = vshll.u32 %v1814_v53, 16  ;;  %v1735_v45 = vshll.u32 %v1697_v15, 16 }
 0x289   : > { %v1602_v28 = vadd.f32 %v4639_v38, %v1579_v30  ;;  %v1863_v63 = vsel %vm425_vm0, %v1858_v21, %v1862_v4  ;;  %v1734_v60 = vrot.slane %v1732_v58, 7  ;;  %v2030_v57 = vrot.slane %v1804_v54, 1 }
 0x28a   : > { %v1601_v43 = vadd.f32 %v4639_v38, %v1578_v20  ;;  %v1630_v38 = vstv %s1626_s23  ;;  %v2007_v55 = vor.u32 %v2006_v61, %v2002_v0  ;;  %v2011_v10 = vrot.slane %v2009_v33, 1 }
 0x28b   : > { %v1622_v39 = vmax.f32 %v1602_v28, 0.0  ;;  %v1737_v50 = vor.u32 %v1735_v45, %v1734_v60  ;;  %v2031_v42 = vrot.slane %v1814_v53, 1  ;;  %v1810_v48 = vsel %vm4236_vm12, %v1734_v60, 0  ;;  %v2246_v60 = vld [vmem:[%s5470_s2 + $0x10] sm:$0x3] }
 0x28c   : > { %1926 = vrot.lane.b32.xlu0 %v1911_v17, %s3434_s14  ;;  %v2115_v17 = vsel %vm783_vm3, %v4251_v9, %v1913_v29  ;;  %v1955_v9 = vsel %vm566_vm1, %v1953_v19, %v1954_v2  ;;  %v1621_v6 = vmax.f32 %v1601_v43, 0.0  ;;  %v2012_v51 = vsel %vm425_vm0, %v2007_v55, %v2011_v10 }
 0x28d   : > { %v4741_v59 = vpop.permute.xlu2 %1922  ;;  %v1632_v1 = vmul.f32 %v1630_v38, %v1622_v39  ;;  %v4761_v11 = vsel %vm4236_vm12, 0, %v1737_v50  ;;  %v2032_v5 = vsel %vm566_vm1, %v2030_v57, %v2031_v42  ;;  %v1872_v49 = vshll.u32 %v1810_v48, 16 }
 0x28e   : > { %v1631_v31 = vmul.f32 %v1630_v38, %v1621_v6  ;;  %v1867_v37 = vshll.u32 %v4761_v11, 16  ;;  %v1865_v19 = vshrl.u32 %v4761_v11, 16  ;;  %v1956_v2 = vrot.slane %v4761_v11, 1 }
 0x28f   : > { %v1652_v32 = vpack.c.bf16 %v1632_v1, %v1632_v1  ;;  %v1957_v30 = vrot.slane %v1810_v48, 1  ;;  %v2256_v0 = vunpack.c.l.b16 %v2246_v60 }
 0x290   : > { %1999 = vrot.lane.b32.xlu1 %v1804_v54, %s3437_s17  ;;  %2052 = vrot.lane.b32.xlu2 %v4702_v35, %s3439_s19  ;;  %v1651_v29 = vpack.c.bf16 %v1631_v31, %v1631_v31 }
 0x291   : > { %v1969_v7 = vpop.permute.xlu0 %1968  ;;  %v1692_v26 = vunpack.c.l.b16 %v1652_v32  ;;  %v1958_v15 = vsel %vm566_vm1, %v1956_v2, %v1957_v30  ;;  %v2259_v45 = vpack.c.b16 %v2256_v0, %v2256_v0 }
 0x292   : > { %v4728_v12 = vsel %vm804_vm5, %v2115_v17, %v1969_v7  ;;  %v1691_v14 = vunpack.c.l.b16 %v1651_v29  ;;  %v1869_v17 = vrot.slane %v1867_v37, 1 }
 0x293   : > { %v2279_v50 = vsel %vm992_vm2, %v2259_v45, 0 }
 0x294   : > { %2100 = vrot.lane.b32.xlu0 %v1955_v9, %s3441_s21  ;;  %v1702_v7 = vpack.c.b16 %v1692_v26, %v1691_v14  ;;  %v1870_v44 = vor.u32 %v1869_v17, %v1865_v19  ;;  %3254 = vmatpush.bf16.msra.mxu3 %v2279_v50  ;;  %v3249_v14 = vld [vmem:[%s5470_s2] sm:$0xff] }
 0x295   : > { %v4753_v47 = vpop.permute.xlu2 %2084  ;;  %2286 = vmatpush.bf16.msra.mxu1 %v2279_v50 }
 0x296   : > { %v1767_v18 = vshrl.u32 %v1702_v7, 16  ;;  %v1770_v21 = vshll.u32 %v1702_v7, 16 }
 0x298   : > { %2080 = vrot.lane.b32.xlu1 %v1863_v63, %s3438_s18  ;;  %2037 = vrot.lane.b32.xlu2 %v1955_v9, %s3440_s20  ;;  %v1769_v20 = vrot.slane %v1767_v18, 7 }
 0x299   : > { %3255 = vmatpush.bf16.msra.mxu3 %v3250_v22  ;;  %2287 = vmatpush.bf16.msra.mxu1 %v3250_v22 }
 0x29a   : > { %v1772_v28 = vor.u32 %v1770_v21, %v1769_v20  ;;  %v1815_v33 = vsel %vm4236_vm12, %v1769_v20, 0 }
 0x29b   : > { %v2074_v1 = vshll.u32 %v1815_v33, 16  ;;  %v2096_v29 = vrot.slane %v1815_v33, 1 }
 0x29c   : > { %2017 = vrot.lane.b32.xlu0 %v1863_v63, %s3436_s16  ;;  %v1805_v43 = vsel %vm4236_vm12, 0, %v1772_v28  ;;  %vm5504_vm12 = vcmask 293888  }
 0x29d   : > { %v4769_v46 = vpop.permute.xlu2 %2033  ;;  %v4776_v34 = vpop.permute.xlu0 %2056  ;;  %v2069_v61 = vshll.u32 %v1805_v43, 16  ;;  %v2067_v55 = vshrl.u32 %v1805_v43, 16  ;;  %v2076_v32 = vrot.slane %v2074_v1, 1  ;;  %3256 = vmatpush.bf16.msra.mxu3 %v3249_v14  ;;  %2288 = vmatpush.bf16.msra.mxu1 %v3249_v14  ;;  %vm5506_vm15 = vmmov %vm5504_vm12 }
 0x29e   : > { %vm5509_vm10 = vmmov %vm5504_vm12 }
 0x29f   : > { %v2071_v6 = vrot.slane %v2069_v61, 1 }
 0x2a0   : > { %1918 = vrot.lane.b32.xlu1 %v1863_v63, %s3434_s14  ;;  %1974 = vrot.lane.b32.xlu2 %v1955_v9, %s3435_s15  ;;  %v1874_v9 = vrot.slane %v1872_v49, 1 }
 0x2a1   : > { %v4751_v8 = vpop.permute.xlu1 %1978  ;;  %v2072_v10 = vor.u32 %v2071_v6, %v2067_v55 }
 0x2a2   : > { %v1875_v13 = vsel %vm425_vm0, %v1870_v44, %v1874_v9  ;;  %v2125_v44 = vsel %vm783_vm3, %v4300_v27, %v4741_v59 }
 0x2a3   : > { %v2077_v57 = vsel %vm425_vm0, %v2072_v10, %v2076_v32  ;;  %vm5501_vm0 = vcmask 228352  }
 0x2a4   : > { %2090 = vrot.lane.b32.xlu0 %v2012_v51, %s3438_s18  ;;  %vm5503_vm2 = vmmov %vm5501_vm0 }
 0x2a5   : > { %vm5507_vm11 = vmmov %vm5501_vm0 }
 0x2a6   : > { %vm5510_vm13 = vmmov %vm5501_vm0 }
 0x2a8   : > { %2110 = vrot.lane.b32.xlu1 %v2032_v5, %s3441_s21  ;;  %2062 = vrot.lane.b32.xlu2 %v1804_v54, %s3439_s19 }
 0x2a9   : > { %v4764_v3 = vpop.permute.xlu1 %2104 }
 0x2ac   : > { %1991 = vrot.lane.b32.xlu0 %v4761_v11, %s3437_s17 }
 0x2ad   : > { %v4782_v54 = vpop.permute.xlu2 %2023 }
 0x2b0   : > { %2054 = vrot.lane.b32.xlu1 %v4761_v11, %s3439_s19  ;;  %2102 = vrot.lane.b32.xlu2 %v1958_v15, %s3441_s21 }
 0x2b2   : > { %v4785_v16 = vpop.permute.xlu1 %1985 }
 0x2b4   : > { %2082 = vrot.lane.b32.xlu0 %v1875_v13, %s3438_s18 }
 0x2b5   : > { %v1971_v56 = vpop.permute.xlu0 %1970 }
 0x2b8   : > { %2039 = vrot.lane.b32.xlu1 %v1958_v15, %s3440_s20  ;;  %2047 = vrot.lane.b32.xlu2 %v2032_v5, %s3440_s20 }
 0x2ba   : > { %v1915_v4 = vpop.permute.xlu1 %1914  ;;  %v4791_v58 = vpop.permute.xlu2 %1987 }
 0x2bb   : > { %v2117_v63 = vsel %vm783_vm3, %v4397_v23, %v1915_v4 }
 0x2bc   : > { %2027 = vrot.lane.b32.xlu0 %v2012_v51, %s3436_s16  ;;  %v4799_v53 = vsel %vm804_vm5, %v2117_v63, %v1971_v56  ;;  %v2095_v51 = vrot.slane %v1805_v43, 1 }
 0x2bd   : > { %v2149_v33 = vsel %vm825_vm4, %v4799_v53, %v4791_v58 }
 0x2be   : > { %v1996_v39 = vpop.permute.xlu0 %1995  ;;  %v2097_v26 = vsel %vm566_vm1, %v2095_v51, %v2096_v29  ;;  %vm5502_vm1 = vcmask 261120  }
 0x2bf   : > { %vm5505_vm14 = vmmov %vm5502_vm1 }
 0x2c0   : > { %2064 = vrot.lane.b32.xlu1 %v1805_v43, %s3439_s19  ;;  %2019 = vrot.lane.b32.xlu2 %v1875_v13, %s3436_s16  ;;  %vm5508_vm9 = vmmov %vm5502_vm1 }
 0x2c2   : > { %v2099_v23 = vpop.permute.xlu2 %2098  ;;  %v2044_v38 = vpop.permute.xlu1 %2043 }
 0x2c4   : > { %1920 = vrot.lane.b32.xlu0 %v1875_v13, %s3434_s14 }
 0x2c6   : > { %v2014_v31 = vpop.permute.xlu0 %2013 }
 0x2c8   : > { %1976 = vrot.lane.b32.xlu1 %v1958_v15, %s3435_s15  ;;  %2092 = vrot.lane.b32.xlu2 %v2077_v57, %s3438_s18  ;;  %s3143_s15 = sshll.u32 %s3416_s24, 3 }
 0x2c9   : > { %p296_p8 = scmp.lt.s32.totalorder %s3143_s15, 15 }
 0x2ca   : > { %v1925_v37 = vpop.permute.xlu1 %1924  ;;  %v1998_v42 = vpop.permute.xlu2 %1997 }
 0x2cb   : > { %v2127_v5 = vsel %vm783_vm3, %v4443_v24, %v1925_v37  ;;  %s5539_s15 = smov (!%p296_p8, %s3143_s15), 15 }
 0x2cc   : > { %2112 = vrot.lane.b32.xlu0 %v2097_v26, %s3441_s21  ;;  %s3144_s24 = sshll.u32 %s5539_s15, 1 }
 0x2ce   : > { %v1981_v48 = vpop.permute.xlu0 %1980 }
 0x2cf   : > { %v2143_v17 = vsel %vm804_vm5, %v2127_v5, %v1981_v48 }
 0x2d0   : > { %2021 = vrot.lane.b32.xlu1 %v4352_v25, %s3436_s16  ;;  %1993 = vrot.lane.b32.xlu2 %v4300_v27, %s3437_s17  ;;  %v2159_v51 = vsel %vm825_vm4, %v2143_v17, %v1998_v42  ;;  %s3145_s16 = sshll.u32 %s5537_s25, 5 }
 0x2d1   : > { %s300_s25 = sadd.s32 %s3145_s16, %s3144_s24 }
 0x2d2   : > { %v1917_v7 = vpop.permute.xlu2 %1916  ;;  %v2051_v49 = vpop.permute.xlu1 %2050 }
 0x2d3   : > { %v2119_v5 = vsel %vm783_vm3, %v4551_v62, %v1917_v7 }
 0x2d4   : > { %2041 = vrot.lane.b32.xlu0 %v4320_v52, %s3440_s20  ;;  %v2141_v52 = vsel %vm804_vm5, %v2125_v44, %v4751_v8 }
 0x2d5   : > { %v2157_v18 = vsel %vm825_vm4, %v2141_v52, %v1996_v39 }
 0x2d6   : > { %v2036_v19 = vpop.permute.xlu0 %2035 }
 0x2d8   : > { %2086 = vrot.lane.b32.xlu1 %v4490_v40, %s3438_s18  ;;  %2058 = vrot.lane.b32.xlu2 %v4443_v24, %s3439_s19  ;;  %v2173_v24 = vsel %vm846_vm6, %v2157_v18, %v4782_v54 }
 0x2d9   : > { %v2189_v15 = vsel %vm867_vm7, %v2173_v24, %v2044_v38 }
 0x2da   : > { %v2109_v2 = vpop.permute.xlu2 %2108 }
 0x2dc   : > { %2106 = vrot.lane.b32.xlu0 %v4462_v36, %s3441_s21  ;;  %v2016_v30 = vpop.permute.xlu1 %2015  ;;  %v2147_v36 = vsel %vm825_vm4, %v4728_v12, %v4785_v16  ;;  %s3146_s21 = sshll.u32 %s300_s25, 3 }
 0x2dd   : > { %v2163_v27 = vsel %vm846_vm6, %v2147_v36, %v2014_v31  ;;  %v2165_v6 = vsel %vm846_vm6, %v2149_v33, %v2016_v30  ;;  %s5093_s8 = scalar_lea.vmem %s5475_s7, %s3146_s21 }
 0x2de   : > { %v1973_v25 = vpop.permute.xlu0 %1972  ;;  %v2179_v8 = vsel %vm867_vm7, %v2163_v27, %v4769_v46  ;;  %v2181_v45 = vsel %vm867_vm7, %v2165_v6, %v2036_v19 }
 0x2df   : > { %v2195_v20 = vsel %vm888_vm8, %v2179_v8, %v2051_v49  ;;  %v2135_v42 = vsel %vm804_vm5, %v2119_v5, %v1973_v25 }
 0x2e2   : > { %v4842_v9 = vpop.permute.xlu2 %1982 }
 0x2e6   : > { %v2061_v40 = vpop.permute.xlu0 %2060 }
 0x2e7   : > { %v2205_v59 = vsel %vm888_vm8, %v2189_v15, %v2061_v40 }
 0x2ea   : > { %v2089_v13 = vpop.permute.xlu1 %2088  ;;  %v2053_v12 = vpop.permute.xlu2 %2052 }
 0x2eb   : > { %v2221_v21 = vsel %vm5501_vm0, %v2205_v59, %v2089_v13  ;;  %vm5511_vm0 = vmmov %vm5502_vm1 }
 0x2ec   : > { %v2237_v54 = vsel %vm5502_vm1, %v2221_v21, %v2109_v2  ;;  %vm5512_vm1 = vmmov %vm5509_vm10 }
 0x2ed   : > { %3229 = vmatmul.msk.bf16.vlgmr.msra.gmra.mxu3 %vm5504_vm12, %v2237_v54  ;;  %vm5513_vm12 = vmmov %vm5511_vm0 }
 0x2ee   : > { %v2079_v56 = vpop.permute.xlu0 %2078 }
 0x2ef   : > { %v2211_v28 = vsel %vm5503_vm2, %v2195_v20, %v2079_v56 }
 0x2f0   : > { %v2227_v16 = vsel %vm5505_vm14, %v2211_v28, %v2099_v23  ;;  %v2197_v23 = vsel %vm888_vm8, %v2181_v45, %v2053_v12  ;;  %vm5514_vm14 = vmmov %vm5512_vm1 }
 0x2f1   : > { %3224 = vmatmul.msk.bf16.vlgmr.msra.gmra.mxu1 %vm5506_vm15, %v2227_v16  ;;  %vm5515_vm15 = vmmov %vm5503_vm2 }
 0x2f2   : > { %v2026_v4 = vpop.permute.xlu1 %2025  ;;  %v2038_v46 = vpop.permute.xlu2 %2037 }
 0x2f3   : > { %v2175_v58 = vsel %vm846_vm6, %v2159_v51, %v2026_v4 }
 0x2f6   : > { %v2046_v43 = vpop.permute.xlu0 %2045 }
 0x2f7   : > { %v2191_v32 = vsel %vm867_vm7, %v2175_v58, %v2046_v43 }
 0x2fa   : > { %v1990_v63 = vpop.permute.xlu1 %1989  ;;  %v1975_v39 = vpop.permute.xlu2 %1974 }
 0x2fb   : > { %v2151_v48 = vsel %vm825_vm4, %v2135_v42, %v1990_v63 }
 0x2fe   : > { %v1927_v61 = vpop.permute.xlu0 %1926 }
 0x2ff   : > { %v2129_v36 = vsel %vm783_vm3, %v4629_v41, %v1927_v61 }
 0x300   : > { %v2145_v59 = vsel %vm804_vm5, %v2129_v36, %v4842_v9 }
 0x302   : > { %v2000_v60 = vpop.permute.xlu1 %1999  ;;  %v2063_v55 = vpop.permute.xlu2 %2062 }
 0x303   : > { %v2207_v29 = vsel %vm888_vm8, %v2191_v32, %v2063_v55  ;;  %v2161_v13 = vsel %vm825_vm4, %v2145_v59, %v2000_v60 }
 0x306   : > { %v2101_v0 = vpop.permute.xlu0 %2100 }
 0x30a   : > { %v2081_v38 = vpop.permute.xlu1 %2080  ;;  %v2103_v53 = vpop.permute.xlu2 %2102 }
 0x30b   : > { %v2213_v1 = vsel %vm5507_vm11, %v2197_v23, %v2081_v38  ;;  %vm5516_vm11 = vmmov %vm5511_vm0 }
 0x30c   : > { %v2229_v22 = vsel %vm5508_vm9, %v2213_v1, %v2101_v0  ;;  %vm5517_vm9 = vmmov %vm5512_vm1 }
 0x30d   : > { %3225 = vmatmul.msk.bf16.gmra.mxu1 %vm5509_vm10, %v2229_v22  ;;  %vm5518_vm10 = vmmov %vm5503_vm2 }
 0x30e   : > { %v2018_v50 = vpop.permute.xlu0 %2017 }
 0x30f   : > { %v2167_v17 = vsel %vm846_vm6, %v2151_v48, %v2018_v50 }
 0x310   : > { %v2183_v2 = vsel %vm867_vm7, %v2167_v17, %v2038_v46 }
 0x312   : > { %v1919_v10 = vpop.permute.xlu1 %1918  ;;  %v2048_v19 = vpop.permute.xlu2 %2047 }
 0x313   : > { %v2121_v18 = vsel %vm783_vm3, %v4702_v35, %v1919_v10 }
 0x314   : > { %v2137_v25 = vsel %vm804_vm5, %v2121_v18, %v1975_v39 }
 0x316   : > { %v2091_v31 = vpop.permute.xlu0 %2090 }
 0x317   : > { %v2223_v57 = vsel %vm5510_vm13, %v2207_v29, %v2091_v31  ;;  %vm5519_vm13 = vmmov %vm5511_vm0 }
 0x31a   : > { %v2111_v37 = vpop.permute.xlu1 %2110  ;;  %v2020_v40 = vpop.permute.xlu2 %2019 }
 0x31b   : > { %v2239_v26 = vsel %vm5511_vm0, %v2223_v57, %v2111_v37  ;;  %vm5520_vm0 = vmmov %vm5512_vm1 }
 0x31c   : > { %3230 = vmatmul.msk.bf16.gmra.mxu3 %vm5512_vm1, %v2239_v26  ;;  %vm5521_vm1 = vmmov %vm5503_vm2 }
 0x31e   : > { %v1992_v14 = vpop.permute.xlu0 %1991 }
 0x31f   : > { %v2153_v30 = vsel %vm825_vm4, %v2137_v25, %v1992_v14 }
 0x320   : > { %v2169_v15 = vsel %vm846_vm6, %v2153_v30, %v2020_v40 }
 0x322   : > { %v2055_v49 = vpop.permute.xlu1 %2054  ;;  %v2093_v41 = vpop.permute.xlu2 %2092 }
 0x323   : > { %v2199_v44 = vsel %vm888_vm8, %v2183_v2, %v2055_v49 }
 0x326   : > { %v2083_v52 = vpop.permute.xlu0 %2082 }
 0x327   : > { %v2215_v62 = vsel %vm5503_vm2, %v2199_v44, %v2083_v52  ;;  %vm5522_vm2 = vmmov %vm5516_vm11 }
 0x328   : > { %v2231_v7 = vsel %vm5513_vm12, %v2215_v62, %v2103_v53  ;;  %vm5523_vm12 = vmmov %vm5520_vm0 }
 0x329   : > { %3226 = vmatmul.msk.bf16.gmra.mxu1 %vm5514_vm14, %v2231_v7 }
 0x32a   : > { %v2040_v24 = vpop.permute.xlu1 %2039  ;;  %v1994_v46 = vpop.permute.xlu2 %1993 }
 0x32b   : > { %v2185_v35 = vsel %vm867_vm7, %v2169_v15, %v2040_v24 }
 0x32c   : > { %v2201_v8 = vsel %vm888_vm8, %v2185_v35, %v4776_v34 }
 0x32d   : > { %v2217_v56 = vsel %vm5515_vm15, %v2201_v8, %v4753_v47 }
 0x32e   : > { %v2028_v27 = vpop.permute.xlu0 %2027  ;;  %v2233_v12 = vsel %vm5516_vm11, %v2217_v56, %v4764_v3 }
 0x32f   : > { %v2177_v21 = vsel %vm846_vm6, %v2161_v13, %v2028_v27 }
 0x330   : > { %v2193_v28 = vsel %vm867_vm7, %v2177_v21, %v2048_v19 }
 0x332   : > { %v2065_v20 = vpop.permute.xlu1 %2064  ;;  %v2059_v33 = vpop.permute.xlu2 %2058 }
 0x333   : > { %v2209_v9 = vsel %vm888_vm8, %v2193_v28, %v2065_v20 }
 0x334   : > { %v2225_v4 = vsel %vm5518_vm10, %v2209_v9, %v2093_v41 }
 0x336   : > { %v1921_v54 = vpop.permute.xlu0 %1920 }
 0x337   : > { %v2123_v47 = vsel %vm783_vm3, %v4761_v11, %v1921_v54 }
 0x339   : > { %3227 = vmatmul.msk.bf16.gmra.mxu1 %vm5517_vm9, %v2233_v12 }
 0x33a   : > { %v1977_v34 = vpop.permute.xlu1 %1976 }
 0x33b   : > { %v2139_v63 = vsel %vm804_vm5, %v2123_v47, %v1977_v34  ;;  %vm2771_vm5 = vsmask.f32 7440 }
 0x33c   : > { %v2155_v3 = vsel %vm825_vm4, %v2139_v63, %v1994_v46  ;;  %vm2770_vm4 = vsmask.f32 3328 }
 0x33e   : > { %v2113_v16 = vpop.permute.xlu0 %2112 }
 0x33f   : > { %v2241_v43 = vsel %vm5519_vm13, %v2225_v4, %v2113_v16 }
 0x340   : > { %3231 = vmatmul.msk.bf16.gmra.mxu3 %vm5520_vm0, %v2241_v43 }
 0x342   : > { %v2022_v61 = vpop.permute.xlu1 %2021 }
 0x343   : > { %v2171_v60 = vsel %vm846_vm6, %v2155_v3, %v2022_v61 }
 0x346   : > { %v2042_v39 = vpop.permute.xlu0 %2041 }
 0x347   : > { %v2187_v0 = vsel %vm867_vm7, %v2171_v60, %v2042_v39  ;;  %vm5053_vm7 = vmor %vm2770_vm4, %vm2771_vm5 }
 0x348   : > { %v2203_v6 = vsel %vm888_vm8, %v2187_v0, %v2059_v33 }
 0x34a   : > { %v2087_v45 = vpop.permute.xlu1 %2086 }
 0x34b   : > { %v2219_v38 = vsel %vm5521_vm1, %v2203_v6, %v2087_v45 }
 0x34e   : > { %v2107_v23 = vpop.permute.xlu0 %2106 }
 0x34f   : > { %v2235_v11 = vsel %vm5522_vm2, %v2219_v38, %v2107_v23 }
 0x350   : > { %3228 = vmatmul.msk.bf16.gmra.mxu1 %vm5523_vm12, %v2235_v11 }
 0x36e   : > { %v4921_v55 = vpop.f32.mrf.mxu1 }
 0x36f   : > { %v2380_v1 = vmul.f32 %v4921_v55, %v4921_v55  ;;  %v2332_v50 = vsel %vm783_vm3, %v4921_v55, 0.0 }
 0x370   : > { %2333 = vadd.xlane.f32.xlu2 %v2332_v50  ;;  %v4935_v53 = vpop.f32.mrf.mxu3 }
 0x371   : > { %v2396_v22 = vsel %vm783_vm3, %v2380_v1, 0.0  ;;  %v2390_v32 = vmul.f32 %v4935_v53, %v4935_v53  ;;  %v2362_v57 = vsel %vm783_vm3, %v4935_v53, 0.0 }
 0x372   : > { %2397 = vadd.xlane.f32.xlu1 %v2396_v22 }
 0x373   : > { %v2426_v29 = vsel %vm783_vm3, %v2390_v32, 0.0 }
 0x376   : > { %v4928_v10 = vpop.f32.mrf.mxu1 }
 0x377   : > { %v2381_v31 = vmul.f32 %v4928_v10, %v4928_v10  ;;  %v2335_v58 = vsel %vm783_vm3, %v4928_v10, 0.0 }
 0x378   : > { %v4949_v42 = vpop.f32.mrf.mxu3 }
 0x379   : > { %v2399_v51 = vsel %vm783_vm3, %v2381_v31, 0.0  ;;  %v2391_v48 = vmul.f32 %v4949_v42, %v4949_v42  ;;  %v2365_v49 = vsel %vm783_vm3, %v4949_v42, 0.0 }
 0x37a   : > { %2400 = vadd.xlane.f32.xlu0 %v2399_v51  ;;  %2336 = vadd.xlane.f32.xlu1 %v2335_v58 }
 0x37b   : > { %v2429_v2 = vsel %vm783_vm3, %v2391_v48, 0.0 }
 0x382   : > { %2427 = vadd.xlane.f32.xlu0 %v2426_v29  ;;  %2363 = vadd.xlane.f32.xlu1 %v2362_v57  ;;  %v315_v29 = vld [vmem:[%s3521_s13 + $0x18] sm:$0xf] }
 0x383   : > { %v2774_v48 = vshrl.u32 %v315_v29, 16 }
 0x38a   : > { %v4942_v37 = vpop.f32.mrf.mxu1 }
 0x38b   : > { %v2382_v26 = vmul.f32 %v4942_v37, %v4942_v37  ;;  %v2338_v14 = vsel %vm783_vm3, %v4942_v37, 0.0 }
 0x38c   : > { %2339 = vadd.xlane.f32.xlu0 %v2338_v14 }
 0x38d   : > { %v2402_v5 = vsel %vm783_vm3, %v2382_v26, 0.0 }
 0x38e   : > { %2403 = vadd.xlane.f32.xlu2 %v2402_v5 }
 0x392   : > { %v4953_v17 = vpop.f32.mrf.mxu1 }
 0x393   : > { %v2383_v19 = vmul.f32 %v4953_v17, %v4953_v17  ;;  %v2341_v52 = vsel %vm783_vm3, %v4953_v17, 0.0 }
 0x394   : > { %2366 = vadd.xlane.f32.xlu0 %v2365_v49 }
 0x395   : > { %v2405_v44 = vsel %vm783_vm3, %v2383_v19, 0.0  ;;  %v2777_v19 = vshll.u32 %v315_v29, 16 }
 0x396   : > { %2430 = vadd.xlane.f32.xlu2 %v2429_v2  ;;  %2406 = vadd.xlane.f32.xlu1 %v2405_v44 }
 0x39e   : > { %2342 = vadd.xlane.f32.xlu2 %v2341_v52  ;;  %v2776_v52 = vrot.slane %v2774_v48, 4 }
 0x39f   : > { %v4963_v18 = vpop.f32.mrf.mxu3 }
 0x3a0   : > { %v2392_v62 = vmul.f32 %v4963_v18, %v4963_v18  ;;  %v2368_v40 = vsel %vm783_vm3, %v4963_v18, 0.0 }
 0x3a2   : > { %v2432_v7 = vsel %vm783_vm3, %v2392_v62, 0.0  ;;  %v2779_v62 = vrot.slane %v2777_v19, 5 }
 0x3a3   : > { %2433 = vadd.xlane.f32.xlu1 %v2432_v7 }
 0x3a6   : > { %v4968_v25 = vpop.f32.mrf.mxu1  ;;  %2369 = vadd.xlane.f32.xlu2 %v2368_v40 }
 0x3a7   : > { %v2384_v30 = vmul.f32 %v4968_v25, %v4968_v25  ;;  %v2344_v36 = vsel %vm783_vm3, %v4968_v25, 0.0  ;;  %v4984_v8 = vpop.f32.mrf.mxu3 }
 0x3a8   : > { %v2371_v13 = vsel %vm783_vm3, %v4984_v8, 0.0  ;;  %v2393_v60 = vmul.f32 %v4984_v8, %v4984_v8 }
 0x3a9   : > { %v2408_v24 = vsel %vm783_vm3, %v2384_v30, 0.0  ;;  %v316_v30 = vld [vmem:[%s3521_s13 + $0x1c] sm:$0xf] }
 0x3aa   : > { %2409 = vadd.xlane.f32.xlu0 %v2408_v24  ;;  %v2435_v6 = vsel %vm783_vm3, %v2393_v60, 0.0 }
 0x3ab   : > { %2345 = vadd.xlane.f32.xlu1 %v2344_v36 }
 0x3ae   : > { %v4977_v15 = vpop.f32.mrf.mxu1 }
 0x3af   : > { %v2385_v27 = vmul.f32 %v4977_v15, %v4977_v15  ;;  %v2347_v59 = vsel %vm783_vm3, %v4977_v15, 0.0 }
 0x3b1   : > { %v2411_v35 = vsel %vm783_vm3, %v2385_v27, 0.0 }
 0x3b2   : > { %2412 = vadd.xlane.f32.xlu2 %v2411_v35  ;;  %2348 = vadd.xlane.f32.xlu0 %v2347_v59  ;;  %v2787_v35 = vshrl.u32 %v316_v30, 16 }
 0x3b3   : > { %2372 = vadd.xlane.f32.xlu1 %v2371_v13 }
 0x3b6   : > { %v4988_v20 = vpop.f32.mrf.mxu1 }
 0x3b7   : > { %v2386_v21 = vmul.f32 %v4988_v20, %v4988_v20  ;;  %v2350_v56 = vsel %vm783_vm3, %v4988_v20, 0.0 }
 0x3b9   : > { %v2414_v41 = vsel %vm783_vm3, %v2386_v21, 0.0  ;;  %v2783_v21 = vshll.u32 %v316_v30, 16 }
 0x3ba   : > { %2351 = vadd.xlane.f32.xlu2 %v2350_v56  ;;  %v2780_v56 = vor.u32 %v2779_v62, %v2776_v52 }
 0x3bb   : > { %2415 = vadd.xlane.f32.xlu1 %v2414_v41 }
 0x3be   : > { %v4995_v54 = vpop.f32.mrf.mxu1 }
 0x3bf   : > { %v2353_v9 = vsel %vm783_vm3, %v4995_v54, 0.0  ;;  %v2387_v34 = vmul.f32 %v4995_v54, %v4995_v54 }
 0x3c1   : > { %v2417_v4 = vsel %vm783_vm3, %v2387_v34, 0.0 }
 0x3c3   : > { %v4997_v28 = vpop.f32.mrf.mxu3  ;;  %2354 = vadd.xlane.f32.xlu1 %v2353_v9 }
 0x3c4   : > { %v2374_v12 = vsel %vm783_vm3, %v4997_v28, 0.0  ;;  %v2394_v23 = vmul.f32 %v4997_v28, %v4997_v28 }
 0x3c5   : > { %2375 = vadd.xlane.f32.xlu0 %v2374_v12 }
 0x3c6   : > { %v2438_v50 = vsel %vm783_vm3, %v2394_v23, 0.0 }
 0x3cb   : > { %v5005_v16 = vpop.f32.mrf.mxu3 }
 0x3cc   : > { %v2377_v43 = vsel %vm783_vm3, %v5005_v16, 0.0  ;;  %v2395_v33 = vmul.f32 %v5005_v16, %v5005_v16 }
 0x3cd   : > { %2418 = vadd.xlane.f32.xlu0 %v2417_v4  ;;  %2378 = vadd.xlane.f32.xlu2 %v2377_v43  ;;  %v5010_v46 = vpop.f32.mrf.mxu1  ;;  %v2789_v4 = vrot.slane %v2787_v35, 4 }
 0x3ce   : > { %v2388_v47 = vmul.f32 %v5010_v46, %v5010_v46  ;;  %v2356_v61 = vsel %vm783_vm3, %v5010_v46, 0.0  ;;  %v2441_v38 = vsel %vm783_vm3, %v2395_v33, 0.0 }
 0x3d0   : > { %v2420_v63 = vsel %vm783_vm3, %v2388_v47, 0.0  ;;  %v2785_v47 = vrot.slane %v2783_v21, 5 }
 0x3d5   : > { %2421 = vadd.xlane.f32.xlu2 %v2420_v63  ;;  %2357 = vadd.xlane.f32.xlu0 %v2356_v61  ;;  %v5017_v3 = vpop.f32.mrf.mxu1  ;;  %v2781_v63 = vrot.slane %v2780_v56, 4 }
 0x3d6   : > { %v2389_v39 = vmul.f32 %v5017_v3, %v5017_v3  ;;  %v2359_v45 = vsel %vm783_vm3, %v5017_v3, 0.0 }
 0x3d8   : > { %v2423_v0 = vsel %vm783_vm3, %v2389_v39, 0.0  ;;  %v3393_v39 = vld [vmem:[%s5474_s6] ss:$0 sm:$0xff] }
 0x3d9   : > { %2424 = vadd.xlane.f32.xlu1 %v2423_v0  ;;  %v3384_v0 = vld [vmem:[%s3521_s13 + $0x20] sm:$0x1] }
 0x3da   : > { %v2793_v33 = vshll.u32 %v3384_v0, 16 }
 0x3dd   : > { %2436 = vadd.xlane.f32.xlu0 %v2435_v6  ;;  %2360 = vadd.xlane.f32.xlu2 %v2359_v45  ;;  %v330_v45 = vld [vmem:[%s3521_s13 + $0x54] sm:$0xf] }
 0x3de   : > { %v2897_v29 = vshll.u32 %v330_v45, 16 }
 0x3e1   : > { %2442 = vadd.xlane.f32.xlu1 %v2441_v38  ;;  %v2790_v38 = vor.u32 %v2789_v4, %v2785_v47 }
 0x3e3   : > { %v2334_v11 = vpop.xlane.xlu2 %2333 }
 0x3e4   : > { %v5032_v1 = vmul.f32 0.25, %v2334_v11 }
 0x3e5   : > { %v2398_v22 = vpop.xlane.xlu1 %2397  ;;  %2439 = vadd.xlane.f32.xlu2 %v2438_v50  ;;  %v5066_v50 = vld [vmem:[%s5473_s5] ss:$0 sm:$0xff] }
 0x3e6   : > { %v2476_v31 = vmul.f32 %v5032_v1, %v5032_v1  ;;  %v2460_v51 = vmul.f32 0.25, %v2398_v22  ;;  %v2524_v11 = vsub.f32 %v4921_v55, %v5032_v1  ;;  %v5076_v55 = vld [vmem:[%s5474_s6] ss:$0 sm:$0xff] }
 0x3e8   : > { %v2492_v58 = vsub.f32 %v2460_v51, %v2476_v31  ;;  %v2786_v31 = vsel %vm5053_vm7, %v2781_v63, %v2785_v47 }
 0x3e9   : > { %v2981_v48 = vunpack.c.l.bf16 %v2786_v31 }
 0x3ea   : > { %v2508_v32 = vmax.f32 %v2492_v58, 0.0 }
 0x3ec   : > { %v2540_v57 = vadd.f32 1e-05, %v2508_v32  ;;  %v2894_v32 = vshrl.u32 %v330_v45, 16 }
 0x3ed   : > { %v2337_v26 = vpop.xlane.xlu1 %2336  ;;  %v2401_v14 = vpop.xlane.xlu0 %2400 }
 0x3ee   : > { %3350 = vrsqrt.f32 %v2540_v57  ;;  %v5038_v5 = vmul.f32 0.25, %v2337_v26  ;;  %v2461_v2 = vmul.f32 0.25, %v2401_v14  ;;  %vm2562_vm8 = vweird.f32 %v2540_v57 }
 0x3ef   : > { %v2791_v26 = vrot.slane %v2790_v38, 4  ;;  %v2795_v14 = vrot.slane %v2793_v33, 5  ;;  %v2896_v62 = vrot.slane %v2894_v32, 4 }
 0x3f0   : > { %v2477_v49 = vmul.f32 %v5038_v5, %v5038_v5 }
 0x3f1   : > { %v2796_v35 = vsel %vm5053_vm7, %v2791_v26, %v2795_v14 }
 0x3f2   : > { %v2493_v44 = vsub.f32 %v2461_v2, %v2477_v49 }
 0x3f4   : > { %v3351_v7 = vpop.eup %3350  ;;  %v2509_v40 = vmax.f32 %v2493_v44, 0.0 }
 0x3f5   : > { %v2557_v24 = vmul.f32 %v3351_v7, %v2540_v57  ;;  %v2364_v36 = vpop.xlane.xlu1 %2363  ;;  %v2428_v27 = vpop.xlane.xlu0 %2427  ;;  %vm2563_vm6 = vweird.f32 %v3351_v7 }
 0x3f6   : > { %v5044_v59 = vadd.f32 1e-05, %v2509_v40  ;;  %v5046_v13 = vmul.f32 0.25, %v2364_v36  ;;  %v2470_v9 = vmul.f32 0.25, %v2428_v27  ;;  %vm2564_vm14 = vmor %vm2562_vm8, %vm2563_vm6 }
 0x3f7   : > { %v2558_v41 = vmul.f32 %v3351_v7, %v2557_v24  ;;  %v5084_v24 = vld [vmem:[%s3521_s13 + $0x58] sm:$0xf] }
 0x3f8   : > { %3352 = vrsqrt.f32 %v5044_v59  ;;  %v2486_v12 = vmul.f32 %v5046_v13, %v5046_v13  ;;  %vm2572_vm11 = vweird.f32 %v5044_v59 }
 0x3f9   : > { %v2559_v34 = vmul.f32 0.5, %v2558_v41  ;;  %v2525_v41 = vsub.f32 %v4928_v10, %v5038_v5  ;;  %v2982_v10 = vunpack.c.l.bf16 %v2796_v35  ;;  %v5121_v35 = vld [vmem:[%s3521_s13 + $0x28] sm:$0xf] }
 0x3fa   : > { %v2502_v43 = vsub.f32 %v2470_v9, %v2486_v12 }
 0x3fb   : > { %v2560_v61 = vsub.f32 1.5, %v2559_v34 }
 0x3fc   : > { %v2518_v60 = vmax.f32 %v2502_v43, 0.0  ;;  %v2903_v43 = vshll.u32 %v5084_v24, 16 }
 0x3fd   : > { %v2561_v6 = vmul.f32 %v3351_v7, %v2560_v61 }
 0x3fe   : > { %v3353_v23 = vpop.eup %3352  ;;  %v5068_v22 = vadd.f32 1e-05, %v2518_v60 }
 0x3ff   : > { %v2565_v51 = vsel %vm2564_vm14, %v3351_v7, %v2561_v6  ;;  %v2567_v58 = vmul.f32 %v3353_v23, %v5044_v59  ;;  %v2340_v49 = vpop.xlane.xlu0 %2339  ;;  %v2899_v7 = vrot.slane %v2897_v29, 5  ;;  %vm2573_vm15 = vweird.f32 %v3353_v23  ;;  %v318_v6 = vld [vmem:[%s3521_s13 + $0x24] sm:$0xf] }
 0x400   : > { %v2716_v1 = vmul.f32 %v2565_v51, %v2524_v11  ;;  %3354 = vrsqrt.f32 %v5068_v22  ;;  %v5080_v44 = vmul.f32 0.25, %v2340_v49  ;;  %vm2574_vm9 = vmor %vm2572_vm11, %vm2573_vm15  ;;  %v5106_v11 = vrot.slane %v2903_v43, 5 }
 0x401   : > { %v2568_v57 = vmul.f32 %v3353_v23, %v2567_v58  ;;  %v2404_v30 = vpop.xlane.xlu2 %2403  ;;  %v2900_v4 = vor.u32 %v2899_v7, %v2896_v62  ;;  %v2798_v29 = vshrl.u32 %v318_v6, 16  ;;  %vm2662_vm13 = vweird.f32 %v5068_v22 }
 0x402   : > { %v2735_v19 = vmul.f32 %v5066_v50, %v2716_v1  ;;  %v2478_v36 = vmul.f32 %v5080_v44, %v5080_v44  ;;  %v2462_v56 = vmul.f32 0.25, %v2404_v30 }
 0x403   : > { %v2569_v2 = vmul.f32 0.5, %v2568_v57  ;;  %v2901_v38 = vrot.slane %v2900_v4, 4  ;;  %v2801_v57 = vshll.u32 %v318_v6, 16 }
 0x404   : > { %v2754_v52 = vadd.f32 %v5076_v55, %v2735_v19  ;;  %v2494_v47 = vsub.f32 %v2462_v56, %v2478_v36  ;;  %v2534_v19 = vsub.f32 %v4935_v53, %v5046_v13 }
 0x405   : > { %v2570_v40 = vsub.f32 1.5, %v2569_v2  ;;  %v2906_v49 = vsel %vm5053_vm7, %v2901_v38, %v5106_v11  ;;  %v2803_v36 = vrot.slane %v2801_v57, 5 }
 0x406   : > { %v3355_v27 = vpop.eup %3354  ;;  %v2997_v21 = vadd.f32 %v2981_v48, %v2754_v52  ;;  %v2510_v0 = vmax.f32 %v2494_v47, 0.0  ;;  %v2991_v53 = vunpack.c.l.bf16 %v2906_v49 }
 0x407   : > { %v2571_v12 = vmul.f32 %v3353_v23, %v2570_v40  ;;  %v2657_v9 = vmul.f32 %v3355_v27, %v5068_v22  ;;  %v2367_v33 = vpop.xlane.xlu0 %2366  ;;  %vm2663_vm10 = vweird.f32 %v3355_v27  ;;  %v2800_v40 = vrot.slane %v2798_v29, 4 }
 0x408   : > { %v3013_v34 = vmax.f32 %v2997_v21, 0.0  ;;  %v5103_v45 = vmul.f32 0.25, %v2367_v33  ;;  %v5108_v31 = vadd.f32 1e-05, %v2510_v0  ;;  %vm2664_vm0 = vmor %vm2662_vm13, %vm2663_vm10 }
 0x409   : > { %v2575_v63 = vsel %vm2574_vm9, %v3353_v23, %v2571_v12  ;;  %v2658_v61 = vmul.f32 %v3355_v27, %v2657_v9  ;;  %v2431_v51 = vpop.xlane.xlu2 %2430  ;;  %v2407_v52 = vpop.xlane.xlu1 %2406  ;;  %v2804_v9 = vor.u32 %v2803_v36, %v2800_v40 }
 0x40a   : > { %3029 = vst.msk [vmem:[%s5093_s8] sm:$0xff] %vm783_vm3, %v3013_v34  ;;  %v2717_v60 = vmul.f32 %v2575_v63, %v2525_v41  ;;  %v2471_v58 = vmul.f32 0.25, %v2431_v51  ;;  %v2487_v1 = vmul.f32 %v5103_v45, %v5103_v45  ;;  %3356 = vrsqrt.f32 %v5108_v31  ;;  %v3385_v51 = vld [vmem:[%s3521_s13 + $0x5c] sm:$0x1] }
 0x40b   : > { %v2659_v5 = vmul.f32 0.5, %v2658_v61  ;;  %v2807_v34 = vshll.u32 %v5121_v35, 16  ;;  %v2463_v63 = vmul.f32 0.25, %v2407_v52  ;;  %vm2582_vm2 = vweird.f32 %v5108_v31 }
 0x40c   : > { %v2736_v59 = vmul.f32 %v5066_v50, %v2717_v60  ;;  %v2503_v14 = vsub.f32 %v2471_v58, %v2487_v1  ;;  %v2811_v52 = vshrl.u32 %v5121_v35, 16 }
 0x40d   : > { %v2660_v23 = vsub.f32 1.5, %v2659_v5  ;;  %v5137_v5 = vrot.slane %v2807_v34, 5 }
 0x40e   : > { %v2755_v32 = vadd.f32 %v5076_v55, %v2736_v59  ;;  %v2519_v62 = vmax.f32 %v2503_v14, 0.0 }
 0x40f   : > { %v2661_v26 = vmul.f32 %v3355_v27, %v2660_v23  ;;  %v2913_v23 = vshll.u32 %v3385_v51, 16 }
 0x410   : > { %v2998_v48 = vadd.f32 %v2982_v10, %v2755_v32  ;;  %v5123_v22 = vadd.f32 1e-05, %v2519_v62  ;;  %v3357_v21 = vpop.eup %3356  ;;  %v2805_v10 = vrot.slane %v2804_v9, 4  ;;  %v3387_v9 = vld [vmem:[%s3521_s13 + $0x2c] sm:$0x1] }
 0x411   : > { %v2665_v2 = vsel %vm2664_vm0, %v3355_v27, %v2661_v26  ;;  %v2343_v56 = vpop.xlane.xlu2 %2342  ;;  %v2577_v41 = vmul.f32 %v3357_v21, %v5108_v31  ;;  %v2907_v27 = vshrl.u32 %v5084_v24, 16  ;;  %vm2583_vm1 = vweird.f32 %v3357_v21 }
 0x412   : > { %v3014_v7 = vmax.f32 %v2998_v48, 0.0  ;;  %v2726_v30 = vmul.f32 %v2665_v2, %v2534_v19  ;;  %3358 = vrsqrt.f32 %v5123_v22  ;;  %v5133_v4 = vmul.f32 0.25, %v2343_v56  ;;  %vm2584_vm12 = vmor %vm2582_vm2, %vm2583_vm1 }
 0x413   : > { %v2578_v43 = vmul.f32 %v3357_v21, %v2577_v41  ;;  %v2909_v0 = vrot.slane %v2907_v27, 4  ;;  %v2810_v48 = vsel %vm5053_vm7, %v2805_v10, %v5137_v5  ;;  %v2526_v19 = vsub.f32 %v4942_v37, %v5080_v44  ;;  %v3386_v27 = vld [vmem:[%s3521_s13 + $0x38] sm:$0x1] }
 0x414   : > { %3030 = vst.msk [vmem:[%s5093_s8 + $0x8] sm:$0xff] %vm783_vm3, %v3014_v7  ;;  %v2745_v13 = vmul.f32 %v5066_v50, %v2726_v30  ;;  %v2479_v61 = vmul.f32 %v5133_v4, %v5133_v4  ;;  %v2915_v7 = vrot.slane %v2913_v23, 5  ;;  %v2983_v37 = vunpack.c.l.bf16 %v2810_v48 }
 0x415   : > { %v2579_v60 = vmul.f32 0.5, %v2578_v43  ;;  %v2910_v57 = vor.u32 %v2909_v0, %v5106_v11  ;;  %v2817_v34 = vshll.u32 %v3387_v9, 16  ;;  %v2813_v43 = vrot.slane %v2811_v52, 4  ;;  %v321_v52 = vld [vmem:[%s3521_s13 + $0x30] sm:$0xf] }
 0x416   : > { %v2764_v12 = vadd.f32 %v5076_v55, %v2745_v13  ;;  %v2434_v24 = vpop.xlane.xlu1 %2433  ;;  %v2495_v6 = vsub.f32 %v2463_v63, %v2479_v61  ;;  %vm2672_vm5 = vweird.f32 %v5123_v22 }
 0x417   : > { %v2580_v38 = vsub.f32 1.5, %v2579_v60  ;;  %v2472_v62 = vmul.f32 0.25, %v2434_v24  ;;  %v2911_v44 = vrot.slane %v2910_v57, 4  ;;  %v2535_v24 = vsub.f32 %v4949_v42, %v5103_v45 }
 0x418   : > { %v3007_v47 = vadd.f32 %v2991_v53, %v2764_v12  ;;  %v3359_v59 = vpop.eup %3358  ;;  %v2511_v1 = vmax.f32 %v2495_v6, 0.0  ;;  %v2841_v12 = vshll.u32 %v3386_v27, 16 }
 0x419   : > { %v2667_v58 = vmul.f32 %v3359_v59, %v5123_v22  ;;  %v2370_v32 = vpop.xlane.xlu2 %2369  ;;  %v2581_v29 = vmul.f32 %v3357_v21, %v2580_v38  ;;  %vm2673_vm4 = vweird.f32 %v3359_v59  ;;  %v2916_v0 = vsel %vm5053_vm7, %v2911_v44, %v2915_v7 }
 0x41a   : > { %v3023_v33 = vmax.f32 %v3007_v47, 0.0  ;;  %v5145_v26 = vmul.f32 0.25, %v2370_v32  ;;  %v5152_v2 = vadd.f32 1e-05, %v2511_v1  ;;  %vm2674_vm6 = vmor %vm2672_vm5, %vm2673_vm4  ;;  %v5176_v1 = vld [vmem:[%s3521_s13 + $0x64] sm:$0xf] }
 0x41b   : > { %v2668_v49 = vmul.f32 %v3359_v59, %v2667_v58  ;;  %v2585_v31 = vsel %vm2584_vm12, %v3357_v21, %v2581_v29  ;;  %v333_v21 = vld [vmem:[%s3521_s13 + $0x60] sm:$0xf]  ;;  %v2814_v29 = vor.u32 %v2813_v43, %v5137_v5  ;;  %v5181_v57 = vrot.slane %v2841_v12, 5 }
 0x41c   : > { %3039 = vst.msk [vmem:[%s5093_s8 + $0x50] sm:$0xff] %vm783_vm3, %v3023_v33  ;;  %v2488_v11 = vmul.f32 %v5145_v26, %v5145_v26  ;;  %v2718_v30 = vmul.f32 %v2585_v31, %v2526_v19  ;;  %3360 = vrsqrt.f32 %v5152_v2  ;;  %v2918_v33 = vshrl.u32 %v333_v21, 16 }
 0x41d   : > { %v2410_v14 = vpop.xlane.xlu0 %2409  ;;  %v2669_v40 = vmul.f32 0.5, %v2668_v49  ;;  %v2921_v22 = vshll.u32 %v333_v21, 16  ;;  %v2992_v19 = vunpack.c.l.bf16 %v2916_v0  ;;  %v2927_v5 = vshll.u32 %v5176_v1, 16 }
 0x41e   : > { %v2504_v36 = vsub.f32 %v2472_v62, %v2488_v11  ;;  %v2346_v53 = vpop.xlane.xlu1 %2345  ;;  %v2737_v13 = vmul.f32 %v5066_v50, %v2718_v30  ;;  %v2464_v41 = vmul.f32 0.25, %v2410_v14  ;;  %v2819_v14 = vrot.slane %v2817_v34, 5 }
 0x41f   : > { %v2670_v35 = vsub.f32 1.5, %v2669_v40  ;;  %v5160_v56 = vmul.f32 0.25, %v2346_v53  ;;  %v2920_v11 = vrot.slane %v2918_v33, 4  ;;  %v2923_v7 = vrot.slane %v2921_v22, 5  ;;  %v5193_v40 = vld [vmem:[%s3521_s13 + $0x40] sm:$0xf] }
 0x420   : > { %v2520_v47 = vmax.f32 %v2504_v36, 0.0  ;;  %v2756_v63 = vadd.f32 %v5076_v55, %v2737_v13  ;;  %v2815_v44 = vrot.slane %v2814_v29, 4  ;;  %v2822_v13 = vshrl.u32 %v321_v52, 16 }
 0x421   : > { %v2671_v61 = vmul.f32 %v3359_v59, %v2670_v35  ;;  %v2480_v60 = vmul.f32 %v5160_v56, %v5160_v56  ;;  %v2825_v35 = vshll.u32 %v321_v52, 16  ;;  %v2855_v43 = vshll.u32 %v5193_v40, 16 }
 0x422   : > { %v5173_v10 = vadd.f32 1e-05, %v2520_v47  ;;  %v3361_v38 = vpop.eup %3360  ;;  %v2999_v51 = vadd.f32 %v2983_v37, %v2756_v63  ;;  %v2924_v47 = vor.u32 %v2923_v7, %v2920_v11  ;;  %vm2592_vm14 = vweird.f32 %v5152_v2 }
 0x423   : > { %v2675_v23 = vsel %vm2674_vm6, %v3359_v59, %v2671_v61  ;;  %v2496_v58 = vsub.f32 %v2464_v41, %v2480_v60  ;;  %v2587_v42 = vmul.f32 %v3361_v38, %v5152_v2  ;;  %vm2593_vm8 = vweird.f32 %v3361_v38 }
 0x424   : > { %v2727_v32 = vmul.f32 %v2675_v23, %v2535_v24  ;;  %3362 = vrsqrt.f32 %v5173_v10  ;;  %v3015_v48 = vmax.f32 %v2999_v51, 0.0  ;;  %v2820_v33 = vsel %vm5053_vm7, %v2815_v44, %v2819_v14  ;;  %vm2594_vm15 = vmor %vm2592_vm14, %vm2593_vm8 }
 0x425   : > { %v2413_v6 = vpop.xlane.xlu2 %2412  ;;  %v2349_v45 = vpop.xlane.xlu0 %2348  ;;  %v2588_v49 = vmul.f32 %v3361_v38, %v2587_v42  ;;  %v2512_v31 = vmax.f32 %v2496_v58, 0.0  ;;  %v5210_v22 = vrot.slane %v2927_v5, 5  ;;  %v2827_v29 = vrot.slane %v2825_v35, 5 }
 0x426   : > { %v2746_v59 = vmul.f32 %v5066_v50, %v2727_v32  ;;  %v5185_v62 = vpop.xlane.xlu1 %2372  ;;  %3031 = vst.msk [vmem:[%s5093_s8 + $0x10] sm:$0xff] %vm783_vm3, %v3015_v48  ;;  %v5190_v30 = vmul.f32 0.25, %v2349_v45  ;;  %v2465_v21 = vmul.f32 0.25, %v2413_v6  ;;  %v2527_v6 = vsub.f32 %v4953_v17, %v5133_v4  ;;  %v322_v48 = vld [vmem:[%s3521_s13 + $0x34] sm:$0xf] }
 0x427   : > { %v2589_v36 = vmul.f32 0.5, %v2588_v49  ;;  %v5196_v53 = vadd.f32 1e-05, %v2512_v31  ;;  %v2824_v32 = vrot.slane %v2822_v13, 4  ;;  %v2984_v4 = vunpack.c.l.bf16 %v2820_v33 }
 0x428   : > { %v2765_v37 = vadd.f32 %v5076_v55, %v2746_v59  ;;  %v2481_v41 = vmul.f32 %v5190_v30, %v5190_v30  ;;  %v2925_v59 = vrot.slane %v2924_v47, 4  ;;  %v2835_v49 = vshrl.u32 %v322_v48, 16 }
 0x429   : > { %v2590_v9 = vsub.f32 1.5, %v2589_v36  ;;  %3364 = vrsqrt.f32 %v5196_v53  ;;  %vm2682_vm9 = vweird.f32 %v5173_v10  ;;  %v2828_v11 = vor.u32 %v2827_v29, %v2824_v32  ;;  %v324_v29 = vld [vmem:[%s3521_s13 + $0x3c] sm:$0xf] }
 0x42a   : > { %v3363_v27 = vpop.eup %3362  ;;  %v3008_v12 = vadd.f32 %v2992_v19, %v2765_v37  ;;  %v2497_v61 = vsub.f32 %v2465_v21, %v2481_v41  ;;  %v2831_v7 = vshll.u32 %v322_v48, 16  ;;  %v5224_v35 = vrot.slane %v2855_v43, 5 }
 0x42b   : > { %v2677_v63 = vmul.f32 %v3363_v27, %v5173_v10  ;;  %v2591_v0 = vmul.f32 %v3361_v38, %v2590_v9  ;;  %vm2683_vm11 = vweird.f32 %v3363_v27  ;;  %v2930_v21 = vsel %vm5053_vm7, %v2925_v59, %v5210_v22 }
 0x42c   : > { %v3024_v60 = vmax.f32 %v3008_v12, 0.0  ;;  %v2513_v23 = vmax.f32 %v2497_v61, 0.0  ;;  %v2536_v41 = vsub.f32 %v4963_v18, %v5145_v26  ;;  %vm2684_vm10 = vmor %vm2682_vm9, %vm2683_vm11  ;;  %v2837_v10 = vrot.slane %v2835_v49, 4 }
 0x42d   : > { %v2352_v34 = vpop.xlane.xlu2 %2351  ;;  %v2678_v51 = vmul.f32 %v3363_v27, %v2677_v63  ;;  %v2595_v58 = vsel %vm2594_vm15, %v3361_v38, %v2591_v0  ;;  %v2859_v43 = vshrl.u32 %v5193_v40, 16  ;;  %v2833_v0 = vrot.slane %v2831_v7, 5 }
 0x42e   : > { %v5204_v24 = vmul.f32 0.25, %v2352_v34  ;;  %3040 = vst.msk [vmem:[%s5093_s8 + $0x58] sm:$0xff] %vm783_vm3, %v3024_v60  ;;  %v2416_v42 = vpop.xlane.xlu1 %2415  ;;  %v2719_v2 = vmul.f32 %v2595_v58, %v2527_v6  ;;  %v5215_v19 = vadd.f32 1e-05, %v2513_v23  ;;  %v2829_v60 = vrot.slane %v2828_v11, 4 }
 0x42f   : > { %v2679_v45 = vmul.f32 0.5, %v2678_v51  ;;  %v3365_v17 = vpop.eup %3364  ;;  %v2466_v5 = vmul.f32 0.25, %v2416_v42  ;;  %v2993_v23 = vunpack.c.l.bf16 %v2930_v21  ;;  %v2528_v32 = vsub.f32 %v4968_v25, %v5160_v56 }
 0x430   : > { %v2482_v14 = vmul.f32 %v5204_v24, %v5204_v24  ;;  %v2738_v52 = vmul.f32 %v5066_v50, %v2719_v2  ;;  %v2597_v38 = vmul.f32 %v3365_v17, %v5196_v53  ;;  %3366 = vrsqrt.f32 %v5215_v19 }
 0x431   : > { %v2680_v31 = vsub.f32 1.5, %v2679_v45  ;;  %vm2603_vm13 = vweird.f32 %v3365_v17  ;;  %vm2602_vm0 = vweird.f32 %v5196_v53  ;;  %v2838_v42 = vor.u32 %v2837_v10, %v2833_v0  ;;  %v3388_v53 = vld [vmem:[%s3521_s13 + $0x44] sm:$0x1] }
 0x432   : > { %v2757_v37 = vadd.f32 %v5076_v55, %v2738_v52  ;;  %v2598_v36 = vmul.f32 %v3365_v17, %v2597_v38  ;;  %v2498_v13 = vsub.f32 %v2466_v5, %v2482_v14  ;;  %vm2604_vm1 = vmor %vm2602_vm0, %vm2603_vm13  ;;  %v2846_v14 = vshrl.u32 %v324_v29, 16 }
 0x433   : > { %v2681_v44 = vmul.f32 %v3363_v27, %v2680_v31  ;;  %v2861_v59 = vrot.slane %v2859_v43, 4  ;;  %v2865_v49 = vshll.u32 %v3388_v53, 16  ;;  %v2839_v11 = vrot.slane %v2838_v42, 4 }
 0x434   : > { %v3000_v12 = vadd.f32 %v2984_v4, %v2757_v37  ;;  %v2599_v34 = vmul.f32 0.5, %v2598_v36  ;;  %v2514_v47 = vmax.f32 %v2498_v13, 0.0  ;;  %v2849_v4 = vshll.u32 %v324_v29, 16 }
 0x435   : > { %v2685_v9 = vsel %vm2684_vm10, %v3363_v27, %v2681_v44  ;;  %v2931_v27 = vshrl.u32 %v5176_v1, 16  ;;  %v2834_v1 = vsel %vm5053_vm7, %v2829_v60, %v2833_v0  ;;  %v2848_v10 = vrot.slane %v2846_v14, 4  ;;  %v3389_v60 = vld [vmem:[%s3521_s13 + $0x68] sm:$0x1] }
 0x436   : > { %v2728_v61 = vmul.f32 %v2685_v9, %v2536_v41  ;;  %v3016_v33 = vmax.f32 %v3000_v12, 0.0  ;;  %v2600_v6 = vsub.f32 1.5, %v2599_v34  ;;  %v5235_v18 = vadd.f32 1e-05, %v2514_v47  ;;  %v2355_v26 = vpop.xlane.xlu1 %2354  ;;  %v3367_v51 = vpop.eup %3366 }
 0x437   : > { %v2607_v2 = vmul.f32 %v3367_v51, %v5215_v19  ;;  %v5251_v25 = vmul.f32 0.25, %v2355_v26  ;;  %v2933_v38 = vrot.slane %v2931_v27, 4  ;;  %v2985_v5 = vunpack.c.l.bf16 %v2834_v1 }
 0x438   : > { %v5232_v63 = vpop.xlane.xlu0 %2375  ;;  %v2747_v58 = vmul.f32 %v5066_v50, %v2728_v61  ;;  %3032 = vst.msk [vmem:[%s5093_s8 + $0x18] sm:$0xff] %vm783_vm3, %v3016_v33  ;;  %v2601_v40 = vmul.f32 %v3365_v17, %v2600_v6  ;;  %3368 = vrsqrt.f32 %v5235_v18  ;;  %vm2613_vm2 = vweird.f32 %v3367_v51 }
 0x439   : > { %v2608_v48 = vmul.f32 %v3367_v51, %v2607_v2  ;;  %v2483_v13 = vmul.f32 %v5251_v25, %v5251_v25  ;;  %v2851_v12 = vrot.slane %v2849_v4, 5  ;;  %v2862_v34 = vor.u32 %v2861_v59, %v5224_v35 }
 0x43a   : > { %v2766_v45 = vadd.f32 %v5076_v55, %v2747_v58  ;;  %v2605_v56 = vsel %vm2604_vm1, %v3365_v17, %v2601_v40  ;;  %v5262_v47 = vrot.slane %v2865_v49, 5  ;;  %v2937_v0 = vshll.u32 %v3389_v60, 16 }
 0x43b   : > { %v2720_v31 = vmul.f32 %v2605_v56, %v2528_v32  ;;  %v2609_v7 = vmul.f32 0.5, %v2608_v48  ;;  %vm2612_vm12 = vweird.f32 %v5215_v19  ;;  %v2934_v26 = vor.u32 %v2933_v38, %v5210_v22 }
 0x43c   : > { %v3009_v52 = vadd.f32 %v2993_v23, %v2766_v45  ;;  %v2529_v23 = vsub.f32 %v4977_v15, %v5190_v30  ;;  %vm2614_vm4 = vmor %vm2612_vm12, %vm2613_vm2  ;;  %v2844_v32 = vsel %vm5053_vm7, %v2839_v11, %v5181_v57  ;;  %v2852_v19 = vor.u32 %v2851_v12, %v2848_v10  ;;  %v5286_v15 = vld [vmem:[%s3521_s13 + $0x70] sm:$0xf] }
 0x43d   : > { %v2739_v17 = vmul.f32 %v5066_v50, %v2720_v31  ;;  %v2610_v41 = vsub.f32 1.5, %v2609_v7  ;;  %v5279_v42 = vrot.slane %v2862_v34, 4  ;;  %v5283_v1 = vrot.slane %v2937_v0, 5 }
 0x43e   : > { %v3025_v36 = vmax.f32 %v3009_v52, 0.0  ;;  %v5259_v9 = vpop.eup %3368  ;;  %v5288_v14 = vrot.slane %v2934_v26, 4  ;;  %v2986_v57 = vunpack.c.l.bf16 %v2844_v32  ;;  %v2853_v4 = vrot.slane %v2852_v19, 4 }
 0x43f   : > { %v2758_v43 = vadd.f32 %v5076_v55, %v2739_v17  ;;  %v2611_v33 = vmul.f32 %v3367_v51, %v2610_v41  ;;  %v2617_v6 = vmul.f32 %v5259_v9, %v5235_v18  ;;  %vm2623_vm5 = vweird.f32 %v5259_v9  ;;  %v5315_v17 = vld [vmem:[%s3521_s13 + $0x50] sm:$0x1] }
 0x440   : > { %v5254_v37 = vpop.xlane.xlu2 %2378  ;;  %v2419_v44 = vpop.xlane.xlu0 %2418  ;;  %3041 = vst.msk [vmem:[%s5093_s8 + $0x60] sm:$0xff] %vm783_vm3, %v3025_v36  ;;  %v2868_v49 = vsel %vm5053_vm7, %v5279_v42, %v5262_v47  ;;  %v2951_v52 = vshll.u32 %v5286_v15, 16  ;;  %v5303_v31 = vmul.f32 0.25, %v5185_v62  ;;  %vm2622_vm6 = vweird.f32 %v5235_v18  ;;  %v327_v18 = vld [vmem:[%s3521_s13 + $0x48] sm:$0xf] }
 0x441   : > { %v2467_v21 = vmul.f32 0.25, %v2419_v44  ;;  %v3001_v27 = vadd.f32 %v2985_v5, %v2758_v43  ;;  %v2615_v29 = vsel %vm2614_vm4, %v3367_v51, %v2611_v33  ;;  %v2618_v40 = vmul.f32 %v5259_v9, %v2617_v6  ;;  %vm2624_vm8 = vmor %vm2622_vm6, %vm2623_vm5 }
 0x442   : > { %v2721_v22 = vmul.f32 %v2615_v29, %v2529_v23  ;;  %v2940_v36 = vsel %vm5053_vm7, %v5288_v14, %v5283_v1  ;;  %v2889_v62 = vshll.u32 %v5315_v17, 16  ;;  %v2955_v41 = vshrl.u32 %v5286_v15, 16  ;;  %v328_v15 = vld [vmem:[%s3521_s13 + $0x4c] sm:$0xf] }
 0x443   : > { %v2499_v61 = vsub.f32 %v2467_v21, %v2483_v13  ;;  %v3017_v2 = vmax.f32 %v3001_v27, 0.0  ;;  %v2619_v30 = vmul.f32 0.5, %v2618_v40  ;;  %v2530_v21 = vsub.f32 %v4988_v20, %v5204_v24 }
 0x444   : > { %v2740_v51 = vmul.f32 %v5066_v50, %v2721_v22  ;;  %v2858_v10 = vsel %vm5053_vm7, %v2853_v4, %v5224_v35  ;;  %v2489_v20 = vmul.f32 %v5303_v31, %v5303_v31  ;;  %v2870_v33 = vshrl.u32 %v327_v18, 16 }
 0x445   : > { %v2515_v58 = vmax.f32 %v2499_v61, 0.0  ;;  %3033 = vst.msk [vmem:[%s5093_s8 + $0x20] sm:$0xff] %vm783_vm3, %v3017_v2  ;;  %v2620_v59 = vsub.f32 1.5, %v2619_v30  ;;  %v5328_v61 = vrot.slane %v2951_v52, 5  ;;  %v2873_v6 = vshll.u32 %v327_v18, 16 }
 0x446   : > { %v2759_v38 = vadd.f32 %v5076_v55, %v2740_v51  ;;  %v2987_v35 = vunpack.c.l.bf16 %v2858_v10  ;;  %v5339_v29 = vmul.f32 0.25, %v5232_v63  ;;  %v5342_v19 = vmul.f32 0.25, %v5254_v37 }
 0x447   : > { %v5281_v45 = vadd.f32 1e-05, %v2515_v58  ;;  %v2621_v5 = vmul.f32 %v5259_v9, %v2620_v59  ;;  %v2872_v51 = vrot.slane %v2870_v33, 4  ;;  %v2875_v4 = vrot.slane %v2873_v6, 5 }
 0x448   : > { %v2422_v56 = vpop.xlane.xlu2 %2421  ;;  %v2358_v48 = vpop.xlane.xlu0 %2357  ;;  %v3002_v13 = vadd.f32 %v2986_v57, %v2759_v38  ;;  %v2957_v6 = vrot.slane %v2955_v41, 4  ;;  %v2988_v41 = vunpack.c.l.bf16 %v2868_v49 }
 0x449   : > { %3370 = vrsqrt.f32 %v5281_v45  ;;  %v5295_v53 = vmul.f32 0.25, %v2358_v48  ;;  %v2468_v11 = vmul.f32 0.25, %v2422_v56  ;;  %v2625_v12 = vsel %vm2624_vm8, %v5259_v9, %v2621_v5 }
 0x44a   : > { %v3018_v24 = vmax.f32 %v3002_v13, 0.0  ;;  %v2722_v60 = vmul.f32 %v2625_v12, %v2530_v21  ;;  %v2491_v5 = vmul.f32 %v5342_v19, %v5342_v19  ;;  %v2883_v13 = vshrl.u32 %v328_v15, 16 }
 0x44b   : > { %v2484_v7 = vmul.f32 %v5295_v53, %v5295_v53  ;;  %vm2632_vm15 = vweird.f32 %v5281_v45  ;;  %v2876_v12 = vor.u32 %v2875_v4, %v2872_v51  ;;  %v336_v51 = vld [vmem:[%s3521_s13 + $0x6c] sm:$0xf] }
 0x44c   : > { %v2425_v44 = vpop.xlane.xlu1 %2424  ;;  %3034 = vst.msk [vmem:[%s5093_s8 + $0x28] sm:$0xff] %vm783_vm3, %v3018_v24  ;;  %v2741_v9 = vmul.f32 %v5066_v50, %v2722_v60  ;;  %v2531_v24 = vsub.f32 %v4995_v54, %v5251_v25 }
 0x44d   : > { %v2500_v34 = vsub.f32 %v2468_v11, %v2484_v7  ;;  %v2469_v30 = vmul.f32 0.25, %v2425_v44  ;;  %v2879_v7 = vshll.u32 %v328_v15, 16  ;;  %v2877_v54 = vrot.slane %v2876_v12, 4 }
 0x44e   : > { %v2760_v22 = vadd.f32 %v5076_v55, %v2741_v9 }
 0x44f   : > { %v3371_v43 = vpop.eup %3370  ;;  %v2516_v26 = vmax.f32 %v2500_v34, 0.0  ;;  %v2881_v25 = vrot.slane %v2879_v7, 5 }
 0x450   : > { %v2627_v0 = vmul.f32 %v3371_v43, %v5281_v45  ;;  %v2361_v27 = vpop.xlane.xlu2 %2360  ;;  %v2437_v23 = vpop.xlane.xlu0 %2436  ;;  %v3003_v59 = vadd.f32 %v2987_v35, %v2760_v22  ;;  %vm2633_vm14 = vweird.f32 %v3371_v43  ;;  %v2490_v35 = vmul.f32 %v5339_v29, %v5339_v29 }
 0x451   : > { %v5336_v58 = vmul.f32 0.25, %v2361_v27  ;;  %v2473_v32 = vmul.f32 0.25, %v2437_v23  ;;  %v5344_v2 = vadd.f32 1e-05, %v2516_v26  ;;  %vm2634_vm11 = vmor %vm2632_vm15, %vm2633_vm14  ;;  %v3391_v26 = vld [vmem:[%s3521_s13 + $0x74] sm:$0x1]  ;;  %v2882_v1 = vsel %vm5053_vm7, %v2877_v54, %v2881_v25 }
 0x452   : > { %v2628_v40 = vmul.f32 %v3371_v43, %v2627_v0  ;;  %v3019_v44 = vmax.f32 %v3003_v59, 0.0  ;;  %v2961_v27 = vshll.u32 %v3391_v26, 16 }
 0x453   : > { %v2485_v56 = vmul.f32 %v5336_v58, %v5336_v58  ;;  %v2505_v48 = vsub.f32 %v2473_v32, %v2489_v20  ;;  %3372 = vrsqrt.f32 %v5344_v2  ;;  %vm2642_vm10 = vweird.f32 %v5344_v2 }
 0x454   : > { %v2629_v57 = vmul.f32 0.5, %v2628_v40  ;;  %v2443_v63 = vpop.xlane.xlu1 %2442  ;;  %3035 = vst.msk [vmem:[%s5093_s8 + $0x30] sm:$0xff] %vm783_vm3, %v3019_v44  ;;  %v2885_v40 = vrot.slane %v2883_v13, 4  ;;  %v5388_v47 = vrot.slane %v2961_v27, 5  ;;  %v2945_v44 = vshll.u32 %v336_v51, 16 }
 0x455   : > { %v2501_v37 = vsub.f32 %v2469_v30, %v2485_v56  ;;  %v2521_v52 = vmax.f32 %v2505_v48, 0.0  ;;  %v2475_v38 = vmul.f32 0.25, %v2443_v63  ;;  %v5381_v56 = vunpack.c.l.bf16 %v2940_v36 }
 0x456   : > { %v2630_v11 = vsub.f32 1.5, %v2629_v57  ;;  %v5385_v48 = vrot.slane %v2889_v62, 5  ;;  %v2958_v63 = vor.u32 %v2957_v6, %v5328_v61  ;;  %v2886_v14 = vor.u32 %v2885_v40, %v2881_v25 }
 0x457   : > { %v2517_v21 = vmax.f32 %v2501_v37, 0.0  ;;  %v5353_v18 = vadd.f32 1e-05, %v2521_v52  ;;  %v2507_v34 = vsub.f32 %v2475_v38, %v2491_v5  ;;  %v2942_v5 = vshrl.u32 %v336_v51, 16 }
 0x458   : > { %v2631_v10 = vmul.f32 %v3371_v43, %v2630_v11  ;;  %v2440_v20 = vpop.xlane.xlu2 %2439  ;;  %v2533_v54 = vsub.f32 %v5017_v3, %v5336_v58 }
 0x459   : > { %v5360_v60 = vadd.f32 1e-05, %v2517_v21  ;;  %3374 = vrsqrt.f32 %v5353_v18  ;;  %v2474_v0 = vmul.f32 0.25, %v2440_v20  ;;  %v3373_v33 = vpop.eup %3372  ;;  %v2523_v45 = vmax.f32 %v2507_v34, 0.0 }
 0x45a   : > { %v2635_v23 = vsel %vm2634_vm11, %v3371_v43, %v2631_v10  ;;  %v2637_v32 = vmul.f32 %v3373_v33, %v5344_v2  ;;  %vm2643_vm9 = vweird.f32 %v3373_v33  ;;  %v2959_v21 = vrot.slane %v2958_v63, 4 }
 0x45b   : > { %v2723_v9 = vmul.f32 %v2635_v23, %v2531_v24  ;;  %3376 = vrsqrt.f32 %v5360_v60  ;;  %v5368_v22 = vadd.f32 1e-05, %v2523_v45  ;;  %v2506_v30 = vsub.f32 %v2474_v0, %v2490_v35  ;;  %vm2644_vm13 = vmor %vm2642_vm10, %vm2643_vm9 }
 0x45c   : > { %v2638_v15 = vmul.f32 %v3373_v33, %v2637_v32  ;;  %v2532_v10 = vsub.f32 %v5010_v46, %v5295_v53  ;;  %v2989_v2 = vunpack.c.l.bf16 %v2882_v1  ;;  %v2887_v24 = vrot.slane %v2886_v14, 4 }
 0x45d   : > { %v2742_v43 = vmul.f32 %v5066_v50, %v2723_v9  ;;  %3378 = vrsqrt.f32 %v5368_v22  ;;  %v2522_v4 = vmax.f32 %v2506_v30, 0.0  ;;  %vm2692_vm1 = vweird.f32 %v5353_v18 }
 0x45e   : > { %v2639_v49 = vmul.f32 0.5, %v2638_v15  ;;  %v2944_v45 = vrot.slane %v2942_v5, 4  ;;  %v2947_v35 = vrot.slane %v2945_v44, 5  ;;  %vm2652_vm12 = vweird.f32 %v5360_v60 }
 0x45f   : > { %v3375_v57 = vpop.eup %3374  ;;  %v2761_v42 = vadd.f32 %v5076_v55, %v2742_v43  ;;  %v5396_v37 = vadd.f32 1e-05, %v2522_v4  ;;  %v2892_v15 = vsel %vm5053_vm7, %v2887_v24, %v5385_v48  ;;  %vm2712_vm8 = vweird.f32 %v5368_v22 }
 0x460   : > { %v2687_v36 = vmul.f32 %v3375_v57, %v5353_v18  ;;  %v2640_v59 = vsub.f32 1.5, %v2639_v49  ;;  %vm2693_vm0 = vweird.f32 %v3375_v57  ;;  %v2948_v58 = vor.u32 %v2947_v35, %v2944_v45 }
 0x461   : > { %v3377_v17 = vpop.eup %3376  ;;  %v3004_v62 = vadd.f32 %v2988_v41, %v2761_v42  ;;  %3380 = vrsqrt.f32 %v5396_v37  ;;  %vm2694_vm4 = vmor %vm2692_vm1, %vm2693_vm0  ;;  %v2539_v48 = vsub.f32 %v5005_v16, %v5342_v19  ;;  %v2990_v1 = vunpack.c.l.bf16 %v2892_v15 }
 0x462   : > { %v2647_v52 = vmul.f32 %v3377_v17, %v5360_v60  ;;  %v2688_v38 = vmul.f32 %v3375_v57, %v2687_v36  ;;  %v2641_v7 = vmul.f32 %v3373_v33, %v2640_v59  ;;  %vm2653_vm2 = vweird.f32 %v3377_v17 }
 0x463   : > { %v3020_v11 = vmax.f32 %v3004_v62, 0.0  ;;  %v3379_v13 = vpop.eup %3378  ;;  %vm2654_vm5 = vmor %vm2652_vm12, %vm2653_vm2  ;;  %vm2702_vm11 = vweird.f32 %v5396_v37  ;;  %v2538_v5 = vsub.f32 %v4997_v28, %v5339_v29  ;;  %v3392_v29 = vld [vmem:[%s5473_s5] ss:$0 sm:$0xff] }
 0x464   : > { %v2648_v12 = vmul.f32 %v3377_v17, %v2647_v52  ;;  %v2689_v34 = vmul.f32 0.5, %v2688_v38  ;;  %v2645_v20 = vsel %vm2644_vm13, %v3373_v33, %v2641_v7  ;;  %v2707_v0 = vmul.f32 %v3379_v13, %v5368_v22 }
 0x465   : > { %3036 = vst.msk [vmem:[%s5093_s8 + $0x38] sm:$0xff] %vm783_vm3, %v3020_v11  ;;  %v2724_v6 = vmul.f32 %v2645_v20, %v2532_v10  ;;  %v2537_v33 = vsub.f32 %v4984_v8, %v5303_v31  ;;  %vm2713_vm6 = vweird.f32 %v3379_v13  ;;  %v2949_v22 = vrot.slane %v2948_v58, 4 }
 0x466   : > { %v2649_v26 = vmul.f32 0.5, %v2648_v12  ;;  %v2690_v27 = vsub.f32 1.5, %v2689_v34  ;;  %v2708_v23 = vmul.f32 %v3379_v13, %v2707_v0  ;;  %vm2714_vm14 = vmor %vm2712_vm8, %vm2713_vm6 }
 0x467   : > { %v2743_v46 = vmul.f32 %v5066_v50, %v2724_v6  ;;  %v3381_v32 = vpop.eup %3380 }
 0x468   : > { %v2650_v53 = vsub.f32 1.5, %v2649_v26  ;;  %v2691_v9 = vmul.f32 %v3375_v57, %v2690_v27  ;;  %v2709_v25 = vmul.f32 0.5, %v2708_v23  ;;  %v2697_v43 = vmul.f32 %v3381_v32, %v5396_v37 }
 0x469   : > { %v2762_v18 = vadd.f32 %v5076_v55, %v2743_v46  ;;  %vm2703_vm15 = vweird.f32 %v3381_v32 }
 0x46a   : > { %v2651_v40 = vmul.f32 %v3377_v17, %v2650_v53  ;;  %v2695_v41 = vsel %vm2694_vm4, %v3375_v57, %v2691_v9  ;;  %v2710_v8 = vsub.f32 1.5, %v2709_v25  ;;  %v2698_v60 = vmul.f32 %v3381_v32, %v2697_v43  ;;  %vm2704_vm9 = vmor %vm2702_vm11, %vm2703_vm15 }
 0x46b   : > { %v2729_v30 = vmul.f32 %v2695_v41, %v2537_v33  ;;  %v3005_v31 = vadd.f32 %v2989_v2, %v2762_v18  ;;  %v2964_v57 = vsel %vm5053_vm7, %v2959_v21, %v5388_v47 }
 0x46c   : > { %v2655_v3 = vsel %vm2654_vm5, %v3377_v17, %v2651_v40  ;;  %v2711_v51 = vmul.f32 %v3379_v13, %v2710_v8  ;;  %v2699_v63 = vmul.f32 0.5, %v2698_v60  ;;  %v2996_v19 = vunpack.c.l.bf16 %v2964_v57 }
 0x46d   : > { %v2725_v42 = vmul.f32 %v2655_v3, %v2533_v54  ;;  %v2748_v49 = vmul.f32 %v5066_v50, %v2729_v30  ;;  %v3021_v4 = vmax.f32 %v3005_v31, 0.0 }
 0x46e   : > { %v2715_v17 = vsel %vm2714_vm14, %v3379_v13, %v2711_v51  ;;  %v2700_v59 = vsub.f32 1.5, %v2699_v63 }
 0x46f   : > { %v2744_v14 = vmul.f32 %v5066_v50, %v2725_v42  ;;  %v2767_v36 = vadd.f32 %v5076_v55, %v2748_v49  ;;  %3037 = vst.msk [vmem:[%s5093_s8 + $0x40] sm:$0xff] %vm783_vm3, %v3021_v4  ;;  %v2731_v62 = vmul.f32 %v2715_v17, %v2539_v48 }
 0x470   : > { %v2701_v38 = vmul.f32 %v3381_v32, %v2700_v59 }
 0x471   : > { %v2763_v47 = vadd.f32 %v5076_v55, %v2744_v14  ;;  %v3010_v16 = vadd.f32 %v5381_v56, %v2767_v36  ;;  %v2750_v52 = vmul.f32 %v5066_v50, %v2731_v62  ;;  %v2954_v56 = vsel %vm5053_vm7, %v2949_v22, %v5328_v61 }
 0x472   : > { %v2705_v13 = vsel %vm2704_vm9, %v3381_v32, %v2701_v38  ;;  %v2995_v28 = vunpack.c.l.bf16 %v2954_v56 }
 0x473   : > { %v3006_v11 = vadd.f32 %v2990_v1, %v2763_v47  ;;  %v3026_v7 = vmax.f32 %v3010_v16, 0.0  ;;  %v2769_v44 = vadd.f32 %v5076_v55, %v2750_v52  ;;  %v2730_v50 = vmul.f32 %v2705_v13, %v2538_v5 }
 0x475   : > { %v3022_v21 = vmax.f32 %v3006_v11, 0.0  ;;  %3042 = vst.msk [vmem:[%s5093_s8 + $0x68] sm:$0xff] %vm783_vm3, %v3026_v7  ;;  %v3012_v37 = vadd.f32 %v2996_v19, %v2769_v44  ;;  %v2749_v10 = vmul.f32 %v3392_v29, %v2730_v50 }
 0x477   : > { %3038 = vst.msk [vmem:[%s5093_s8 + $0x48] sm:$0xff] %vm783_vm3, %v3022_v21  ;;  %v3028_v55 = vmax.f32 %v3012_v37, 0.0  ;;  %v2768_v61 = vadd.f32 %v3393_v39, %v2749_v10 }
 0x479   : > { %3044 = vst.msk [vmem:[%s5093_s8 + $0x78] sm:$0xff] %vm783_vm3, %v3028_v55  ;;  %v3011_v12 = vadd.f32 %v2995_v28, %v2768_v61 }
 0x47b   : > { %v3027_v34 = vmax.f32 %v3011_v12, 0.0 }
 0x47d   : > { %3043 = vst.msk [vmem:[%s5093_s8 + $0x70] sm:$0xff] %vm783_vm3, %v3027_v34 }
 0x47e PF: > { %s17_s28 = sadd.s32 1, %s3432_s28   ;;  %s5526_s24 = smov %s3424_s26 }
 0x47f   : > { %p14_p9 = scmp.ge.s32.totalorder %s17_s28, 6   ;;  %s5527_s25 = smov %s3428_s27 }
 0x480   : > { %s5528_s26 = smov %s5531_s29  ;;  %s5529_s27 = smov %s5535_s30 }
 0x481   :  { %16 = sbr.rel (!%p14_p9) target bundleno = 3 (0x3), region = 79 }

</bundles_post_ra>
